<compile_context>
chip_gen: v7x
topology: tpu7x:2x2x1
jax: 0.10.0
libtpu: 0.0.40
codegen_flags: <defaults>
</compile_context>

<pallas_src>
import functools

import numpy as np

import jax
import jax.numpy as jnp
from jax.experimental import pallas as pl
from jax.experimental.pallas import tpu as pltpu


# ----------------------------- small config ---------------------------------
CONFIG = dict(
    postnet_filter_size=5,
    postnet_fsmn_num_layers=2,
    postnet_num_memory_units=32,
    postnet_ffn_inner_dim=32,
    postnet_dropout=0.0,      # eval / inference: dropout is identity
    postnet_shift=0,
    postnet_lstm_units=32,
    num_mels=8,
)


# ------------------------- fused PostNet kernel ------------------------------
def _postnet_kernel(x_ref, sm_ref, *rest, B, T, residuals):
    """Fused FSMN stack + LSTM + Linear.  All activations stay on-chip."""
    nl = len(residuals)
    layer_refs = rest[:4 * nl]
    (wih_ref, whh_ref, bab_ref, wfc_ref, bfc_ref, o_ref, hseq_ref) = rest[4 * nl:]

    f32 = jnp.float32
    fs = sm_ref.shape[0]

    # ---------------- FSMN encoder (FFN + depthwise memory block) ------------
    h = x_ref[...]                                   # (B*T, d_in)
    for li in range(nl):
        w1_ref, b1_ref, w2_ref, dw_ref = layer_refs[4 * li:4 * li + 4]

        # FeedForwardNetV2: w2(relu(w1(x))) -- kernel-size-1 convs == matmuls,
        # B and T folded into the MXU M dimension.
        a = jnp.maximum(
            jnp.dot(h, w1_ref[...], preferred_element_type=f32) + b1_ref[...], 0.0)
        ctx = jnp.dot(a, w2_ref[...], preferred_element_type=f32)    # (BT, Dm)

        # MemoryBlockV2: depthwise conv over time with zero padding.  Each tap
        # k is a banded shift+pad matrix S_k (built wrapper-side, also handles
        # the batch boundary), applied on the idle MXU: shifted_k = S_k @ ctx.
        dw = dw_ref[...]                             # (fs, Dm) depthwise taps
        acc = ctx                                    # memory-block residual (out += in)
        for k in range(fs):                          # static, unrolled taps
            shifted = jnp.dot(sm_ref[k], ctx, preferred_element_type=f32)
            acc = acc + shifted * dw[k:k + 1, :]
        mem = acc
        if residuals[li]:                            # encoder residual if dims match
            mem = mem + h
        h = mem

    # ------------------------------- LSTM -------------------------------------
    H8 = wih_ref.shape[1]                            # 8H (two 4H gate halves)
    H = H8 // 8
    H4 = 4 * H

    # Input contribution for all (b, t) at once: one bulk MXU matmul (off the
    # serial chain); per-step slices of gx3 are chain-independent.
    gx = jnp.dot(h, wih_ref[...], preferred_element_type=f32) + bab_ref[...]   # (BT, 8H)
    gx3 = gx.reshape(B, T, H8)
    whh_ab = whh_ref[...]                            # (4H, 8H); rows [H:] are zero

    # Block-layout state: real c / h live in lanes [0, H); other lanes carry
    # bounded junk that is annihilated by the zero rows of whh_ab / wfc_blk.
    c_full = jnp.zeros((B, H4), f32)
    h_full = jnp.zeros((B, H4), f32)
    for t in range(T):                               # static unroll; per-step live
        gates = gx3[:, t, :] + jnp.dot(h_full, whh_ab,         # state is just (h, c)
                                       preferred_element_type=f32)   # (B, 8H)
        gA = gates[:, :H4]                           # [ i | . | g | . ] (vreg-aligned)
        gB = gates[:, H4:]                           # [ f | . | o | . ]
        sA = jax.nn.sigmoid(gA)                      # full-width EUP ops
        tA = jnp.tanh(gA)
        sB = jax.nn.sigmoid(gB)
        ig = sA * pltpu.roll(tA, 2 * H, axis=1)      # lanes[0:H): sigmoid(i)*tanh(g)
        c_full = sB * c_full + ig                    # lanes[0:H): f*c + i*g
        h_full = pltpu.roll(sB, 2 * H, axis=1) * jnp.tanh(c_full)   # o*tanh(c)
        hseq_ref[:, t * H:(t + 1) * H] = h_full[:, :H]   # idle vst slot, frees vregs

    # ---------------- final nn.Linear: block-diagonal, lane-dense output ------
    o_ref[...] = (jnp.dot(hseq_ref[...], wfc_ref[...], preferred_element_type=f32)
                  + bfc_ref[...])                    # (B, T*num_mels), 128 lanes


# ----------------------------- parameters ------------------------------------
def init_params(key, config):
    nm = config['num_mels']
    dm = config['postnet_num_memory_units']
    hf = config['postnet_ffn_inner_dim']
    fs = config['postnet_filter_size']
    nl = config['postnet_fsmn_num_layers']
    hl = config['postnet_lstm_units']
    keys = iter(jax.random.split(key, 4 * nl + 5))
    params = {'fsmn': []}
    d_in = nm
    for _ in range(nl):
        w1 = 0.1 * jax.random.normal(next(keys), (d_in, hf), jnp.float32)
        b1 = 0.1 * jax.random.normal(next(keys), (1, hf), jnp.float32)
        w2 = 0.1 * jax.random.normal(next(keys), (hf, dm), jnp.float32)
        dw = 0.1 * jax.random.normal(next(keys), (fs, dm), jnp.float32)  # depthwise taps
        params['fsmn'].append((w1, b1, w2, dw))
        d_in = dm
    params['wih'] = 0.1 * jax.random.normal(next(keys), (dm, 4 * hl), jnp.float32)
    params['whh'] = 0.1 * jax.random.normal(next(keys), (hl, 4 * hl), jnp.float32)
    # NOTE: equals PyTorch b_ih + b_hh when importing real checkpoints.
    params['b_lstm'] = 0.1 * jax.random.normal(next(keys), (1, 4 * hl), jnp.float32)
    params['wfc'] = 0.1 * jax.random.normal(next(keys), (hl, nm), jnp.float32)
    params['bfc'] = 0.1 * jax.random.normal(next(keys), (1, nm), jnp.float32)
    return params


def _paddings(config):
    fs = config['postnet_filter_size']
    shift = config['postnet_shift']
    lp = int(round((fs - 1) / 2))
    rp = int((fs - 1) / 2)
    if shift > 0:
        lp += shift
        rp -= shift
    assert lp >= 0 and rp >= 0, "postnet_shift too large for postnet_filter_size"
    return lp, rp


# --------------------- wrapper-side weight / matrix packing -------------------
def _build_shift_mats(B, T, fs, lp):
    """Banded shift+zero-pad matrices: (S_k @ ctx)[b*T+t] = ctx[b*T+t+k-lp] or 0."""
    BT = B * T
    m = np.zeros((fs, BT, BT), np.float32)
    for k in range(fs):
        s = k - lp
        for b in range(B):
            for t in range(T):
                tp = t + s
                if 0 <= tp < T:
                    m[k, b * T + t, b * T + tp] = 1.0
    return jnp.asarray(m)


def _pack_lstm_gate_blocks(wih, whh, b, H):
    """Repack LSTM weights into the [i|.|g|. || f|.|o|.] double-half lane layout.

    The f/o half sits 2H-lane-aligned with the i/g half so every in-loop gate
    alignment is a half-width pltpu.roll; unused blocks and recurrent rows
    beyond H are zero, so junk lanes of the block-layout state never leak in.
    """
    def blocks(w):
        return [w[:, j * H:(j + 1) * H] for j in range(4)]
    wi, wf, wg, wo = blocks(wih)
    ui, uf, ug, uo = blocks(whh)
    bi, bf, bg, bo = blocks(b)
    zw, zu, zb = jnp.zeros_like(wi), jnp.zeros_like(ui), jnp.zeros_like(bi)
    wih_ab = jnp.concatenate([wi, zw, wg, zw, wf, zw, wo, zw], axis=1)   # (Dm, 8H)
    u_top = jnp.concatenate([ui, zu, ug, zu, uf, zu, uo, zu], axis=1)    # (H, 8H)
    whh_ab = jnp.concatenate(
        [u_top, jnp.zeros((3 * H, 8 * H), u_top.dtype)], axis=0)         # (4H, 8H)
    b_ab = jnp.concatenate([bi, zb, bg, zb, bf, zb, bo, zb], axis=1)     # (1, 8H)
    return wih_ab, whh_ab, b_ab


# ----------------------------- forward (Pallas) -------------------------------
def postnet_forward(x, params, config):
    B, T, nm = x.shape
    lp, _rp = _paddings(config)
    fs = config['postnet_filter_size']
    H = config['postnet_lstm_units']

    shift_mats = _build_shift_mats(B, T, fs, lp)

    flat_args = [x.reshape(B * T, nm).astype(jnp.float32), shift_mats]
    residuals = []
    d_in = nm
    for (w1, b1, w2, dw) in params['fsmn']:
        flat_args += [w1, b1, w2, dw]
        residuals.append(bool(w2.shape[1] == d_in))   # FsmnEncoderV2 residual rule
        d_in = w2.shape[1]

    wih_ab, whh_ab, b_ab = _pack_lstm_gate_blocks(
        params['wih'], params['whh'], params['b_lstm'], H)
    # Block-diagonal FC weight + tiled bias -> output emitted lane-dense (B, T*nm).
    wfc_blk = jnp.kron(jnp.eye(T, dtype=jnp.float32), params['wfc'])     # (T*H, T*nm)
    bfc_blk = jnp.tile(params['bfc'], (1, T))                            # (1, T*nm)
    flat_args += [wih_ab, whh_ab, b_ab, wfc_blk, bfc_blk]

    kernel = functools.partial(_postnet_kernel, B=B, T=T, residuals=tuple(residuals))
    vmem = pl.BlockSpec(memory_space=pltpu.MemorySpace.VMEM)
    out = pl.pallas_call(
        kernel,
        out_shape=jax.ShapeDtypeStruct((B, T * nm), jnp.float32),        # lane-dense slab
        in_specs=[vmem] * len(flat_args),
        out_specs=vmem,
        scratch_shapes=[pltpu.VMEM((B, T * H), jnp.float32)],            # hidden sequence
    )(*flat_args)
    return out.reshape(B, T, nm)


# ----------------------------- reference (pure JAX) ---------------------------
def postnet_reference(x, params, config):
    lp, rp = _paddings(config)
    fs = config['postnet_filter_size']
    H = config['postnet_lstm_units']
    h = x
    for (w1, b1, w2, dw) in params['fsmn']:
        ctx = jnp.maximum(jnp.einsum('btd,dh->bth', h, w1) + b1[None], 0.0)
        ctx = jnp.einsum('bth,hm->btm', ctx, w2)
        T = ctx.shape[1]
        cpad = jnp.pad(ctx, ((0, 0), (lp, rp), (0, 0)))
        acc = jnp.zeros_like(ctx)
        for k in range(fs):
            acc = acc + cpad[:, k:k + T, :] * dw[k][None, None, :]
        mem = ctx + acc
        if mem.shape[-1] == h.shape[-1]:
            mem = mem + h
        h = mem
    B, T, _ = h.shape
    hs = jnp.zeros((B, H), jnp.float32)
    cs = jnp.zeros((B, H), jnp.float32)
    outs = []
    for t in range(T):
        gates = h[:, t, :] @ params['wih'] + hs @ params['whh'] + params['b_lstm']
        i = jax.nn.sigmoid(gates[:, 0 * H:1 * H])
        f = jax.nn.sigmoid(gates[:, 1 * H:2 * H])
        g = jnp.tanh(gates[:, 2 * H:3 * H])
        o = jax.nn.sigmoid(gates[:, 3 * H:4 * H])
        cs = f * cs + i * g
        hs = o * jnp.tanh(cs)
        outs.append(hs)
    hseq = jnp.stack(outs, axis=1)
    return hseq @ params['wfc'] + params['bfc'][None]


# ------------------------------------ main ------------------------------------
if __name__ == "__main__":
    key = jax.random.PRNGKey(0)
    kx, kp = jax.random.split(key)
    B, T = 2, 16
    x = jax.random.normal(kx, (B, T, CONFIG['num_mels']), jnp.float32)
    params = init_params(kp, CONFIG)

    out = postnet_forward(x, params, CONFIG)
    out = jax.block_until_ready(out)

    ref = postnet_reference(x, params, CONFIG)
    assert out.shape == (B, T, CONFIG['num_mels'])
    assert jnp.allclose(out, ref, atol=1e-4, rtol=1e-4), "mismatch vs pure-JAX reference"
    print("KERNEL_OK")
</pallas_src>

<mosaic_0001>
module attributes {stable_mosaic.version = 11 : i64} {
  func.func @_postnet_kernel(%arg0: memref<32x8xf32, #tpu.memory_space<vmem>>, %arg1: memref<5x32x32xf32, #tpu.memory_space<vmem>>, %arg2: memref<8x32xf32, #tpu.memory_space<vmem>>, %arg3: memref<1x32xf32, #tpu.memory_space<vmem>>, %arg4: memref<32x32xf32, #tpu.memory_space<vmem>>, %arg5: memref<5x32xf32, #tpu.memory_space<vmem>>, %arg6: memref<32x32xf32, #tpu.memory_space<vmem>>, %arg7: memref<1x32xf32, #tpu.memory_space<vmem>>, %arg8: memref<32x32xf32, #tpu.memory_space<vmem>>, %arg9: memref<5x32xf32, #tpu.memory_space<vmem>>, %arg10: memref<32x256xf32, #tpu.memory_space<vmem>>, %arg11: memref<128x256xf32, #tpu.memory_space<vmem>>, %arg12: memref<1x256xf32, #tpu.memory_space<vmem>>, %arg13: memref<512x128xf32, #tpu.memory_space<vmem>>, %arg14: memref<1x128xf32, #tpu.memory_space<vmem>>, %arg15: memref<2x128xf32, #tpu.memory_space<vmem>>, %arg16: memref<2x512xf32, #tpu.memory_space<vmem>>) attributes {dimension_semantics = [], scalar_prefetch = 0 : i64, scratch_operands = 1 : i64, tpu.core_type = #tpu.core_type<tc>} {
    %c0 = arith.constant 0 : index
    %c0_0 = arith.constant 0 : index
    %0 = vector.load %arg0[%c0, %c0_0] : memref<32x8xf32, #tpu.memory_space<vmem>>, vector<32x8xf32>
    %c0_1 = arith.constant 0 : index
    %c0_2 = arith.constant 0 : index
    %1 = vector.load %arg2[%c0_1, %c0_2] : memref<8x32xf32, #tpu.memory_space<vmem>>, vector<8x32xf32>
    %cst = arith.constant dense<0.000000e+00> : vector<32x32xf32>
    %2 = tpu.matmul %0, %1, %cst {dimension_numbers = #tpu.dot_dimension_numbers<[1], [0], [0], [1], [0, 0, 1, 1], [], []>} : vector<32x8xf32>, vector<8x32xf32>, vector<32x32xf32> -> vector<32x32xf32>
    %c0_3 = arith.constant 0 : index
    %c0_4 = arith.constant 0 : index
    %3 = vector.load %arg3[%c0_3, %c0_4] : memref<1x32xf32, #tpu.memory_space<vmem>>, vector<1x32xf32>
    %4 = vector.broadcast %3 : vector<1x32xf32> to vector<32x32xf32>
    %5 = arith.addf %2, %4 : vector<32x32xf32>
    %cst_5 = arith.constant 0.000000e+00 : f32
    %6 = vector.broadcast %cst_5 : f32 to vector<32x32xf32>
    %7 = arith.maximumf %5, %6 : vector<32x32xf32>
    %c0_6 = arith.constant 0 : index
    %c0_7 = arith.constant 0 : index
    %8 = vector.load %arg4[%c0_6, %c0_7] : memref<32x32xf32, #tpu.memory_space<vmem>>, vector<32x32xf32>
    %cst_8 = arith.constant dense<0.000000e+00> : vector<32x32xf32>
    %9 = tpu.matmul %7, %8, %cst_8 {dimension_numbers = #tpu.dot_dimension_numbers<[1], [0], [0], [1], [0, 0, 1, 1], [], []>} : vector<32x32xf32>, vector<32x32xf32>, vector<32x32xf32> -> vector<32x32xf32>
    %c0_9 = arith.constant 0 : index
    %c0_10 = arith.constant 0 : index
    %10 = vector.load %arg5[%c0_9, %c0_10] : memref<5x32xf32, #tpu.memory_space<vmem>>, vector<5x32xf32>
    %c0_11 = arith.constant 0 : index
    %c0_12 = arith.constant 0 : index
    %c0_13 = arith.constant 0 : index
    %11 = vector.load %arg1[%c0_11, %c0_12, %c0_13] : memref<5x32x32xf32, #tpu.memory_space<vmem>>, vector<1x32x32xf32>
    %12 = vector.shape_cast %11 : vector<1x32x32xf32> to vector<32x32xf32>
    %cst_14 = arith.constant dense<0.000000e+00> : vector<32x32xf32>
    %13 = tpu.matmul %12, %9, %cst_14 {dimension_numbers = #tpu.dot_dimension_numbers<[1], [0], [0], [1], [0, 0, 1, 1], [], []>} : vector<32x32xf32>, vector<32x32xf32>, vector<32x32xf32> -> vector<32x32xf32>
    %14 = vector.extract_strided_slice %10 {offsets = [0, 0], sizes = [1, 32], strides = [1, 1]} : vector<5x32xf32> to vector<1x32xf32>
    %15 = vector.broadcast %14 : vector<1x32xf32> to vector<32x32xf32>
    %16 = arith.mulf %13, %15 : vector<32x32xf32>
    %17 = arith.addf %9, %16 : vector<32x32xf32>
    %c1 = arith.constant 1 : index
    %c0_15 = arith.constant 0 : index
    %c0_16 = arith.constant 0 : index
    %18 = vector.load %arg1[%c1, %c0_15, %c0_16] : memref<5x32x32xf32, #tpu.memory_space<vmem>>, vector<1x32x32xf32>
    %19 = vector.shape_cast %18 : vector<1x32x32xf32> to vector<32x32xf32>
    %cst_17 = arith.constant dense<0.000000e+00> : vector<32x32xf32>
    %20 = tpu.matmul %19, %9, %cst_17 {dimension_numbers = #tpu.dot_dimension_numbers<[1], [0], [0], [1], [0, 0, 1, 1], [], []>} : vector<32x32xf32>, vector<32x32xf32>, vector<32x32xf32> -> vector<32x32xf32>
    %21 = vector.extract_strided_slice %10 {offsets = [1, 0], sizes = [1, 32], strides = [1, 1]} : vector<5x32xf32> to vector<1x32xf32>
    %22 = vector.broadcast %21 : vector<1x32xf32> to vector<32x32xf32>
    %23 = arith.mulf %20, %22 : vector<32x32xf32>
    %24 = arith.addf %17, %23 : vector<32x32xf32>
    %c2 = arith.constant 2 : index
    %c0_18 = arith.constant 0 : index
    %c0_19 = arith.constant 0 : index
    %25 = vector.load %arg1[%c2, %c0_18, %c0_19] : memref<5x32x32xf32, #tpu.memory_space<vmem>>, vector<1x32x32xf32>
    %26 = vector.shape_cast %25 : vector<1x32x32xf32> to vector<32x32xf32>
    %cst_20 = arith.constant dense<0.000000e+00> : vector<32x32xf32>
    %27 = tpu.matmul %26, %9, %cst_20 {dimension_numbers = #tpu.dot_dimension_numbers<[1], [0], [0], [1], [0, 0, 1, 1], [], []>} : vector<32x32xf32>, vector<32x32xf32>, vector<32x32xf32> -> vector<32x32xf32>
    %28 = vector.extract_strided_slice %10 {offsets = [2, 0], sizes = [1, 32], strides = [1, 1]} : vector<5x32xf32> to vector<1x32xf32>
    %29 = vector.broadcast %28 : vector<1x32xf32> to vector<32x32xf32>
    %30 = arith.mulf %27, %29 : vector<32x32xf32>
    %31 = arith.addf %24, %30 : vector<32x32xf32>
    %c3 = arith.constant 3 : index
    %c0_21 = arith.constant 0 : index
    %c0_22 = arith.constant 0 : index
    %32 = vector.load %arg1[%c3, %c0_21, %c0_22] : memref<5x32x32xf32, #tpu.memory_space<vmem>>, vector<1x32x32xf32>
    %33 = vector.shape_cast %32 : vector<1x32x32xf32> to vector<32x32xf32>
    %cst_23 = arith.constant dense<0.000000e+00> : vector<32x32xf32>
    %34 = tpu.matmul %33, %9, %cst_23 {dimension_numbers = #tpu.dot_dimension_numbers<[1], [0], [0], [1], [0, 0, 1, 1], [], []>} : vector<32x32xf32>, vector<32x32xf32>, vector<32x32xf32> -> vector<32x32xf32>
    %35 = vector.extract_strided_slice %10 {offsets = [3, 0], sizes = [1, 32], strides = [1, 1]} : vector<5x32xf32> to vector<1x32xf32>
    %36 = vector.broadcast %35 : vector<1x32xf32> to vector<32x32xf32>
    %37 = arith.mulf %34, %36 : vector<32x32xf32>
    %38 = arith.addf %31, %37 : vector<32x32xf32>
    %c4 = arith.constant 4 : index
    %c0_24 = arith.constant 0 : index
    %c0_25 = arith.constant 0 : index
    %39 = vector.load %arg1[%c4, %c0_24, %c0_25] : memref<5x32x32xf32, #tpu.memory_space<vmem>>, vector<1x32x32xf32>
    %40 = vector.shape_cast %39 : vector<1x32x32xf32> to vector<32x32xf32>
    %cst_26 = arith.constant dense<0.000000e+00> : vector<32x32xf32>
    %41 = tpu.matmul %40, %9, %cst_26 {dimension_numbers = #tpu.dot_dimension_numbers<[1], [0], [0], [1], [0, 0, 1, 1], [], []>} : vector<32x32xf32>, vector<32x32xf32>, vector<32x32xf32> -> vector<32x32xf32>
    %42 = vector.extract_strided_slice %10 {offsets = [4, 0], sizes = [1, 32], strides = [1, 1]} : vector<5x32xf32> to vector<1x32xf32>
    %43 = vector.broadcast %42 : vector<1x32xf32> to vector<32x32xf32>
    %44 = arith.mulf %41, %43 : vector<32x32xf32>
    %45 = arith.addf %38, %44 : vector<32x32xf32>
    %c0_27 = arith.constant 0 : index
    %c0_28 = arith.constant 0 : index
    %46 = vector.load %arg6[%c0_27, %c0_28] : memref<32x32xf32, #tpu.memory_space<vmem>>, vector<32x32xf32>
    %cst_29 = arith.constant dense<0.000000e+00> : vector<32x32xf32>
    %47 = tpu.matmul %45, %46, %cst_29 {dimension_numbers = #tpu.dot_dimension_numbers<[1], [0], [0], [1], [0, 0, 1, 1], [], []>} : vector<32x32xf32>, vector<32x32xf32>, vector<32x32xf32> -> vector<32x32xf32>
    %c0_30 = arith.constant 0 : index
    %c0_31 = arith.constant 0 : index
    %48 = vector.load %arg7[%c0_30, %c0_31] : memref<1x32xf32, #tpu.memory_space<vmem>>, vector<1x32xf32>
    %49 = vector.broadcast %48 : vector<1x32xf32> to vector<32x32xf32>
    %50 = arith.addf %47, %49 : vector<32x32xf32>
    %cst_32 = arith.constant 0.000000e+00 : f32
    %51 = vector.broadcast %cst_32 : f32 to vector<32x32xf32>
    %52 = arith.maximumf %50, %51 : vector<32x32xf32>
    %c0_33 = arith.constant 0 : index
    %c0_34 = arith.constant 0 : index
    %53 = vector.load %arg8[%c0_33, %c0_34] : memref<32x32xf32, #tpu.memory_space<vmem>>, vector<32x32xf32>
    %cst_35 = arith.constant dense<0.000000e+00> : vector<32x32xf32>
    %54 = tpu.matmul %52, %53, %cst_35 {dimension_numbers = #tpu.dot_dimension_numbers<[1], [0], [0], [1], [0, 0, 1, 1], [], []>} : vector<32x32xf32>, vector<32x32xf32>, vector<32x32xf32> -> vector<32x32xf32>
    %c0_36 = arith.constant 0 : index
    %c0_37 = arith.constant 0 : index
    %55 = vector.load %arg9[%c0_36, %c0_37] : memref<5x32xf32, #tpu.memory_space<vmem>>, vector<5x32xf32>
    %c0_38 = arith.constant 0 : index
    %c0_39 = arith.constant 0 : index
    %c0_40 = arith.constant 0 : index
    %56 = vector.load %arg1[%c0_38, %c0_39, %c0_40] : memref<5x32x32xf32, #tpu.memory_space<vmem>>, vector<1x32x32xf32>
    %57 = vector.shape_cast %56 : vector<1x32x32xf32> to vector<32x32xf32>
    %cst_41 = arith.constant dense<0.000000e+00> : vector<32x32xf32>
    %58 = tpu.matmul %57, %54, %cst_41 {dimension_numbers = #tpu.dot_dimension_numbers<[1], [0], [0], [1], [0, 0, 1, 1], [], []>} : vector<32x32xf32>, vector<32x32xf32>, vector<32x32xf32> -> vector<32x32xf32>
    %59 = vector.extract_strided_slice %55 {offsets = [0, 0], sizes = [1, 32], strides = [1, 1]} : vector<5x32xf32> to vector<1x32xf32>
    %60 = vector.broadcast %59 : vector<1x32xf32> to vector<32x32xf32>
    %61 = arith.mulf %58, %60 : vector<32x32xf32>
    %62 = arith.addf %54, %61 : vector<32x32xf32>
    %c1_42 = arith.constant 1 : index
    %c0_43 = arith.constant 0 : index
    %c0_44 = arith.constant 0 : index
    %63 = vector.load %arg1[%c1_42, %c0_43, %c0_44] : memref<5x32x32xf32, #tpu.memory_space<vmem>>, vector<1x32x32xf32>
    %64 = vector.shape_cast %63 : vector<1x32x32xf32> to vector<32x32xf32>
    %cst_45 = arith.constant dense<0.000000e+00> : vector<32x32xf32>
    %65 = tpu.matmul %64, %54, %cst_45 {dimension_numbers = #tpu.dot_dimension_numbers<[1], [0], [0], [1], [0, 0, 1, 1], [], []>} : vector<32x32xf32>, vector<32x32xf32>, vector<32x32xf32> -> vector<32x32xf32>
    %66 = vector.extract_strided_slice %55 {offsets = [1, 0], sizes = [1, 32], strides = [1, 1]} : vector<5x32xf32> to vector<1x32xf32>
    %67 = vector.broadcast %66 : vector<1x32xf32> to vector<32x32xf32>
    %68 = arith.mulf %65, %67 : vector<32x32xf32>
    %69 = arith.addf %62, %68 : vector<32x32xf32>
    %c2_46 = arith.constant 2 : index
    %c0_47 = arith.constant 0 : index
    %c0_48 = arith.constant 0 : index
    %70 = vector.load %arg1[%c2_46, %c0_47, %c0_48] : memref<5x32x32xf32, #tpu.memory_space<vmem>>, vector<1x32x32xf32>
    %71 = vector.shape_cast %70 : vector<1x32x32xf32> to vector<32x32xf32>
    %cst_49 = arith.constant dense<0.000000e+00> : vector<32x32xf32>
    %72 = tpu.matmul %71, %54, %cst_49 {dimension_numbers = #tpu.dot_dimension_numbers<[1], [0], [0], [1], [0, 0, 1, 1], [], []>} : vector<32x32xf32>, vector<32x32xf32>, vector<32x32xf32> -> vector<32x32xf32>
    %73 = vector.extract_strided_slice %55 {offsets = [2, 0], sizes = [1, 32], strides = [1, 1]} : vector<5x32xf32> to vector<1x32xf32>
    %74 = vector.broadcast %73 : vector<1x32xf32> to vector<32x32xf32>
    %75 = arith.mulf %72, %74 : vector<32x32xf32>
    %76 = arith.addf %69, %75 : vector<32x32xf32>
    %c3_50 = arith.constant 3 : index
    %c0_51 = arith.constant 0 : index
    %c0_52 = arith.constant 0 : index
    %77 = vector.load %arg1[%c3_50, %c0_51, %c0_52] : memref<5x32x32xf32, #tpu.memory_space<vmem>>, vector<1x32x32xf32>
    %78 = vector.shape_cast %77 : vector<1x32x32xf32> to vector<32x32xf32>
    %cst_53 = arith.constant dense<0.000000e+00> : vector<32x32xf32>
    %79 = tpu.matmul %78, %54, %cst_53 {dimension_numbers = #tpu.dot_dimension_numbers<[1], [0], [0], [1], [0, 0, 1, 1], [], []>} : vector<32x32xf32>, vector<32x32xf32>, vector<32x32xf32> -> vector<32x32xf32>
    %80 = vector.extract_strided_slice %55 {offsets = [3, 0], sizes = [1, 32], strides = [1, 1]} : vector<5x32xf32> to vector<1x32xf32>
    %81 = vector.broadcast %80 : vector<1x32xf32> to vector<32x32xf32>
    %82 = arith.mulf %79, %81 : vector<32x32xf32>
    %83 = arith.addf %76, %82 : vector<32x32xf32>
    %c4_54 = arith.constant 4 : index
    %c0_55 = arith.constant 0 : index
    %c0_56 = arith.constant 0 : index
    %84 = vector.load %arg1[%c4_54, %c0_55, %c0_56] : memref<5x32x32xf32, #tpu.memory_space<vmem>>, vector<1x32x32xf32>
    %85 = vector.shape_cast %84 : vector<1x32x32xf32> to vector<32x32xf32>
    %cst_57 = arith.constant dense<0.000000e+00> : vector<32x32xf32>
    %86 = tpu.matmul %85, %54, %cst_57 {dimension_numbers = #tpu.dot_dimension_numbers<[1], [0], [0], [1], [0, 0, 1, 1], [], []>} : vector<32x32xf32>, vector<32x32xf32>, vector<32x32xf32> -> vector<32x32xf32>
    %87 = vector.extract_strided_slice %55 {offsets = [4, 0], sizes = [1, 32], strides = [1, 1]} : vector<5x32xf32> to vector<1x32xf32>
    %88 = vector.broadcast %87 : vector<1x32xf32> to vector<32x32xf32>
    %89 = arith.mulf %86, %88 : vector<32x32xf32>
    %90 = arith.addf %83, %89 : vector<32x32xf32>
    %91 = arith.addf %90, %45 : vector<32x32xf32>
    %c0_58 = arith.constant 0 : index
    %c0_59 = arith.constant 0 : index
    %92 = vector.load %arg10[%c0_58, %c0_59] : memref<32x256xf32, #tpu.memory_space<vmem>>, vector<32x256xf32>
    %cst_60 = arith.constant dense<0.000000e+00> : vector<32x256xf32>
    %93 = tpu.matmul %91, %92, %cst_60 {dimension_numbers = #tpu.dot_dimension_numbers<[1], [0], [0], [1], [0, 0, 1, 1], [], []>} : vector<32x32xf32>, vector<32x256xf32>, vector<32x256xf32> -> vector<32x256xf32>
    %c0_61 = arith.constant 0 : index
    %c0_62 = arith.constant 0 : index
    %94 = vector.load %arg12[%c0_61, %c0_62] : memref<1x256xf32, #tpu.memory_space<vmem>>, vector<1x256xf32>
    %95 = vector.broadcast %94 : vector<1x256xf32> to vector<32x256xf32>
    %96 = arith.addf %93, %95 : vector<32x256xf32>
    %97 = vector.shape_cast %96 : vector<32x256xf32> to vector<2x16x256xf32>
    %c0_63 = arith.constant 0 : index
    %c0_64 = arith.constant 0 : index
    %98 = vector.load %arg11[%c0_63, %c0_64] : memref<128x256xf32, #tpu.memory_space<vmem>>, vector<128x256xf32>
    %cst_65 = arith.constant 0.000000e+00 : f32
    %99 = vector.broadcast %cst_65 : f32 to vector<2x128xf32>
    %cst_66 = arith.constant 0.000000e+00 : f32
    %100 = vector.broadcast %cst_66 : f32 to vector<2x128xf32>
    %101 = vector.extract_strided_slice %97 {offsets = [0, 0, 0], sizes = [2, 1, 256], strides = [1, 1, 1]} : vector<2x16x256xf32> to vector<2x1x256xf32>
    %102 = vector.shape_cast %101 : vector<2x1x256xf32> to vector<2x256xf32>
    %cst_67 = arith.constant dense<0.000000e+00> : vector<2x256xf32>
    %103 = tpu.matmul %100, %98, %cst_67 {dimension_numbers = #tpu.dot_dimension_numbers<[1], [0], [0], [1], [0, 0, 1, 1], [], []>} : vector<2x128xf32>, vector<128x256xf32>, vector<2x256xf32> -> vector<2x256xf32>
    %104 = arith.addf %102, %103 : vector<2x256xf32>
    %105 = vector.extract_strided_slice %104 {offsets = [0, 0], sizes = [2, 128], strides = [1, 1]} : vector<2x256xf32> to vector<2x128xf32>
    %106 = vector.extract_strided_slice %104 {offsets = [0, 128], sizes = [2, 128], strides = [1, 1]} : vector<2x256xf32> to vector<2x128xf32>
    %107 = arith.negf %105 : vector<2x128xf32>
    %108 = math.exp %107 : vector<2x128xf32>
    %cst_68 = arith.constant 1.000000e+00 : f32
    %109 = vector.broadcast %cst_68 : f32 to vector<2x128xf32>
    %110 = arith.addf %109, %108 : vector<2x128xf32>
    %111 = arith.divf %109, %110 : vector<2x128xf32>
    %112 = math.tanh %105 : vector<2x128xf32>
    %113 = arith.negf %106 : vector<2x128xf32>
    %114 = math.exp %113 : vector<2x128xf32>
    %cst_69 = arith.constant 1.000000e+00 : f32
    %115 = vector.broadcast %cst_69 : f32 to vector<2x128xf32>
    %116 = arith.addf %115, %114 : vector<2x128xf32>
    %117 = arith.divf %115, %116 : vector<2x128xf32>
    %c64_i32 = arith.constant 64 : i32
    %118 = tpu.dynamic_rotate %112 by %c64_i32 dim 1 : vector<2x128xf32>, i32 -> vector<2x128xf32>
    %119 = arith.mulf %111, %118 : vector<2x128xf32>
    %120 = arith.mulf %117, %99 : vector<2x128xf32>
    %121 = arith.addf %120, %119 : vector<2x128xf32>
    %c64_i32_70 = arith.constant 64 : i32
    %122 = tpu.dynamic_rotate %117 by %c64_i32_70 dim 1 : vector<2x128xf32>, i32 -> vector<2x128xf32>
    %123 = math.tanh %121 : vector<2x128xf32>
    %124 = arith.mulf %122, %123 : vector<2x128xf32>
    %125 = vector.extract_strided_slice %124 {offsets = [0, 0], sizes = [2, 32], strides = [1, 1]} : vector<2x128xf32> to vector<2x32xf32>
    %c0_71 = arith.constant 0 : index
    %c0_72 = arith.constant 0 : index
    %126 = vector.load %arg16[%c0_71, %c0_72] : memref<2x512xf32, #tpu.memory_space<vmem>>, vector<2x32xf32>
    tpu.vector_store %arg16[%c0_71, %c0_72], %125 {strides = array<i32>} : memref<2x512xf32, #tpu.memory_space<vmem>>, vector<2x32xf32>,
    %127 = vector.extract_strided_slice %97 {offsets = [0, 1, 0], sizes = [2, 1, 256], strides = [1, 1, 1]} : vector<2x16x256xf32> to vector<2x1x256xf32>
    %128 = vector.shape_cast %127 : vector<2x1x256xf32> to vector<2x256xf32>
    %cst_73 = arith.constant dense<0.000000e+00> : vector<2x256xf32>
    %129 = tpu.matmul %124, %98, %cst_73 {dimension_numbers = #tpu.dot_dimension_numbers<[1], [0], [0], [1], [0, 0, 1, 1], [], []>} : vector<2x128xf32>, vector<128x256xf32>, vector<2x256xf32> -> vector<2x256xf32>
    %130 = arith.addf %128, %129 : vector<2x256xf32>
    %131 = vector.extract_strided_slice %130 {offsets = [0, 0], sizes = [2, 128], strides = [1, 1]} : vector<2x256xf32> to vector<2x128xf32>
    %132 = vector.extract_strided_slice %130 {offsets = [0, 128], sizes = [2, 128], strides = [1, 1]} : vector<2x256xf32> to vector<2x128xf32>
    %133 = arith.negf %131 : vector<2x128xf32>
    %134 = math.exp %133 : vector<2x128xf32>
    %cst_74 = arith.constant 1.000000e+00 : f32
    %135 = vector.broadcast %cst_74 : f32 to vector<2x128xf32>
    %136 = arith.addf %135, %134 : vector<2x128xf32>
    %137 = arith.divf %135, %136 : vector<2x128xf32>
    %138 = math.tanh %131 : vector<2x128xf32>
    %139 = arith.negf %132 : vector<2x128xf32>
    %140 = math.exp %139 : vector<2x128xf32>
    %cst_75 = arith.constant 1.000000e+00 : f32
    %141 = vector.broadcast %cst_75 : f32 to vector<2x128xf32>
    %142 = arith.addf %141, %140 : vector<2x128xf32>
    %143 = arith.divf %141, %142 : vector<2x128xf32>
    %c64_i32_76 = arith.constant 64 : i32
    %144 = tpu.dynamic_rotate %138 by %c64_i32_76 dim 1 : vector<2x128xf32>, i32 -> vector<2x128xf32>
    %145 = arith.mulf %137, %144 : vector<2x128xf32>
    %146 = arith.mulf %143, %121 : vector<2x128xf32>
    %147 = arith.addf %146, %145 : vector<2x128xf32>
    %c64_i32_77 = arith.constant 64 : i32
    %148 = tpu.dynamic_rotate %143 by %c64_i32_77 dim 1 : vector<2x128xf32>, i32 -> vector<2x128xf32>
    %149 = math.tanh %147 : vector<2x128xf32>
    %150 = arith.mulf %148, %149 : vector<2x128xf32>
    %151 = vector.extract_strided_slice %150 {offsets = [0, 0], sizes = [2, 32], strides = [1, 1]} : vector<2x128xf32> to vector<2x32xf32>
    %c0_78 = arith.constant 0 : index
    %c32 = arith.constant 32 : index
    %152 = vector.load %arg16[%c0_78, %c32] : memref<2x512xf32, #tpu.memory_space<vmem>>, vector<2x32xf32>
    tpu.vector_store %arg16[%c0_78, %c32], %151 {strides = array<i32>} : memref<2x512xf32, #tpu.memory_space<vmem>>, vector<2x32xf32>,
    %153 = vector.extract_strided_slice %97 {offsets = [0, 2, 0], sizes = [2, 1, 256], strides = [1, 1, 1]} : vector<2x16x256xf32> to vector<2x1x256xf32>
    %154 = vector.shape_cast %153 : vector<2x1x256xf32> to vector<2x256xf32>
    %cst_79 = arith.constant dense<0.000000e+00> : vector<2x256xf32>
    %155 = tpu.matmul %150, %98, %cst_79 {dimension_numbers = #tpu.dot_dimension_numbers<[1], [0], [0], [1], [0, 0, 1, 1], [], []>} : vector<2x128xf32>, vector<128x256xf32>, vector<2x256xf32> -> vector<2x256xf32>
    %156 = arith.addf %154, %155 : vector<2x256xf32>
    %157 = vector.extract_strided_slice %156 {offsets = [0, 0], sizes = [2, 128], strides = [1, 1]} : vector<2x256xf32> to vector<2x128xf32>
    %158 = vector.extract_strided_slice %156 {offsets = [0, 128], sizes = [2, 128], strides = [1, 1]} : vector<2x256xf32> to vector<2x128xf32>
    %159 = arith.negf %157 : vector<2x128xf32>
    %160 = math.exp %159 : vector<2x128xf32>
    %cst_80 = arith.constant 1.000000e+00 : f32
    %161 = vector.broadcast %cst_80 : f32 to vector<2x128xf32>
    %162 = arith.addf %161, %160 : vector<2x128xf32>
    %163 = arith.divf %161, %162 : vector<2x128xf32>
    %164 = math.tanh %157 : vector<2x128xf32>
    %165 = arith.negf %158 : vector<2x128xf32>
    %166 = math.exp %165 : vector<2x128xf32>
    %cst_81 = arith.constant 1.000000e+00 : f32
    %167 = vector.broadcast %cst_81 : f32 to vector<2x128xf32>
    %168 = arith.addf %167, %166 : vector<2x128xf32>
    %169 = arith.divf %167, %168 : vector<2x128xf32>
    %c64_i32_82 = arith.constant 64 : i32
    %170 = tpu.dynamic_rotate %164 by %c64_i32_82 dim 1 : vector<2x128xf32>, i32 -> vector<2x128xf32>
    %171 = arith.mulf %163, %170 : vector<2x128xf32>
    %172 = arith.mulf %169, %147 : vector<2x128xf32>
    %173 = arith.addf %172, %171 : vector<2x128xf32>
    %c64_i32_83 = arith.constant 64 : i32
    %174 = tpu.dynamic_rotate %169 by %c64_i32_83 dim 1 : vector<2x128xf32>, i32 -> vector<2x128xf32>
    %175 = math.tanh %173 : vector<2x128xf32>
    %176 = arith.mulf %174, %175 : vector<2x128xf32>
    %177 = vector.extract_strided_slice %176 {offsets = [0, 0], sizes = [2, 32], strides = [1, 1]} : vector<2x128xf32> to vector<2x32xf32>
    %c0_84 = arith.constant 0 : index
    %c64 = arith.constant 64 : index
    %178 = vector.load %arg16[%c0_84, %c64] : memref<2x512xf32, #tpu.memory_space<vmem>>, vector<2x32xf32>
    tpu.vector_store %arg16[%c0_84, %c64], %177 {strides = array<i32>} : memref<2x512xf32, #tpu.memory_space<vmem>>, vector<2x32xf32>,
    %179 = vector.extract_strided_slice %97 {offsets = [0, 3, 0], sizes = [2, 1, 256], strides = [1, 1, 1]} : vector<2x16x256xf32> to vector<2x1x256xf32>
    %180 = vector.shape_cast %179 : vector<2x1x256xf32> to vector<2x256xf32>
    %cst_85 = arith.constant dense<0.000000e+00> : vector<2x256xf32>
    %181 = tpu.matmul %176, %98, %cst_85 {dimension_numbers = #tpu.dot_dimension_numbers<[1], [0], [0], [1], [0, 0, 1, 1], [], []>} : vector<2x128xf32>, vector<128x256xf32>, vector<2x256xf32> -> vector<2x256xf32>
    %182 = arith.addf %180, %181 : vector<2x256xf32>
    %183 = vector.extract_strided_slice %182 {offsets = [0, 0], sizes = [2, 128], strides = [1, 1]} : vector<2x256xf32> to vector<2x128xf32>
    %184 = vector.extract_strided_slice %182 {offsets = [0, 128], sizes = [2, 128], strides = [1, 1]} : vector<2x256xf32> to vector<2x128xf32>
    %185 = arith.negf %183 : vector<2x128xf32>
    %186 = math.exp %185 : vector<2x128xf32>
    %cst_86 = arith.constant 1.000000e+00 : f32
    %187 = vector.broadcast %cst_86 : f32 to vector<2x128xf32>
    %188 = arith.addf %187, %186 : vector<2x128xf32>
    %189 = arith.divf %187, %188 : vector<2x128xf32>
    %190 = math.tanh %183 : vector<2x128xf32>
    %191 = arith.negf %184 : vector<2x128xf32>
    %192 = math.exp %191 : vector<2x128xf32>
    %cst_87 = arith.constant 1.000000e+00 : f32
    %193 = vector.broadcast %cst_87 : f32 to vector<2x128xf32>
    %194 = arith.addf %193, %192 : vector<2x128xf32>
    %195 = arith.divf %193, %194 : vector<2x128xf32>
    %c64_i32_88 = arith.constant 64 : i32
    %196 = tpu.dynamic_rotate %190 by %c64_i32_88 dim 1 : vector<2x128xf32>, i32 -> vector<2x128xf32>
    %197 = arith.mulf %189, %196 : vector<2x128xf32>
    %198 = arith.mulf %195, %173 : vector<2x128xf32>
    %199 = arith.addf %198, %197 : vector<2x128xf32>
    %c64_i32_89 = arith.constant 64 : i32
    %200 = tpu.dynamic_rotate %195 by %c64_i32_89 dim 1 : vector<2x128xf32>, i32 -> vector<2x128xf32>
    %201 = math.tanh %199 : vector<2x128xf32>
    %202 = arith.mulf %200, %201 : vector<2x128xf32>
    %203 = vector.extract_strided_slice %202 {offsets = [0, 0], sizes = [2, 32], strides = [1, 1]} : vector<2x128xf32> to vector<2x32xf32>
    %c0_90 = arith.constant 0 : index
    %c96 = arith.constant 96 : index
    %204 = vector.load %arg16[%c0_90, %c96] : memref<2x512xf32, #tpu.memory_space<vmem>>, vector<2x32xf32>
    tpu.vector_store %arg16[%c0_90, %c96], %203 {strides = array<i32>} : memref<2x512xf32, #tpu.memory_space<vmem>>, vector<2x32xf32>,
    %205 = vector.extract_strided_slice %97 {offsets = [0, 4, 0], sizes = [2, 1, 256], strides = [1, 1, 1]} : vector<2x16x256xf32> to vector<2x1x256xf32>
    %206 = vector.shape_cast %205 : vector<2x1x256xf32> to vector<2x256xf32>
    %cst_91 = arith.constant dense<0.000000e+00> : vector<2x256xf32>
    %207 = tpu.matmul %202, %98, %cst_91 {dimension_numbers = #tpu.dot_dimension_numbers<[1], [0], [0], [1], [0, 0, 1, 1], [], []>} : vector<2x128xf32>, vector<128x256xf32>, vector<2x256xf32> -> vector<2x256xf32>
    %208 = arith.addf %206, %207 : vector<2x256xf32>
    %209 = vector.extract_strided_slice %208 {offsets = [0, 0], sizes = [2, 128], strides = [1, 1]} : vector<2x256xf32> to vector<2x128xf32>
    %210 = vector.extract_strided_slice %208 {offsets = [0, 128], sizes = [2, 128], strides = [1, 1]} : vector<2x256xf32> to vector<2x128xf32>
    %211 = arith.negf %209 : vector<2x128xf32>
    %212 = math.exp %211 : vector<2x128xf32>
    %cst_92 = arith.constant 1.000000e+00 : f32
    %213 = vector.broadcast %cst_92 : f32 to vector<2x128xf32>
    %214 = arith.addf %213, %212 : vector<2x128xf32>
    %215 = arith.divf %213, %214 : vector<2x128xf32>
    %216 = math.tanh %209 : vector<2x128xf32>
    %217 = arith.negf %210 : vector<2x128xf32>
    %218 = math.exp %217 : vector<2x128xf32>
    %cst_93 = arith.constant 1.000000e+00 : f32
    %219 = vector.broadcast %cst_93 : f32 to vector<2x128xf32>
    %220 = arith.addf %219, %218 : vector<2x128xf32>
    %221 = arith.divf %219, %220 : vector<2x128xf32>
    %c64_i32_94 = arith.constant 64 : i32
    %222 = tpu.dynamic_rotate %216 by %c64_i32_94 dim 1 : vector<2x128xf32>, i32 -> vector<2x128xf32>
    %223 = arith.mulf %215, %222 : vector<2x128xf32>
    %224 = arith.mulf %221, %199 : vector<2x128xf32>
    %225 = arith.addf %224, %223 : vector<2x128xf32>
    %c64_i32_95 = arith.constant 64 : i32
    %226 = tpu.dynamic_rotate %221 by %c64_i32_95 dim 1 : vector<2x128xf32>, i32 -> vector<2x128xf32>
    %227 = math.tanh %225 : vector<2x128xf32>
    %228 = arith.mulf %226, %227 : vector<2x128xf32>
    %229 = vector.extract_strided_slice %228 {offsets = [0, 0], sizes = [2, 32], strides = [1, 1]} : vector<2x128xf32> to vector<2x32xf32>
    %c0_96 = arith.constant 0 : index
    %c128 = arith.constant 128 : index
    %230 = vector.load %arg16[%c0_96, %c128] : memref<2x512xf32, #tpu.memory_space<vmem>>, vector<2x32xf32>
    tpu.vector_store %arg16[%c0_96, %c128], %229 {strides = array<i32>} : memref<2x512xf32, #tpu.memory_space<vmem>>, vector<2x32xf32>,
    %231 = vector.extract_strided_slice %97 {offsets = [0, 5, 0], sizes = [2, 1, 256], strides = [1, 1, 1]} : vector<2x16x256xf32> to vector<2x1x256xf32>
    %232 = vector.shape_cast %231 : vector<2x1x256xf32> to vector<2x256xf32>
    %cst_97 = arith.constant dense<0.000000e+00> : vector<2x256xf32>
    %233 = tpu.matmul %228, %98, %cst_97 {dimension_numbers = #tpu.dot_dimension_numbers<[1], [0], [0], [1], [0, 0, 1, 1], [], []>} : vector<2x128xf32>, vector<128x256xf32>, vector<2x256xf32> -> vector<2x256xf32>
    %234 = arith.addf %232, %233 : vector<2x256xf32>
    %235 = vector.extract_strided_slice %234 {offsets = [0, 0], sizes = [2, 128], strides = [1, 1]} : vector<2x256xf32> to vector<2x128xf32>
    %236 = vector.extract_strided_slice %234 {offsets = [0, 128], sizes = [2, 128], strides = [1, 1]} : vector<2x256xf32> to vector<2x128xf32>
    %237 = arith.negf %235 : vector<2x128xf32>
    %238 = math.exp %237 : vector<2x128xf32>
    %cst_98 = arith.constant 1.000000e+00 : f32
    %239 = vector.broadcast %cst_98 : f32 to vector<2x128xf32>
    %240 = arith.addf %239, %238 : vector<2x128xf32>
    %241 = arith.divf %239, %240 : vector<2x128xf32>
    %242 = math.tanh %235 : vector<2x128xf32>
    %243 = arith.negf %236 : vector<2x128xf32>
    %244 = math.exp %243 : vector<2x128xf32>
    %cst_99 = arith.constant 1.000000e+00 : f32
    %245 = vector.broadcast %cst_99 : f32 to vector<2x128xf32>
    %246 = arith.addf %245, %244 : vector<2x128xf32>
    %247 = arith.divf %245, %246 : vector<2x128xf32>
    %c64_i32_100 = arith.constant 64 : i32
    %248 = tpu.dynamic_rotate %242 by %c64_i32_100 dim 1 : vector<2x128xf32>, i32 -> vector<2x128xf32>
    %249 = arith.mulf %241, %248 : vector<2x128xf32>
    %250 = arith.mulf %247, %225 : vector<2x128xf32>
    %251 = arith.addf %250, %249 : vector<2x128xf32>
    %c64_i32_101 = arith.constant 64 : i32
    %252 = tpu.dynamic_rotate %247 by %c64_i32_101 dim 1 : vector<2x128xf32>, i32 -> vector<2x128xf32>
    %253 = math.tanh %251 : vector<2x128xf32>
    %254 = arith.mulf %252, %253 : vector<2x128xf32>
    %255 = vector.extract_strided_slice %254 {offsets = [0, 0], sizes = [2, 32], strides = [1, 1]} : vector<2x128xf32> to vector<2x32xf32>
    %c0_102 = arith.constant 0 : index
    %c160 = arith.constant 160 : index
    %256 = vector.load %arg16[%c0_102, %c160] : memref<2x512xf32, #tpu.memory_space<vmem>>, vector<2x32xf32>
    tpu.vector_store %arg16[%c0_102, %c160], %255 {strides = array<i32>} : memref<2x512xf32, #tpu.memory_space<vmem>>, vector<2x32xf32>,
    %257 = vector.extract_strided_slice %97 {offsets = [0, 6, 0], sizes = [2, 1, 256], strides = [1, 1, 1]} : vector<2x16x256xf32> to vector<2x1x256xf32>
    %258 = vector.shape_cast %257 : vector<2x1x256xf32> to vector<2x256xf32>
    %cst_103 = arith.constant dense<0.000000e+00> : vector<2x256xf32>
    %259 = tpu.matmul %254, %98, %cst_103 {dimension_numbers = #tpu.dot_dimension_numbers<[1], [0], [0], [1], [0, 0, 1, 1], [], []>} : vector<2x128xf32>, vector<128x256xf32>, vector<2x256xf32> -> vector<2x256xf32>
    %260 = arith.addf %258, %259 : vector<2x256xf32>
    %261 = vector.extract_strided_slice %260 {offsets = [0, 0], sizes = [2, 128], strides = [1, 1]} : vector<2x256xf32> to vector<2x128xf32>
    %262 = vector.extract_strided_slice %260 {offsets = [0, 128], sizes = [2, 128], strides = [1, 1]} : vector<2x256xf32> to vector<2x128xf32>
    %263 = arith.negf %261 : vector<2x128xf32>
    %264 = math.exp %263 : vector<2x128xf32>
    %cst_104 = arith.constant 1.000000e+00 : f32
    %265 = vector.broadcast %cst_104 : f32 to vector<2x128xf32>
    %266 = arith.addf %265, %264 : vector<2x128xf32>
    %267 = arith.divf %265, %266 : vector<2x128xf32>
    %268 = math.tanh %261 : vector<2x128xf32>
    %269 = arith.negf %262 : vector<2x128xf32>
    %270 = math.exp %269 : vector<2x128xf32>
    %cst_105 = arith.constant 1.000000e+00 : f32
    %271 = vector.broadcast %cst_105 : f32 to vector<2x128xf32>
    %272 = arith.addf %271, %270 : vector<2x128xf32>
    %273 = arith.divf %271, %272 : vector<2x128xf32>
    %c64_i32_106 = arith.constant 64 : i32
    %274 = tpu.dynamic_rotate %268 by %c64_i32_106 dim 1 : vector<2x128xf32>, i32 -> vector<2x128xf32>
    %275 = arith.mulf %267, %274 : vector<2x128xf32>
    %276 = arith.mulf %273, %251 : vector<2x128xf32>
    %277 = arith.addf %276, %275 : vector<2x128xf32>
    %c64_i32_107 = arith.constant 64 : i32
    %278 = tpu.dynamic_rotate %273 by %c64_i32_107 dim 1 : vector<2x128xf32>, i32 -> vector<2x128xf32>
    %279 = math.tanh %277 : vector<2x128xf32>
    %280 = arith.mulf %278, %279 : vector<2x128xf32>
    %281 = vector.extract_strided_slice %280 {offsets = [0, 0], sizes = [2, 32], strides = [1, 1]} : vector<2x128xf32> to vector<2x32xf32>
    %c0_108 = arith.constant 0 : index
    %c192 = arith.constant 192 : index
    %282 = vector.load %arg16[%c0_108, %c192] : memref<2x512xf32, #tpu.memory_space<vmem>>, vector<2x32xf32>
    tpu.vector_store %arg16[%c0_108, %c192], %281 {strides = array<i32>} : memref<2x512xf32, #tpu.memory_space<vmem>>, vector<2x32xf32>,
    %283 = vector.extract_strided_slice %97 {offsets = [0, 7, 0], sizes = [2, 1, 256], strides = [1, 1, 1]} : vector<2x16x256xf32> to vector<2x1x256xf32>
    %284 = vector.shape_cast %283 : vector<2x1x256xf32> to vector<2x256xf32>
    %cst_109 = arith.constant dense<0.000000e+00> : vector<2x256xf32>
    %285 = tpu.matmul %280, %98, %cst_109 {dimension_numbers = #tpu.dot_dimension_numbers<[1], [0], [0], [1], [0, 0, 1, 1], [], []>} : vector<2x128xf32>, vector<128x256xf32>, vector<2x256xf32> -> vector<2x256xf32>
    %286 = arith.addf %284, %285 : vector<2x256xf32>
    %287 = vector.extract_strided_slice %286 {offsets = [0, 0], sizes = [2, 128], strides = [1, 1]} : vector<2x256xf32> to vector<2x128xf32>
    %288 = vector.extract_strided_slice %286 {offsets = [0, 128], sizes = [2, 128], strides = [1, 1]} : vector<2x256xf32> to vector<2x128xf32>
    %289 = arith.negf %287 : vector<2x128xf32>
    %290 = math.exp %289 : vector<2x128xf32>
    %cst_110 = arith.constant 1.000000e+00 : f32
    %291 = vector.broadcast %cst_110 : f32 to vector<2x128xf32>
    %292 = arith.addf %291, %290 : vector<2x128xf32>
    %293 = arith.divf %291, %292 : vector<2x128xf32>
    %294 = math.tanh %287 : vector<2x128xf32>
    %295 = arith.negf %288 : vector<2x128xf32>
    %296 = math.exp %295 : vector<2x128xf32>
    %cst_111 = arith.constant 1.000000e+00 : f32
    %297 = vector.broadcast %cst_111 : f32 to vector<2x128xf32>
    %298 = arith.addf %297, %296 : vector<2x128xf32>
    %299 = arith.divf %297, %298 : vector<2x128xf32>
    %c64_i32_112 = arith.constant 64 : i32
    %300 = tpu.dynamic_rotate %294 by %c64_i32_112 dim 1 : vector<2x128xf32>, i32 -> vector<2x128xf32>
    %301 = arith.mulf %293, %300 : vector<2x128xf32>
    %302 = arith.mulf %299, %277 : vector<2x128xf32>
    %303 = arith.addf %302, %301 : vector<2x128xf32>
    %c64_i32_113 = arith.constant 64 : i32
    %304 = tpu.dynamic_rotate %299 by %c64_i32_113 dim 1 : vector<2x128xf32>, i32 -> vector<2x128xf32>
    %305 = math.tanh %303 : vector<2x128xf32>
    %306 = arith.mulf %304, %305 : vector<2x128xf32>
    %307 = vector.extract_strided_slice %306 {offsets = [0, 0], sizes = [2, 32], strides = [1, 1]} : vector<2x128xf32> to vector<2x32xf32>
    %c0_114 = arith.constant 0 : index
    %c224 = arith.constant 224 : index
    %308 = vector.load %arg16[%c0_114, %c224] : memref<2x512xf32, #tpu.memory_space<vmem>>, vector<2x32xf32>
    tpu.vector_store %arg16[%c0_114, %c224], %307 {strides = array<i32>} : memref<2x512xf32, #tpu.memory_space<vmem>>, vector<2x32xf32>,
    %309 = vector.extract_strided_slice %97 {offsets = [0, 8, 0], sizes = [2, 1, 256], strides = [1, 1, 1]} : vector<2x16x256xf32> to vector<2x1x256xf32>
    %310 = vector.shape_cast %309 : vector<2x1x256xf32> to vector<2x256xf32>
    %cst_115 = arith.constant dense<0.000000e+00> : vector<2x256xf32>
    %311 = tpu.matmul %306, %98, %cst_115 {dimension_numbers = #tpu.dot_dimension_numbers<[1], [0], [0], [1], [0, 0, 1, 1], [], []>} : vector<2x128xf32>, vector<128x256xf32>, vector<2x256xf32> -> vector<2x256xf32>
    %312 = arith.addf %310, %311 : vector<2x256xf32>
    %313 = vector.extract_strided_slice %312 {offsets = [0, 0], sizes = [2, 128], strides = [1, 1]} : vector<2x256xf32> to vector<2x128xf32>
    %314 = vector.extract_strided_slice %312 {offsets = [0, 128], sizes = [2, 128], strides = [1, 1]} : vector<2x256xf32> to vector<2x128xf32>
    %315 = arith.negf %313 : vector<2x128xf32>
    %316 = math.exp %315 : vector<2x128xf32>
    %cst_116 = arith.constant 1.000000e+00 : f32
    %317 = vector.broadcast %cst_116 : f32 to vector<2x128xf32>
    %318 = arith.addf %317, %316 : vector<2x128xf32>
    %319 = arith.divf %317, %318 : vector<2x128xf32>
    %320 = math.tanh %313 : vector<2x128xf32>
    %321 = arith.negf %314 : vector<2x128xf32>
    %322 = math.exp %321 : vector<2x128xf32>
    %cst_117 = arith.constant 1.000000e+00 : f32
    %323 = vector.broadcast %cst_117 : f32 to vector<2x128xf32>
    %324 = arith.addf %323, %322 : vector<2x128xf32>
    %325 = arith.divf %323, %324 : vector<2x128xf32>
    %c64_i32_118 = arith.constant 64 : i32
    %326 = tpu.dynamic_rotate %320 by %c64_i32_118 dim 1 : vector<2x128xf32>, i32 -> vector<2x128xf32>
    %327 = arith.mulf %319, %326 : vector<2x128xf32>
    %328 = arith.mulf %325, %303 : vector<2x128xf32>
    %329 = arith.addf %328, %327 : vector<2x128xf32>
    %c64_i32_119 = arith.constant 64 : i32
    %330 = tpu.dynamic_rotate %325 by %c64_i32_119 dim 1 : vector<2x128xf32>, i32 -> vector<2x128xf32>
    %331 = math.tanh %329 : vector<2x128xf32>
    %332 = arith.mulf %330, %331 : vector<2x128xf32>
    %333 = vector.extract_strided_slice %332 {offsets = [0, 0], sizes = [2, 32], strides = [1, 1]} : vector<2x128xf32> to vector<2x32xf32>
    %c0_120 = arith.constant 0 : index
    %c256 = arith.constant 256 : index
    %334 = vector.load %arg16[%c0_120, %c256] : memref<2x512xf32, #tpu.memory_space<vmem>>, vector<2x32xf32>
    tpu.vector_store %arg16[%c0_120, %c256], %333 {strides = array<i32>} : memref<2x512xf32, #tpu.memory_space<vmem>>, vector<2x32xf32>,
    %335 = vector.extract_strided_slice %97 {offsets = [0, 9, 0], sizes = [2, 1, 256], strides = [1, 1, 1]} : vector<2x16x256xf32> to vector<2x1x256xf32>
    %336 = vector.shape_cast %335 : vector<2x1x256xf32> to vector<2x256xf32>
    %cst_121 = arith.constant dense<0.000000e+00> : vector<2x256xf32>
    %337 = tpu.matmul %332, %98, %cst_121 {dimension_numbers = #tpu.dot_dimension_numbers<[1], [0], [0], [1], [0, 0, 1, 1], [], []>} : vector<2x128xf32>, vector<128x256xf32>, vector<2x256xf32> -> vector<2x256xf32>
    %338 = arith.addf %336, %337 : vector<2x256xf32>
    %339 = vector.extract_strided_slice %338 {offsets = [0, 0], sizes = [2, 128], strides = [1, 1]} : vector<2x256xf32> to vector<2x128xf32>
    %340 = vector.extract_strided_slice %338 {offsets = [0, 128], sizes = [2, 128], strides = [1, 1]} : vector<2x256xf32> to vector<2x128xf32>
    %341 = arith.negf %339 : vector<2x128xf32>
    %342 = math.exp %341 : vector<2x128xf32>
    %cst_122 = arith.constant 1.000000e+00 : f32
    %343 = vector.broadcast %cst_122 : f32 to vector<2x128xf32>
    %344 = arith.addf %343, %342 : vector<2x128xf32>
    %345 = arith.divf %343, %344 : vector<2x128xf32>
    %346 = math.tanh %339 : vector<2x128xf32>
    %347 = arith.negf %340 : vector<2x128xf32>
    %348 = math.exp %347 : vector<2x128xf32>
    %cst_123 = arith.constant 1.000000e+00 : f32
    %349 = vector.broadcast %cst_123 : f32 to vector<2x128xf32>
    %350 = arith.addf %349, %348 : vector<2x128xf32>
    %351 = arith.divf %349, %350 : vector<2x128xf32>
    %c64_i32_124 = arith.constant 64 : i32
    %352 = tpu.dynamic_rotate %346 by %c64_i32_124 dim 1 : vector<2x128xf32>, i32 -> vector<2x128xf32>
    %353 = arith.mulf %345, %352 : vector<2x128xf32>
    %354 = arith.mulf %351, %329 : vector<2x128xf32>
    %355 = arith.addf %354, %353 : vector<2x128xf32>
    %c64_i32_125 = arith.constant 64 : i32
    %356 = tpu.dynamic_rotate %351 by %c64_i32_125 dim 1 : vector<2x128xf32>, i32 -> vector<2x128xf32>
    %357 = math.tanh %355 : vector<2x128xf32>
    %358 = arith.mulf %356, %357 : vector<2x128xf32>
    %359 = vector.extract_strided_slice %358 {offsets = [0, 0], sizes = [2, 32], strides = [1, 1]} : vector<2x128xf32> to vector<2x32xf32>
    %c0_126 = arith.constant 0 : index
    %c288 = arith.constant 288 : index
    %360 = vector.load %arg16[%c0_126, %c288] : memref<2x512xf32, #tpu.memory_space<vmem>>, vector<2x32xf32>
    tpu.vector_store %arg16[%c0_126, %c288], %359 {strides = array<i32>} : memref<2x512xf32, #tpu.memory_space<vmem>>, vector<2x32xf32>,
    %361 = vector.extract_strided_slice %97 {offsets = [0, 10, 0], sizes = [2, 1, 256], strides = [1, 1, 1]} : vector<2x16x256xf32> to vector<2x1x256xf32>
    %362 = vector.shape_cast %361 : vector<2x1x256xf32> to vector<2x256xf32>
    %cst_127 = arith.constant dense<0.000000e+00> : vector<2x256xf32>
    %363 = tpu.matmul %358, %98, %cst_127 {dimension_numbers = #tpu.dot_dimension_numbers<[1], [0], [0], [1], [0, 0, 1, 1], [], []>} : vector<2x128xf32>, vector<128x256xf32>, vector<2x256xf32> -> vector<2x256xf32>
    %364 = arith.addf %362, %363 : vector<2x256xf32>
    %365 = vector.extract_strided_slice %364 {offsets = [0, 0], sizes = [2, 128], strides = [1, 1]} : vector<2x256xf32> to vector<2x128xf32>
    %366 = vector.extract_strided_slice %364 {offsets = [0, 128], sizes = [2, 128], strides = [1, 1]} : vector<2x256xf32> to vector<2x128xf32>
    %367 = arith.negf %365 : vector<2x128xf32>
    %368 = math.exp %367 : vector<2x128xf32>
    %cst_128 = arith.constant 1.000000e+00 : f32
    %369 = vector.broadcast %cst_128 : f32 to vector<2x128xf32>
    %370 = arith.addf %369, %368 : vector<2x128xf32>
    %371 = arith.divf %369, %370 : vector<2x128xf32>
    %372 = math.tanh %365 : vector<2x128xf32>
    %373 = arith.negf %366 : vector<2x128xf32>
    %374 = math.exp %373 : vector<2x128xf32>
    %cst_129 = arith.constant 1.000000e+00 : f32
    %375 = vector.broadcast %cst_129 : f32 to vector<2x128xf32>
    %376 = arith.addf %375, %374 : vector<2x128xf32>
    %377 = arith.divf %375, %376 : vector<2x128xf32>
    %c64_i32_130 = arith.constant 64 : i32
    %378 = tpu.dynamic_rotate %372 by %c64_i32_130 dim 1 : vector<2x128xf32>, i32 -> vector<2x128xf32>
    %379 = arith.mulf %371, %378 : vector<2x128xf32>
    %380 = arith.mulf %377, %355 : vector<2x128xf32>
    %381 = arith.addf %380, %379 : vector<2x128xf32>
    %c64_i32_131 = arith.constant 64 : i32
    %382 = tpu.dynamic_rotate %377 by %c64_i32_131 dim 1 : vector<2x128xf32>, i32 -> vector<2x128xf32>
    %383 = math.tanh %381 : vector<2x128xf32>
    %384 = arith.mulf %382, %383 : vector<2x128xf32>
    %385 = vector.extract_strided_slice %384 {offsets = [0, 0], sizes = [2, 32], strides = [1, 1]} : vector<2x128xf32> to vector<2x32xf32>
    %c0_132 = arith.constant 0 : index
    %c320 = arith.constant 320 : index
    %386 = vector.load %arg16[%c0_132, %c320] : memref<2x512xf32, #tpu.memory_space<vmem>>, vector<2x32xf32>
    tpu.vector_store %arg16[%c0_132, %c320], %385 {strides = array<i32>} : memref<2x512xf32, #tpu.memory_space<vmem>>, vector<2x32xf32>,
    %387 = vector.extract_strided_slice %97 {offsets = [0, 11, 0], sizes = [2, 1, 256], strides = [1, 1, 1]} : vector<2x16x256xf32> to vector<2x1x256xf32>
    %388 = vector.shape_cast %387 : vector<2x1x256xf32> to vector<2x256xf32>
    %cst_133 = arith.constant dense<0.000000e+00> : vector<2x256xf32>
    %389 = tpu.matmul %384, %98, %cst_133 {dimension_numbers = #tpu.dot_dimension_numbers<[1], [0], [0], [1], [0, 0, 1, 1], [], []>} : vector<2x128xf32>, vector<128x256xf32>, vector<2x256xf32> -> vector<2x256xf32>
    %390 = arith.addf %388, %389 : vector<2x256xf32>
    %391 = vector.extract_strided_slice %390 {offsets = [0, 0], sizes = [2, 128], strides = [1, 1]} : vector<2x256xf32> to vector<2x128xf32>
    %392 = vector.extract_strided_slice %390 {offsets = [0, 128], sizes = [2, 128], strides = [1, 1]} : vector<2x256xf32> to vector<2x128xf32>
    %393 = arith.negf %391 : vector<2x128xf32>
    %394 = math.exp %393 : vector<2x128xf32>
    %cst_134 = arith.constant 1.000000e+00 : f32
    %395 = vector.broadcast %cst_134 : f32 to vector<2x128xf32>
    %396 = arith.addf %395, %394 : vector<2x128xf32>
    %397 = arith.divf %395, %396 : vector<2x128xf32>
    %398 = math.tanh %391 : vector<2x128xf32>
    %399 = arith.negf %392 : vector<2x128xf32>
    %400 = math.exp %399 : vector<2x128xf32>
    %cst_135 = arith.constant 1.000000e+00 : f32
    %401 = vector.broadcast %cst_135 : f32 to vector<2x128xf32>
    %402 = arith.addf %401, %400 : vector<2x128xf32>
    %403 = arith.divf %401, %402 : vector<2x128xf32>
    %c64_i32_136 = arith.constant 64 : i32
    %404 = tpu.dynamic_rotate %398 by %c64_i32_136 dim 1 : vector<2x128xf32>, i32 -> vector<2x128xf32>
    %405 = arith.mulf %397, %404 : vector<2x128xf32>
    %406 = arith.mulf %403, %381 : vector<2x128xf32>
    %407 = arith.addf %406, %405 : vector<2x128xf32>
    %c64_i32_137 = arith.constant 64 : i32
    %408 = tpu.dynamic_rotate %403 by %c64_i32_137 dim 1 : vector<2x128xf32>, i32 -> vector<2x128xf32>
    %409 = math.tanh %407 : vector<2x128xf32>
    %410 = arith.mulf %408, %409 : vector<2x128xf32>
    %411 = vector.extract_strided_slice %410 {offsets = [0, 0], sizes = [2, 32], strides = [1, 1]} : vector<2x128xf32> to vector<2x32xf32>
    %c0_138 = arith.constant 0 : index
    %c352 = arith.constant 352 : index
    %412 = vector.load %arg16[%c0_138, %c352] : memref<2x512xf32, #tpu.memory_space<vmem>>, vector<2x32xf32>
    tpu.vector_store %arg16[%c0_138, %c352], %411 {strides = array<i32>} : memref<2x512xf32, #tpu.memory_space<vmem>>, vector<2x32xf32>,
    %413 = vector.extract_strided_slice %97 {offsets = [0, 12, 0], sizes = [2, 1, 256], strides = [1, 1, 1]} : vector<2x16x256xf32> to vector<2x1x256xf32>
    %414 = vector.shape_cast %413 : vector<2x1x256xf32> to vector<2x256xf32>
    %cst_139 = arith.constant dense<0.000000e+00> : vector<2x256xf32>
    %415 = tpu.matmul %410, %98, %cst_139 {dimension_numbers = #tpu.dot_dimension_numbers<[1], [0], [0], [1], [0, 0, 1, 1], [], []>} : vector<2x128xf32>, vector<128x256xf32>, vector<2x256xf32> -> vector<2x256xf32>
    %416 = arith.addf %414, %415 : vector<2x256xf32>
    %417 = vector.extract_strided_slice %416 {offsets = [0, 0], sizes = [2, 128], strides = [1, 1]} : vector<2x256xf32> to vector<2x128xf32>
    %418 = vector.extract_strided_slice %416 {offsets = [0, 128], sizes = [2, 128], strides = [1, 1]} : vector<2x256xf32> to vector<2x128xf32>
    %419 = arith.negf %417 : vector<2x128xf32>
    %420 = math.exp %419 : vector<2x128xf32>
    %cst_140 = arith.constant 1.000000e+00 : f32
    %421 = vector.broadcast %cst_140 : f32 to vector<2x128xf32>
    %422 = arith.addf %421, %420 : vector<2x128xf32>
    %423 = arith.divf %421, %422 : vector<2x128xf32>
    %424 = math.tanh %417 : vector<2x128xf32>
    %425 = arith.negf %418 : vector<2x128xf32>
    %426 = math.exp %425 : vector<2x128xf32>
    %cst_141 = arith.constant 1.000000e+00 : f32
    %427 = vector.broadcast %cst_141 : f32 to vector<2x128xf32>
    %428 = arith.addf %427, %426 : vector<2x128xf32>
    %429 = arith.divf %427, %428 : vector<2x128xf32>
    %c64_i32_142 = arith.constant 64 : i32
    %430 = tpu.dynamic_rotate %424 by %c64_i32_142 dim 1 : vector<2x128xf32>, i32 -> vector<2x128xf32>
    %431 = arith.mulf %423, %430 : vector<2x128xf32>
    %432 = arith.mulf %429, %407 : vector<2x128xf32>
    %433 = arith.addf %432, %431 : vector<2x128xf32>
    %c64_i32_143 = arith.constant 64 : i32
    %434 = tpu.dynamic_rotate %429 by %c64_i32_143 dim 1 : vector<2x128xf32>, i32 -> vector<2x128xf32>
    %435 = math.tanh %433 : vector<2x128xf32>
    %436 = arith.mulf %434, %435 : vector<2x128xf32>
    %437 = vector.extract_strided_slice %436 {offsets = [0, 0], sizes = [2, 32], strides = [1, 1]} : vector<2x128xf32> to vector<2x32xf32>
    %c0_144 = arith.constant 0 : index
    %c384 = arith.constant 384 : index
    %438 = vector.load %arg16[%c0_144, %c384] : memref<2x512xf32, #tpu.memory_space<vmem>>, vector<2x32xf32>
    tpu.vector_store %arg16[%c0_144, %c384], %437 {strides = array<i32>} : memref<2x512xf32, #tpu.memory_space<vmem>>, vector<2x32xf32>,
    %439 = vector.extract_strided_slice %97 {offsets = [0, 13, 0], sizes = [2, 1, 256], strides = [1, 1, 1]} : vector<2x16x256xf32> to vector<2x1x256xf32>
    %440 = vector.shape_cast %439 : vector<2x1x256xf32> to vector<2x256xf32>
    %cst_145 = arith.constant dense<0.000000e+00> : vector<2x256xf32>
    %441 = tpu.matmul %436, %98, %cst_145 {dimension_numbers = #tpu.dot_dimension_numbers<[1], [0], [0], [1], [0, 0, 1, 1], [], []>} : vector<2x128xf32>, vector<128x256xf32>, vector<2x256xf32> -> vector<2x256xf32>
    %442 = arith.addf %440, %441 : vector<2x256xf32>
    %443 = vector.extract_strided_slice %442 {offsets = [0, 0], sizes = [2, 128], strides = [1, 1]} : vector<2x256xf32> to vector<2x128xf32>
    %444 = vector.extract_strided_slice %442 {offsets = [0, 128], sizes = [2, 128], strides = [1, 1]} : vector<2x256xf32> to vector<2x128xf32>
    %445 = arith.negf %443 : vector<2x128xf32>
    %446 = math.exp %445 : vector<2x128xf32>
    %cst_146 = arith.constant 1.000000e+00 : f32
    %447 = vector.broadcast %cst_146 : f32 to vector<2x128xf32>
    %448 = arith.addf %447, %446 : vector<2x128xf32>
    %449 = arith.divf %447, %448 : vector<2x128xf32>
    %450 = math.tanh %443 : vector<2x128xf32>
    %451 = arith.negf %444 : vector<2x128xf32>
    %452 = math.exp %451 : vector<2x128xf32>
    %cst_147 = arith.constant 1.000000e+00 : f32
    %453 = vector.broadcast %cst_147 : f32 to vector<2x128xf32>
    %454 = arith.addf %453, %452 : vector<2x128xf32>
    %455 = arith.divf %453, %454 : vector<2x128xf32>
    %c64_i32_148 = arith.constant 64 : i32
    %456 = tpu.dynamic_rotate %450 by %c64_i32_148 dim 1 : vector<2x128xf32>, i32 -> vector<2x128xf32>
    %457 = arith.mulf %449, %456 : vector<2x128xf32>
    %458 = arith.mulf %455, %433 : vector<2x128xf32>
    %459 = arith.addf %458, %457 : vector<2x128xf32>
    %c64_i32_149 = arith.constant 64 : i32
    %460 = tpu.dynamic_rotate %455 by %c64_i32_149 dim 1 : vector<2x128xf32>, i32 -> vector<2x128xf32>
    %461 = math.tanh %459 : vector<2x128xf32>
    %462 = arith.mulf %460, %461 : vector<2x128xf32>
    %463 = vector.extract_strided_slice %462 {offsets = [0, 0], sizes = [2, 32], strides = [1, 1]} : vector<2x128xf32> to vector<2x32xf32>
    %c0_150 = arith.constant 0 : index
    %c416 = arith.constant 416 : index
    %464 = vector.load %arg16[%c0_150, %c416] : memref<2x512xf32, #tpu.memory_space<vmem>>, vector<2x32xf32>
    tpu.vector_store %arg16[%c0_150, %c416], %463 {strides = array<i32>} : memref<2x512xf32, #tpu.memory_space<vmem>>, vector<2x32xf32>,
    %465 = vector.extract_strided_slice %97 {offsets = [0, 14, 0], sizes = [2, 1, 256], strides = [1, 1, 1]} : vector<2x16x256xf32> to vector<2x1x256xf32>
    %466 = vector.shape_cast %465 : vector<2x1x256xf32> to vector<2x256xf32>
    %cst_151 = arith.constant dense<0.000000e+00> : vector<2x256xf32>
    %467 = tpu.matmul %462, %98, %cst_151 {dimension_numbers = #tpu.dot_dimension_numbers<[1], [0], [0], [1], [0, 0, 1, 1], [], []>} : vector<2x128xf32>, vector<128x256xf32>, vector<2x256xf32> -> vector<2x256xf32>
    %468 = arith.addf %466, %467 : vector<2x256xf32>
    %469 = vector.extract_strided_slice %468 {offsets = [0, 0], sizes = [2, 128], strides = [1, 1]} : vector<2x256xf32> to vector<2x128xf32>
    %470 = vector.extract_strided_slice %468 {offsets = [0, 128], sizes = [2, 128], strides = [1, 1]} : vector<2x256xf32> to vector<2x128xf32>
    %471 = arith.negf %469 : vector<2x128xf32>
    %472 = math.exp %471 : vector<2x128xf32>
    %cst_152 = arith.constant 1.000000e+00 : f32
    %473 = vector.broadcast %cst_152 : f32 to vector<2x128xf32>
    %474 = arith.addf %473, %472 : vector<2x128xf32>
    %475 = arith.divf %473, %474 : vector<2x128xf32>
    %476 = math.tanh %469 : vector<2x128xf32>
    %477 = arith.negf %470 : vector<2x128xf32>
    %478 = math.exp %477 : vector<2x128xf32>
    %cst_153 = arith.constant 1.000000e+00 : f32
    %479 = vector.broadcast %cst_153 : f32 to vector<2x128xf32>
    %480 = arith.addf %479, %478 : vector<2x128xf32>
    %481 = arith.divf %479, %480 : vector<2x128xf32>
    %c64_i32_154 = arith.constant 64 : i32
    %482 = tpu.dynamic_rotate %476 by %c64_i32_154 dim 1 : vector<2x128xf32>, i32 -> vector<2x128xf32>
    %483 = arith.mulf %475, %482 : vector<2x128xf32>
    %484 = arith.mulf %481, %459 : vector<2x128xf32>
    %485 = arith.addf %484, %483 : vector<2x128xf32>
    %c64_i32_155 = arith.constant 64 : i32
    %486 = tpu.dynamic_rotate %481 by %c64_i32_155 dim 1 : vector<2x128xf32>, i32 -> vector<2x128xf32>
    %487 = math.tanh %485 : vector<2x128xf32>
    %488 = arith.mulf %486, %487 : vector<2x128xf32>
    %489 = vector.extract_strided_slice %488 {offsets = [0, 0], sizes = [2, 32], strides = [1, 1]} : vector<2x128xf32> to vector<2x32xf32>
    %c0_156 = arith.constant 0 : index
    %c448 = arith.constant 448 : index
    %490 = vector.load %arg16[%c0_156, %c448] : memref<2x512xf32, #tpu.memory_space<vmem>>, vector<2x32xf32>
    tpu.vector_store %arg16[%c0_156, %c448], %489 {strides = array<i32>} : memref<2x512xf32, #tpu.memory_space<vmem>>, vector<2x32xf32>,
    %491 = vector.extract_strided_slice %97 {offsets = [0, 15, 0], sizes = [2, 1, 256], strides = [1, 1, 1]} : vector<2x16x256xf32> to vector<2x1x256xf32>
    %492 = vector.shape_cast %491 : vector<2x1x256xf32> to vector<2x256xf32>
    %cst_157 = arith.constant dense<0.000000e+00> : vector<2x256xf32>
    %493 = tpu.matmul %488, %98, %cst_157 {dimension_numbers = #tpu.dot_dimension_numbers<[1], [0], [0], [1], [0, 0, 1, 1], [], []>} : vector<2x128xf32>, vector<128x256xf32>, vector<2x256xf32> -> vector<2x256xf32>
    %494 = arith.addf %492, %493 : vector<2x256xf32>
    %495 = vector.extract_strided_slice %494 {offsets = [0, 0], sizes = [2, 128], strides = [1, 1]} : vector<2x256xf32> to vector<2x128xf32>
    %496 = vector.extract_strided_slice %494 {offsets = [0, 128], sizes = [2, 128], strides = [1, 1]} : vector<2x256xf32> to vector<2x128xf32>
    %497 = arith.negf %495 : vector<2x128xf32>
    %498 = math.exp %497 : vector<2x128xf32>
    %cst_158 = arith.constant 1.000000e+00 : f32
    %499 = vector.broadcast %cst_158 : f32 to vector<2x128xf32>
    %500 = arith.addf %499, %498 : vector<2x128xf32>
    %501 = arith.divf %499, %500 : vector<2x128xf32>
    %502 = math.tanh %495 : vector<2x128xf32>
    %503 = arith.negf %496 : vector<2x128xf32>
    %504 = math.exp %503 : vector<2x128xf32>
    %cst_159 = arith.constant 1.000000e+00 : f32
    %505 = vector.broadcast %cst_159 : f32 to vector<2x128xf32>
    %506 = arith.addf %505, %504 : vector<2x128xf32>
    %507 = arith.divf %505, %506 : vector<2x128xf32>
    %c64_i32_160 = arith.constant 64 : i32
    %508 = tpu.dynamic_rotate %502 by %c64_i32_160 dim 1 : vector<2x128xf32>, i32 -> vector<2x128xf32>
    %509 = arith.mulf %501, %508 : vector<2x128xf32>
    %510 = arith.mulf %507, %485 : vector<2x128xf32>
    %511 = arith.addf %510, %509 : vector<2x128xf32>
    %c64_i32_161 = arith.constant 64 : i32
    %512 = tpu.dynamic_rotate %507 by %c64_i32_161 dim 1 : vector<2x128xf32>, i32 -> vector<2x128xf32>
    %513 = math.tanh %511 : vector<2x128xf32>
    %514 = arith.mulf %512, %513 : vector<2x128xf32>
    %515 = vector.extract_strided_slice %514 {offsets = [0, 0], sizes = [2, 32], strides = [1, 1]} : vector<2x128xf32> to vector<2x32xf32>
    %c0_162 = arith.constant 0 : index
    %c480 = arith.constant 480 : index
    %516 = vector.load %arg16[%c0_162, %c480] : memref<2x512xf32, #tpu.memory_space<vmem>>, vector<2x32xf32>
    tpu.vector_store %arg16[%c0_162, %c480], %515 {strides = array<i32>} : memref<2x512xf32, #tpu.memory_space<vmem>>, vector<2x32xf32>,
    %c0_163 = arith.constant 0 : index
    %c0_164 = arith.constant 0 : index
    %517 = vector.load %arg16[%c0_163, %c0_164] : memref<2x512xf32, #tpu.memory_space<vmem>>, vector<2x512xf32>
    %c0_165 = arith.constant 0 : index
    %c0_166 = arith.constant 0 : index
    %518 = vector.load %arg13[%c0_165, %c0_166] : memref<512x128xf32, #tpu.memory_space<vmem>>, vector<512x128xf32>
    %cst_167 = arith.constant dense<0.000000e+00> : vector<2x128xf32>
    %519 = tpu.matmul %517, %518, %cst_167 {dimension_numbers = #tpu.dot_dimension_numbers<[1], [0], [0], [1], [0, 0, 1, 1], [], []>} : vector<2x512xf32>, vector<512x128xf32>, vector<2x128xf32> -> vector<2x128xf32>
    %c0_168 = arith.constant 0 : index
    %c0_169 = arith.constant 0 : index
    %520 = vector.load %arg14[%c0_168, %c0_169] : memref<1x128xf32, #tpu.memory_space<vmem>>, vector<1x128xf32>
    %521 = vector.broadcast %520 : vector<1x128xf32> to vector<2x128xf32>
    %522 = arith.addf %519, %521 : vector<2x128xf32>
    %c0_170 = arith.constant 0 : index
    %c0_171 = arith.constant 0 : index
    %523 = vector.load %arg15[%c0_170, %c0_171] : memref<2x128xf32, #tpu.memory_space<vmem>>, vector<2x128xf32>
    tpu.vector_store %arg15[%c0_170, %c0_171], %522 {strides = array<i32>} : memref<2x128xf32, #tpu.memory_space<vmem>>, vector<2x128xf32>,
    return
  }
}

</mosaic_0001>

<bundles_post_ra>
// kernel: tpu_custom_call.1
= control target key start
LH: loop header
LB: loop body
LE: loop exit
PB: predicated region body
PF: predicated region fallthrough
CT: control target
= control target key end

     0   :  { %20 = vsyncpa [#allocation4], 0  ;;  %s7566_s0 = inlined_call_operand.vmem [shape: f32[32,8], index: 0, kind: input, shape index: {}]   ;;  %s7567_s1 = inlined_call_operand.hbm [shape: f32[5,32,32], index: 1, kind: input, shape index: {}]   ;;  %s7568_s2 = inlined_call_operand.vmem [shape: f32[8,32], index: 2, kind: input, shape index: {}]   ;;  %s7569_s3 = inlined_call_operand.vmem [shape: f32[1,32], index: 3, kind: input, shape index: {}]   ;;  %s7570_s4 = inlined_call_operand.hbm [shape: f32[32,32], index: 4, kind: input, shape index: {}]   ;;  %s7571_s5 = inlined_call_operand.hbm [shape: f32[5,32], index: 5, kind: input, shape index: {}]   ;;  %s7572_s6 = inlined_call_operand.hbm [shape: f32[32,32], index: 6, kind: input, shape index: {}]   ;;  %s7573_s7 = inlined_call_operand.vmem [shape: f32[1,32], index: 7, kind: input, shape index: {}]   ;;  %s7574_s8 = inlined_call_operand.hbm [shape: f32[32,32], index: 8, kind: input, shape index: {}]   ;;  %s7575_s9 = inlined_call_operand.hbm [shape: f32[5,32], index: 9, kind: input, shape index: {}]   ;;  %s7576_s10 = inlined_call_operand.vmem [shape: f32[32,256], index: 10, kind: input, shape index: {}]   ;;  %s7577_s11 = inlined_call_operand.hbm [shape: f32[128,256], index: 11, kind: input, shape index: {}]   ;;  %s7578_s12 = inlined_call_operand.vmem [shape: f32[1,256], index: 12, kind: input, shape index: {}]   ;;  %s7579_s13 = inlined_call_operand.hbm [shape: f32[512,128], index: 13, kind: input, shape index: {}]   ;;  %s7580_s14 = inlined_call_operand.vmem [shape: f32[1,128], index: 14, kind: input, shape index: {}]   ;;  %s7581_s15 = inlined_call_operand.hbm [shape: f32[2,128], index: 15, kind: output, shape index: {}]  }
   0x1   :  { %21 = vsyncpa [#allocation7], 0 }
   0x2   :  { %22 = vsyncpa [#allocation10], 0 }
   0x3   :  { %23 = vsyncpa [#allocation13], 0 }
   0x4   :  { %24 = vsyncpa [#allocation16], 0 }
   0x5   :  { %25 = vsyncpa [#allocation5], 0  ;;  %s6420_s18 = smov [#allocation6]   ;;  %s6421_s20 = smov [#allocation9]  }
   0x6   :  { %s49_s19 = sshll.u32 %s6420_s18, 4  ;;  %s71_s21 = sshll.u32 %s6421_s20, 4  ;;  %s50_s19 = int_to_ptr.vmem [resolvable:$true] %s49_s19  ;;  %s6518_s21 = int_to_ptr.vmem [resolvable:$true] %s71_s21 }
   0x7   :  { %s6210_s24 = scalar_lea.hbm %s7570_s4, 512 }
   0x8   :  { %p6211_p0 = scmp.ne.s32.totalorder %s7570_s4, %s6210_s24  ;;  %p6214_p1 = scmp.lt.u32.totalorder %s6210_s24, %s7570_s4 }
   0xa   :  { %p6216_p2 = pnand %p6214_p1, %p6211_p0 }
   0xc   :  { %6219 = shalt.err (!%p6216_p2)
}
   0xd   :  { %s6220_s29 = scalar_lea.vmem %s50_s19, 512  ;;  %p6225_p4 = scmp.lt.s32.totalorder %s50_s19, %s50_s19 }
   0xe   :  { %p6221_p3 = scmp.ne.s32.totalorder %s50_s19, %s6220_s29  ;;  %p6226_p5 = scmp.lt.s32.totalorder %s6220_s29, %s6220_s29 }
  0x10   :  { %p6227_p6 = por %p6226_p5, %p6225_p4 }
  0x12   :  { %p6228_p7 = pnand %p6227_p6, %p6221_p3 }
  0x14   :  { %6231 = shalt.err (!%p6228_p7)
}
  0x15   :  { %s6422_s30 = smov 128   ;;  %s6423_s16 = smov 8  }
  0x16   :  { %55 = dma.hbm_to_vmem [thread:$0]  %s7570_s4, 512, %s50_s19, [#allocation7], %s6422_s30, %s6422_s30, %s6423_s16  }
  0x17   :  { %s6232_s23 = scalar_lea.hbm %s7572_s6, 512 }
  0x18   :  { %p6233_p8 = scmp.ne.s32.totalorder %s7572_s6, %s6232_s23  ;;  %p6236_p9 = scmp.lt.u32.totalorder %s6232_s23, %s7572_s6 }
  0x1a   :  { %p6238_p10 = pnand %p6236_p9, %p6233_p8 }
  0x1c   :  { %6241 = shalt.err (!%p6238_p10)
}
  0x1d   :  { %s6242_s28 = scalar_lea.vmem %s6518_s21, 512  ;;  %p6247_p12 = scmp.lt.s32.totalorder %s6518_s21, %s6518_s21 }
  0x1e   :  { %p6243_p11 = scmp.ne.s32.totalorder %s6518_s21, %s6242_s28  ;;  %p6248_p13 = scmp.lt.s32.totalorder %s6242_s28, %s6242_s28 }
  0x20   :  { %p6249_p0 = por %p6248_p13, %p6247_p12 }
  0x22   :  { %p6250_p1 = pnand %p6249_p0, %p6243_p11 }
  0x24   :  { %6253 = shalt.err (!%p6250_p1)
}
  0x25   :  { %77 = dma.hbm_to_vmem [thread:$0]  %s7572_s6, 512, %s6518_s21, [#allocation10], %s6422_s30, %s6422_s30, %s6423_s16  }
  0x26   :  { %s6424_s29 = smov [#allocation12]   ;;  %s6425_s18 = smov [#allocation3]  }
  0x27   :  { %s98_s17 = sshll.u32 %s6424_s29, 4  ;;  %s33_s20 = sshll.u32 %s6425_s18, 4  ;;  %s99_s17 = int_to_ptr.vmem [resolvable:$true] %s98_s17  ;;  %s6555_s20 = int_to_ptr.vmem [resolvable:$true] %s33_s20 }
  0x28   :  { %s6254_s24 = scalar_lea.hbm %s7575_s9, 128 }
  0x29   :  { %p6255_p2 = scmp.ne.s32.totalorder %s7575_s9, %s6254_s24  ;;  %p6258_p3 = scmp.lt.u32.totalorder %s6254_s24, %s7575_s9 }
  0x2b   :  { %p6260_p4 = pnand %p6258_p3, %p6255_p2 }
  0x2d   :  { %6263 = shalt.err (!%p6260_p4)
}
  0x2e   :  { %s6264_s6 = scalar_lea.vmem %s99_s17, 128  ;;  %p6269_p6 = scmp.lt.s32.totalorder %s99_s17, %s99_s17 }
  0x2f   :  { %p6265_p5 = scmp.ne.s32.totalorder %s99_s17, %s6264_s6  ;;  %p6270_p7 = scmp.lt.s32.totalorder %s6264_s6, %s6264_s6 }
  0x31   :  { %p6271_p8 = por %p6270_p7, %p6269_p6 }
  0x33   :  { %p6272_p9 = pnand %p6271_p8, %p6265_p5 }
  0x35   :  { %6275 = shalt.err (!%p6272_p9)
}
  0x36   :  { %101 = dma.hbm_to_vmem [thread:$0]  %s7575_s9, 128, %s99_s17, [#allocation13]  }
  0x37   :  { %s6276_s18 = scalar_lea.hbm %s7567_s1, 2560 }
  0x38   :  { %p6277_p10 = scmp.ne.s32.totalorder %s7567_s1, %s6276_s18  ;;  %p6280_p11 = scmp.lt.u32.totalorder %s6276_s18, %s7567_s1 }
  0x3a   :  { %p6282_p12 = pnand %p6280_p11, %p6277_p10 }
  0x3c   :  { %6285 = shalt.err (!%p6282_p12)
}
  0x3d   :  { %s6286_s26 = scalar_lea.vmem %s6555_s20, 2560  ;;  %p6291_p0 = scmp.lt.s32.totalorder %s6555_s20, %s6555_s20 }
  0x3e   :  { %p6287_p13 = scmp.ne.s32.totalorder %s6555_s20, %s6286_s26  ;;  %p6292_p1 = scmp.lt.s32.totalorder %s6286_s26, %s6286_s26 }
  0x40   :  { %p6293_p2 = por %p6292_p1, %p6291_p0 }
  0x42   :  { %p6294_p3 = pnand %p6293_p2, %p6287_p13 }
  0x44   :  { %6297 = shalt.err (!%p6294_p3)
}
  0x45   :  { %39 = dma.hbm_to_vmem [thread:$0]  %s7567_s1, 2560, %s6555_s20, [#allocation4], %s6422_s30, %s6422_s30, %s6423_s16  }
  0x46   :  { %s6426_s27 = smov [#allocation8]   ;;  %s6427_s6 = smov [#allocation11]  }
  0x47   :  { %s62_s28 = sshll.u32 %s6426_s27, 4  ;;  %s85_s21 = sshll.u32 %s6427_s6, 4  ;;  %s63_s28 = int_to_ptr.vmem [resolvable:$true] %s62_s28  ;;  %s6589_s21 = int_to_ptr.vmem [resolvable:$true] %s85_s21 }
  0x48   :  { %s6298_s29 = scalar_lea.hbm %s7571_s5, 128 }
  0x49   :  { %p6299_p4 = scmp.ne.s32.totalorder %s7571_s5, %s6298_s29  ;;  %p6302_p5 = scmp.lt.u32.totalorder %s6298_s29, %s7571_s5 }
  0x4b   :  { %p6304_p6 = pnand %p6302_p5, %p6299_p4 }
  0x4d   :  { %6307 = shalt.err (!%p6304_p6)
}
  0x4e   :  { %s6308_s1 = scalar_lea.vmem %s63_s28, 128  ;;  %p6313_p8 = scmp.lt.s32.totalorder %s63_s28, %s63_s28 }
  0x4f   :  { %p6309_p7 = scmp.ne.s32.totalorder %s63_s28, %s6308_s1  ;;  %p6314_p9 = scmp.lt.s32.totalorder %s6308_s1, %s6308_s1 }
  0x51   :  { %p6315_p10 = por %p6314_p9, %p6313_p8 }
  0x53   :  { %p6316_p11 = pnand %p6315_p10, %p6309_p7 }
  0x55   :  { %6319 = shalt.err (!%p6316_p11)
}
  0x56   :  { %65 = dma.hbm_to_vmem [thread:$0]  %s7571_s5, 128, %s63_s28, [#allocation7]  }
  0x57   :  { %s6320_s17 = scalar_lea.hbm %s7574_s8, 512 }
  0x58   :  { %p6321_p12 = scmp.ne.s32.totalorder %s7574_s8, %s6320_s17  ;;  %p6324_p13 = scmp.lt.u32.totalorder %s6320_s17, %s7574_s8 }
  0x5a   :  { %p6326_p0 = pnand %p6324_p13, %p6321_p12 }
  0x5c   :  { %6329 = shalt.err (!%p6326_p0)
}
  0x5d   :  { %s6330_s29 = scalar_lea.vmem %s6589_s21, 512  ;;  %p6335_p2 = scmp.lt.s32.totalorder %s6589_s21, %s6589_s21 }
  0x5e   :  { %p6331_p1 = scmp.ne.s32.totalorder %s6589_s21, %s6330_s29  ;;  %p6336_p3 = scmp.lt.s32.totalorder %s6330_s29, %s6330_s29 }
  0x60   :  { %p6337_p4 = por %p6336_p3, %p6335_p2 }
  0x62   :  { %p6338_p5 = pnand %p6337_p4, %p6331_p1 }
  0x64   :  { %6341 = shalt.err (!%p6338_p5)
}
  0x65   :  { %91 = dma.hbm_to_vmem [thread:$0]  %s7574_s8, 512, %s6589_s21, [#allocation10], %s6422_s30, %s6422_s30, %s6423_s16  }
  0x66   :  { %s6428_s18 = smov [#allocation14]   ;;  %s6342_s1 = scalar_lea.hbm %s7577_s11, 4096 }
  0x67   :  { %s109_s22 = sshll.u32 %s6428_s18, 4  ;;  %p6343_p6 = scmp.ne.s32.totalorder %s7577_s11, %s6342_s1  ;;  %s110_s22 = int_to_ptr.vmem [resolvable:$true] %s109_s22 }
  0x68   :  { %p6346_p7 = scmp.lt.u32.totalorder %s6342_s1, %s7577_s11 }
  0x6a   :  { %p6348_p8 = pnand %p6346_p7, %p6343_p6 }
  0x6c   :  { %6351 = shalt.err (!%p6348_p8)
}
  0x6d   :  { %s6352_s17 = scalar_lea.vmem %s110_s22, 4096  ;;  %p6357_p10 = scmp.lt.s32.totalorder %s110_s22, %s110_s22 }
  0x6e   :  { %p6353_p9 = scmp.ne.s32.totalorder %s110_s22, %s6352_s17  ;;  %p6358_p11 = scmp.lt.s32.totalorder %s6352_s17, %s6352_s17 }
  0x70   :  { %p6359_p12 = por %p6358_p11, %p6357_p10 }
  0x72   :  { %p6360_p13 = pnand %p6359_p12, %p6353_p9 }
  0x74   :  { %6363 = shalt.err (!%p6360_p13)
}
  0x75   :  { %s6429_s8 = smov 256   ;;  %s6430_s21 = smov 16  }
  0x76   :  { %115 = dma.hbm_to_vmem [thread:$0]  %s7577_s11, 4096, %s110_s22, [#allocation13], %s6429_s8, %s6429_s8, %s6430_s21  }
  0x77   :  { %s6431_s4 = smov [#allocation15]   ;;  %s6364_s28 = scalar_lea.hbm %s7579_s13, 8192 }
  0x78   :  { %s123_s19 = sshll.u32 %s6431_s4, 4  ;;  %p6365_p0 = scmp.ne.s32.totalorder %s7579_s13, %s6364_s28  ;;  %s124_s19 = int_to_ptr.vmem [resolvable:$true] %s123_s19 }
  0x79   :  { %p6368_p1 = scmp.lt.u32.totalorder %s6364_s28, %s7579_s13 }
  0x7b   :  { %p6370_p2 = pnand %p6368_p1, %p6365_p0 }
  0x7d   :  { %6373 = shalt.err (!%p6370_p2)
}
  0x7e   :  { %s6374_s20 = scalar_lea.vmem %s124_s19, 8192  ;;  %p6379_p4 = scmp.lt.s32.totalorder %s124_s19, %s124_s19 }
  0x7f   :  { %p6375_p3 = scmp.ne.s32.totalorder %s124_s19, %s6374_s20  ;;  %p6380_p5 = scmp.lt.s32.totalorder %s6374_s20, %s6374_s20 }
  0x81   :  { %p6381_p6 = por %p6380_p5, %p6379_p4 }
  0x83   :  { %p6382_p7 = pnand %p6381_p6, %p6375_p3 }
  0x85   :  { %6385 = shalt.err (!%p6382_p7)
}
  0x86   :  { %129 = dma.hbm_to_vmem [thread:$0]  %s7579_s13, 8192, %s124_s19, [#allocation16], %s6422_s30, %s6422_s30, %s6423_s16  }
  0x87   :  { %6408 = dma.done.wait [#allocation4], 2560  }
  0x88   :  { %6409 = vsyncadd [#allocation4], 4294964736 }
  0x89   :  { %6410 = dma.done.wait [#allocation7], 640  }
  0x8a   :  { %6411 = vsyncadd [#allocation7], 4294966656 }
  0x8b   :  { %6412 = dma.done.wait [#allocation10], 1024  }
  0x8c   :  { %6413 = vsyncadd [#allocation10], 4294966272 }
  0x8d   :  { %6414 = dma.done.wait [#allocation13], 4224  }
  0x8e   :  { %6415 = vsyncadd [#allocation13], 4294963072 }
  0x8f   :  { %6416 = dma.done.wait [#allocation16], 8192  }
  0x90   :  { %6417 = vsyncadd [#allocation16], 4294959104  ;;  %vm168_vm0 = vcmask 64512   ;;  %v160_v0 = vld [vmem:[%s7568_s2] sm:$0xff]  ;;  %v157_v2 = vld [vmem:[%s7566_s0 + $0x8] sm:$0xff]  ;;  %vm274_vm1 = vcmask 261120   ;;  %v474_v59 = vlaneseq }
  0x91   :  { %v156_v1 = vld [vmem:[%s7566_s0] sm:$0xff]  ;;  %4929 = vmatprep.subr.mxu0 %v160_v0  ;;  %v158_v3 = vld [vmem:[%s7566_s0 + $0x10] sm:$0xff]  ;;  %v270_v4 = vld [vmem:[#allocation6] sm:$0xff]  ;;  %vm1910_vm2 = vcmask 1041409   ;;  %vm1940_vm3 = vcmask 254976   ;;  %s6435_s13 = smov 32  }
  0x92   :  { %4931 = vmatprep.mubr.msk.f32.mxu0 %vm168_vm0, %v156_v1  ;;  %4930 = vmatpush3.msra.mxu0 %v160_v0  ;;  %v271_v5 = vld [vmem:[#allocation6 + $0x8] sm:$0xff]  ;;  %v159_v7 = vld [vmem:[%s7566_s0 + $0x18] sm:$0xff]  ;;  %v273_v9 = vld [vmem:[#allocation6 + $0x18] sm:$0xff]  ;;  %v6768_v60 = vshrl.u32 %v474_v59, 7  ;;  %s6436_s30 = smov 96   ;;  %vm2100_vm4 = vcmask 517376  }
  0x93   :  { %4932 = vmatmul.mubr.msk.f32.vlgmr.msra.gmra.mrb[0].mxu0 %vm168_vm0, %v157_v2  ;;  %v5119_v6 = vpack.c.bf16 %v271_v5, %v270_v4  ;;  %v272_v8 = vld [vmem:[#allocation6 + $0x10] sm:$0xff]  ;;  %v4623_v11 = vld [vmem:[%s7569_s3] ss:$0 sm:$0xff]  ;;  %v6676_v24 = vld [vmem:[#allocation3] sm:$0xff]  ;;  %vm2266_vm5 = vcmask 779776   ;;  %vm2432_vm6 = vcmask 1042176  }
  0x94   :  { %4934 = vmatprep.mubr.msk.f32.mxu0 %vm168_vm0, %v158_v3  ;;  %v5123_v10 = vpack.c.bf16 %v273_v9, %v272_v8  ;;  %v6680_v25 = vld [vmem:[#allocation3 + $0x20] sm:$0xff]  ;;  %v6696_v32 = vld [vmem:[#allocation3 + $0x8] sm:$0xff]  ;;  %v6704_v34 = vld [vmem:[#allocation3 + $0x10] sm:$0xff]  ;;  %v6771_v61 = vsub.s32 0, %v6768_v60  ;;  %v6774_v62 = vsub.s32 1, %v6768_v60  ;;  %v704_v4 = vsub.s32 2, %v6768_v60 }
  0x95   :  { %5120 = vmatprep.subr.bf16.mxu1 %v5119_v6  ;;  %v6698_v33 = vld [vmem:[#allocation3 + $0x28] sm:$0xff]  ;;  %v6706_v35 = vld [vmem:[#allocation3 + $0x30] sm:$0xff]  ;;  %v6708_v36 = vld [vmem:[#allocation3 + $0x18] sm:$0xff]  ;;  %v818_v9 = vsub.s32 3, %v6768_v60  ;;  %s6437_s2 = smov [#allocation17]  }
  0x96   :  { %5122 = vmatpush3.bf16.msra.mxu1 %v5119_v6  ;;  %v6710_v37 = vld [vmem:[#allocation3 + $0x38] sm:$0xff]  ;;  %v6716_v38 = vld [vmem:[#allocation3 + $0x40] sm:$0xff]  ;;  %v6724_v40 = vld [vmem:[#allocation3 + $0x48] sm:$0xff]  ;;  %s4610_s21 = sshll.u32 %s6437_s2, 4  ;;  %s4611_s21 = int_to_ptr.vmem [resolvable:$true] %s4610_s21 }
  0x97   :  { %4935 = vmatmul.mubr.msk.f32.gmra.mrb[2].mxu0 %vm168_vm0, %v159_v7  ;;  %5124 = vmatprep.subr.bf16.mxu1 %v5123_v10  ;;  %v6722_v39 = vld [vmem:[#allocation3 + $0x60] sm:$0xff]  ;;  %v6726_v41 = vld [vmem:[#allocation3 + $0x68] sm:$0xff]  ;;  %v6730_v42 = vld [vmem:[#allocation3 + $0x50] sm:$0xff]  ;;  %s6386_s27 = scalar_lea.vmem %s4611_s21, 32  ;;  %p6391_p9 = scmp.lt.s32.totalorder %s4611_s21, %s4611_s21 }
  0x98   :  { %4959 = vmatprep.mubr.msk.f32.mxu0 %vm274_vm1, %v6676_v24  ;;  %v6734_v43 = vld [vmem:[#allocation3 + $0x70] sm:$0xff]  ;;  %v6742_v44 = vld [vmem:[#allocation3 + $0x58] sm:$0xff]  ;;  %v6748_v46 = vld [vmem:[#allocation3 + $0x80] sm:$0xff]  ;;  %p6387_p8 = scmp.ne.s32.totalorder %s4611_s21, %s6386_s27  ;;  %p6392_p10 = scmp.lt.s32.totalorder %s6386_s27, %s6386_s27 }
  0x99   :  { %v6744_v45 = vld [vmem:[#allocation3 + $0x78] sm:$0xff]  ;;  %v6756_v47 = vld [vmem:[#allocation3 + $0x88] sm:$0xff]  ;;  %v6758_v48 = vld [vmem:[#allocation3 + $0x90] sm:$0xff] }
  0x9a   :  { %5126 = vmatpush3.bf16.msra.mxu1 %v5123_v10  ;;  %v6764_v49 = vld [vmem:[#allocation3 + $0x98] sm:$0xff]  ;;  %v942_v50 = vld [vmem:[#allocation9] sm:$0xff]  ;;  %v943_v51 = vld [vmem:[#allocation9 + $0x8] sm:$0xff]  ;;  %p6393_p11 = por %p6392_p10, %p6391_p9 }
  0x9b   :  { %v5167_v52 = vpack.c.bf16 %v943_v51, %v942_v50  ;;  %v944_v53 = vld [vmem:[#allocation9 + $0x10] sm:$0xff]  ;;  %v945_v54 = vld [vmem:[#allocation9 + $0x18] sm:$0xff]  ;;  %v1054_v56 = vld [vmem:[#allocation11] sm:$0xff] }
  0x9c   :  { %v5171_v55 = vpack.c.bf16 %v945_v54, %v944_v53  ;;  %v1055_v57 = vld [vmem:[#allocation11 + $0x8] sm:$0xff]  ;;  %v372_v63 = vld [vmem:[#allocation8] sm:$0x1f]  ;;  %p6394_p12 = pnand %p6393_p11, %p6387_p8 }
  0x9d   :  { %v5175_v58 = vpack.c.bf16 %v1055_v57, %v1054_v56  ;;  %v477_v0 = vrot.slane %v372_v63, %v6771_v61  ;;  %v591_v1 = vrot.slane %v372_v63, %v6774_v62  ;;  %v932_v57 = vsub.s32 4, %v6768_v60 }
 0x166   :  { %v4933_v12 = vpop.f32.mrb[0].mxu0 }
 0x167   :  { %v253_v13 = vadd.f32 %v4933_v12, %v4623_v11  ;;  %v247_v14 = vpop.f32.mrb[1].mxu0 }
 0x168   :  { %v248_v15 = vadd.f32 %v4623_v11, %v247_v14 }
 0x169   :  { %v267_v18 = vmax.f32 %v253_v13, 0.0 }
 0x16a   :  { %v266_v16 = vmax.f32 %v248_v15, 0.0  ;;  %v4936_v17 = vpop.f32.mrb[2].mxu0 }
 0x16b   :  { %v263_v19 = vadd.f32 %v4936_v17, %v4623_v11  ;;  %v257_v20 = vpop.f32.mrb[3].mxu0 }
 0x16c   :  { %v258_v21 = vadd.f32 %v4623_v11, %v257_v20  ;;  %4945 = vmatprep.mubr.msk.f32.mxu1 %vm274_vm1, %v266_v16  ;;  %v705_v16 = vrot.slane %v372_v63, %v704_v4 }
 0x16d   :  { %4946 = vmatmul.mubr.msk.f32.vlgmr.msra.gmra.mrb[0].mxu1 %vm274_vm1, %v267_v18  ;;  %v269_v23 = vmax.f32 %v263_v19, 0.0 }
 0x16e   :  { %v268_v22 = vmax.f32 %v258_v21, 0.0 }
 0x170   :  { %4948 = vmatprep.mubr.msk.f32.mxu1 %vm274_vm1, %v268_v22  ;;  %v819_v22 = vrot.slane %v372_v63, %v818_v9 }
 0x171   :  { %4949 = vmatmul.mubr.msk.f32.gmra.mrb[2].mxu1 %vm274_vm1, %v269_v23 }
 0x172   :  { %4973 = vmatprep.mubr.msk.f32.mxu1 %vm274_vm1, %v6680_v25 }
 0x240   :  { %v6684_v26 = vpop.f32.mrb[0].mxu1 }
 0x241   :  { %v6686_v27 = vpop.f32.mrb[1].mxu1 }
 0x242   :  { %v5127_v28 = vpack.c.bf16 %v6684_v26, %v6686_v27 }
 0x244   :  { %v6690_v29 = vpop.f32.mrb[2].mxu1  ;;  %5128 = vmatprep.subr.bf16.mxu0 %v5127_v28  ;;  %5136 = vmatprep.subr.bf16.mxu1 %v5127_v28 }
 0x245   :  { %v6692_v30 = vpop.f32.mrb[3].mxu1  ;;  %5130 = vmatpush3.bf16.msra.mxu0 %v5127_v28  ;;  %5138 = vmatpush3.bf16.msra.mxu1 %v5127_v28 }
 0x246   :  { %v5131_v31 = vpack.c.bf16 %v6690_v29, %v6692_v30 }
 0x248   :  { %5132 = vmatprep.subr.bf16.mxu0 %v5131_v31  ;;  %5140 = vmatprep.subr.bf16.mxu1 %v5131_v31 }
 0x249   :  { %5134 = vmatpush3.bf16.msra.mxu0 %v5131_v31  ;;  %5142 = vmatpush3.bf16.msra.mxu1 %v5131_v31 }
 0x24a   :  { %5144 = vmatprep.subr.bf16.mxu0 %v5127_v28  ;;  %5152 = vmatprep.subr.bf16.mxu1 %v5127_v28 }
 0x24c   :  { %4960 = vmatmul.mubr.msk.f32.vlgmr.msra.gmra.mrb[4].mxu0 %vm274_vm1, %v6696_v32  ;;  %4974 = vmatmul.mubr.msk.f32.vlgmr.msra.gmra.mrb[4].mxu1 %vm274_vm1, %v6698_v33 }
 0x24d   :  { %5146 = vmatpush3.bf16.msra.mxu0 %v5127_v28  ;;  %5154 = vmatpush3.bf16.msra.mxu1 %v5127_v28 }
 0x24e   :  { %5148 = vmatprep.subr.bf16.mxu0 %v5131_v31  ;;  %5156 = vmatprep.subr.bf16.mxu1 %v5131_v31 }
 0x24f   :  { %4962 = vmatprep.mubr.msk.f32.mxu0 %vm274_vm1, %v6704_v34  ;;  %4976 = vmatprep.mubr.msk.f32.mxu1 %vm274_vm1, %v6706_v35 }
 0x250   :  { %4963 = vmatmul.mubr.msk.f32.gmra.mrb[6].mxu0 %vm274_vm1, %v6708_v36  ;;  %4977 = vmatmul.mubr.msk.f32.gmra.mrb[6].mxu1 %vm274_vm1, %v6710_v37 }
 0x251   :  { %5150 = vmatpush3.bf16.msra.mxu0 %v5131_v31  ;;  %5158 = vmatpush3.bf16.msra.mxu1 %v5131_v31 }
 0x252   :  { %5160 = vmatprep.subr.bf16.mxu0 %v5127_v28  ;;  %4987 = vmatprep.mubr.msk.f32.mxu0 %vm274_vm1, %v6716_v38 }
 0x253   :  { %5001 = vmatprep.mubr.msk.f32.mxu1 %vm274_vm1, %v6722_v39  ;;  %5168 = vmatprep.subr.bf16.mxu1 %v5167_v52 }
 0x254   :  { %4988 = vmatmul.mubr.msk.f32.vlgmr.msra.gmra.mrb[8].mxu0 %vm274_vm1, %v6724_v40  ;;  %5002 = vmatmul.mubr.msk.f32.vlgmr.msra.gmra.mrb[8].mxu1 %vm274_vm1, %v6726_v41 }
 0x255   :  { %5162 = vmatpush3.bf16.msra.mxu0 %v5127_v28  ;;  %4990 = vmatprep.mubr.msk.f32.mxu0 %vm274_vm1, %v6730_v42 }
 0x256   :  { %5164 = vmatprep.subr.bf16.mxu0 %v5131_v31  ;;  %5004 = vmatprep.mubr.msk.f32.mxu1 %vm274_vm1, %v6734_v43 }
 0x257   :  { %5170 = vmatpush3.bf16.msra.mxu1 %v5167_v52 }
 0x258   :  { %4991 = vmatmul.mubr.msk.f32.gmra.mrb[10].mxu0 %vm274_vm1, %v6742_v44  ;;  %5005 = vmatmul.mubr.msk.f32.gmra.mrb[10].mxu1 %vm274_vm1, %v6744_v45 }
 0x259   :  { %5166 = vmatpush3.bf16.msra.mxu0 %v5131_v31  ;;  %5015 = vmatprep.mubr.msk.f32.mxu0 %vm274_vm1, %v6748_v46 }
 0x25a   :  { %5172 = vmatprep.subr.bf16.mxu1 %v5171_v55  ;;  %5176 = vmatprep.subr.bf16.mxu0 %v5175_v58 }
 0x25b   :  { %5174 = vmatpush3.bf16.msra.mxu1 %v5171_v55 }
 0x25c   :  { %5016 = vmatmul.mubr.msk.f32.vlgmr.msra.gmra.mrb[12].mxu0 %vm274_vm1, %v6756_v47 }
 0x25d   :  { %5018 = vmatprep.mubr.msk.f32.mxu0 %vm274_vm1, %v6758_v48  ;;  %5178 = vmatpush3.bf16.msra.mxu0 %v5175_v58 }
 0x260   :  { %5019 = vmatmul.mubr.msk.f32.gmra.mrb[14].mxu0 %vm274_vm1, %v6764_v49 }
 0x31f   :  { %v4961_v2 = vpop.f32.mrb[4].mxu0  ;;  %v4975_v3 = vpop.f32.mrb[4].mxu1 }
 0x320   :  { %v479_v5 = vmul.f32 %v4961_v2, %v477_v0  ;;  %v455_v6 = vpop.f32.mrb[5].mxu0  ;;  %v593_v7 = vmul.f32 %v4975_v3, %v591_v1  ;;  %v569_v8 = vpop.f32.mrb[5].mxu1 }
 0x321   :  { %v478_v10 = vmul.f32 %v477_v0, %v455_v6  ;;  %v592_v11 = vmul.f32 %v591_v1, %v569_v8 }
 0x322   :  { %v483_v12 = vadd.f32 %v6684_v26, %v479_v5 }
 0x323   :  { %v482_v13 = vadd.f32 %v478_v10, %v6686_v27  ;;  %v4964_v14 = vpop.f32.mrb[6].mxu0  ;;  %v4978_v15 = vpop.f32.mrb[6].mxu1  ;;  %v933_v10 = vrot.slane %v372_v63, %v932_v57 }
 0x324   :  { %v597_v17 = vadd.f32 %v593_v7, %v483_v12  ;;  %v481_v18 = vmul.f32 %v4964_v14, %v477_v0  ;;  %v465_v19 = vpop.f32.mrb[7].mxu0  ;;  %v595_v20 = vmul.f32 %v4978_v15, %v591_v1  ;;  %v579_v21 = vpop.f32.mrb[7].mxu1 }
 0x325   :  { %v596_v23 = vadd.f32 %v592_v11, %v482_v13  ;;  %v480_v28 = vmul.f32 %v477_v0, %v465_v19  ;;  %v594_v31 = vmul.f32 %v591_v1, %v579_v21 }
 0x326   :  { %v485_v26 = vadd.f32 %v6690_v29, %v481_v18 }
 0x327   :  { %v484_v27 = vadd.f32 %v480_v28, %v6692_v30  ;;  %v4989_v50 = vpop.f32.mrb[8].mxu0  ;;  %v5003_v51 = vpop.f32.mrb[8].mxu1 }
 0x328   :  { %v599_v52 = vadd.f32 %v595_v20, %v485_v26  ;;  %v707_v53 = vmul.f32 %v4989_v50, %v705_v16  ;;  %v683_v54 = vpop.f32.mrb[9].mxu0  ;;  %v821_v55 = vmul.f32 %v5003_v51, %v819_v22  ;;  %v797_v56 = vpop.f32.mrb[9].mxu1 }
 0x329   :  { %v598_v58 = vadd.f32 %v594_v31, %v484_v27  ;;  %v706_v59 = vmul.f32 %v705_v16, %v683_v54  ;;  %v820_v2 = vmul.f32 %v819_v22, %v797_v56  ;;  %v4652_v54 = vld [vmem:[%s7573_s7] ss:$0 sm:$0xff] }
 0x32a   :  { %v711_v3 = vadd.f32 %v707_v53, %v597_v17 }
 0x32b   :  { %v710_v5 = vadd.f32 %v706_v59, %v596_v23  ;;  %v4992_v0 = vpop.f32.mrb[10].mxu0  ;;  %v5006_v1 = vpop.f32.mrb[10].mxu1 }
 0x32c   :  { %v825_v6 = vadd.f32 %v821_v55, %v711_v3  ;;  %v709_v29 = vmul.f32 %v4992_v0, %v705_v16  ;;  %v693_v7 = vpop.f32.mrb[11].mxu0  ;;  %v823_v30 = vmul.f32 %v5006_v1, %v819_v22  ;;  %v807_v8 = vpop.f32.mrb[11].mxu1 }
 0x32d   :  { %v824_v11 = vadd.f32 %v820_v2, %v710_v5  ;;  %v708_v12 = vmul.f32 %v705_v16, %v693_v7  ;;  %v822_v13 = vmul.f32 %v819_v22, %v807_v8  ;;  %v1056_v22 = vld [vmem:[#allocation11 + $0x10] sm:$0xff] }
 0x32e   :  { %v713_v14 = vadd.f32 %v709_v29, %v599_v52  ;;  %v1057_v52 = vld [vmem:[#allocation11 + $0x18] sm:$0xff] }
 0x32f   :  { %v712_v15 = vadd.f32 %v708_v12, %v598_v58  ;;  %v5017_v18 = vpop.f32.mrb[12].mxu0  ;;  %v5179_v53 = vpack.c.bf16 %v1057_v52, %v1056_v22  ;;  %v1786_v52 = vld [vmem:[#allocation14 + $0xa0] sm:$0xff] }
 0x330   :  { %v827_v19 = vadd.f32 %v823_v30, %v713_v14  ;;  %v935_v20 = vmul.f32 %v5017_v18, %v933_v10  ;;  %v911_v17 = vpop.f32.mrb[13].mxu0  ;;  %v1781_v14 = vld [vmem:[#allocation14 + $0x78] sm:$0xff]  ;;  %v1778_v18 = vld [vmem:[#allocation14 + $0x60] sm:$0xff] }
 0x331   :  { %v826_v21 = vadd.f32 %v822_v13, %v712_v15  ;;  %v934_v23 = vmul.f32 %v933_v10, %v911_v17  ;;  %5180 = vmatprep.subr.bf16.mxu0 %v5179_v53  ;;  %v1785_v17 = vld [vmem:[#allocation14 + $0x98] sm:$0xff] }
 0x332   :  { %v6791_v28 = vadd.f32 %v935_v20, %v825_v6  ;;  %5182 = vmatpush3.bf16.msra.mxu0 %v5179_v53  ;;  %v1783_v20 = vld [vmem:[#allocation14 + $0x88] sm:$0xff]  ;;  %v1788_v53 = vld [vmem:[#allocation14 + $0xb0] sm:$0xff] }
 0x333   :  { %v6793_v31 = vadd.f32 %v934_v23, %v824_v11  ;;  %v5020_v26 = vpop.f32.mrb[14].mxu0  ;;  %v1782_v23 = vld [vmem:[#allocation14 + $0x80] sm:$0xff] }
 0x334   :  { %v937_v27 = vmul.f32 %v5020_v26, %v933_v10  ;;  %v921_v50 = vpop.f32.mrb[15].mxu0  ;;  %v1784_v26 = vld [vmem:[#allocation14 + $0x90] sm:$0xff] }
 0x335   :  { %v936_v51 = vmul.f32 %v933_v10, %v921_v50  ;;  %5029 = vmatprep.mubr.msk.f32.mxu1 %vm274_vm1, %v6793_v31  ;;  %v1787_v50 = vld [vmem:[#allocation14 + $0xa8] sm:$0xff] }
 0x336   :  { %v6797_v63 = vadd.f32 %v937_v27, %v827_v19  ;;  %5030 = vmatmul.mubr.msk.f32.vlgmr.msra.gmra.mrb[12].mxu1 %vm274_vm1, %v6791_v28  ;;  %v6892_v27 = vpack.c.bf16 %v1784_v26, %v1782_v23 }
 0x337   :  { %v6801_v16 = vadd.f32 %v936_v51, %v826_v21  ;;  %v6890_v21 = vpack.c.bf16 %v1785_v17, %v1783_v20  ;;  %v1789_v51 = vld [vmem:[#allocation14 + $0xb8] sm:$0xff] }
 0x338   :  { %v6896_v22 = vpack.c.bf16 %v1789_v51, %v1787_v50 }
 0x339   :  { %5032 = vmatprep.mubr.msk.f32.mxu1 %vm274_vm1, %v6801_v16 }
 0x33a   :  { %5033 = vmatmul.mubr.msk.f32.gmra.mrb[14].mxu1 %vm274_vm1, %v6797_v63 }
 0x33b   :  { %5057 = vmatprep.mubr.msk.f32.mxu1 %vm274_vm1, %v6676_v24 }
 0x409   :  { %v5031_v55 = vpop.f32.mrb[12].mxu1 }
 0x40a   :  { %v1037_v56 = vadd.f32 %v5031_v55, %v4652_v54  ;;  %v1031_v58 = vpop.f32.mrb[13].mxu1  ;;  %v1646_v55 = vld [vmem:[%s7576_s10 + $0x8] sm:$0xff] }
 0x40b   :  { %v1032_v59 = vadd.f32 %v4652_v54, %v1031_v58 }
 0x40c   :  { %v1051_v5 = vmax.f32 %v1037_v56, 0.0  ;;  %v1648_v56 = vld [vmem:[%s7576_s10 + $0x18] sm:$0xff] }
 0x40d   :  { %v1050_v2 = vmax.f32 %v1032_v59, 0.0  ;;  %v5034_v3 = vpop.f32.mrb[14].mxu1  ;;  %v5223_v58 = vpack.c.bf16 %v1648_v56, %v1646_v55  ;;  %v1645_v59 = vld [vmem:[%s7576_s10] sm:$0xff] }
 0x40e   :  { %v1047_v0 = vadd.f32 %v5034_v3, %v4652_v54  ;;  %v1041_v1 = vpop.f32.mrb[15].mxu1 }
 0x40f   :  { %v1042_v6 = vadd.f32 %v4652_v54, %v1041_v1  ;;  %5043 = vmatprep.mubr.msk.f32.mxu0 %vm274_vm1, %v1050_v2  ;;  %v6898_v54 = vpack.c.bf16 %v1788_v53, %v1786_v52  ;;  %v1647_v2 = vld [vmem:[%s7576_s10 + $0x10] sm:$0xff] }
 0x410   :  { %5044 = vmatmul.mubr.msk.f32.vlgmr.msra.gmra.mrb[16].mxu0 %vm274_vm1, %v1051_v5  ;;  %v1053_v29 = vmax.f32 %v1047_v0, 0.0  ;;  %v5225_v3 = vpack.c.bf16 %v1647_v2, %v1645_v59  ;;  %v1791_v5 = vld [vmem:[#allocation14 + $0xc8] sm:$0xff]  ;;  %v1793_v0 = vld [vmem:[#allocation14 + $0xd8] sm:$0xff] }
 0x411   :  { %v1052_v24 = vmax.f32 %v1042_v6, 0.0  ;;  %v6914_v1 = vpack.c.bf16 %v1793_v0, %v1791_v5  ;;  %v1790_v6 = vld [vmem:[#allocation14 + $0xc0] sm:$0xff] }
 0x413   :  { %5046 = vmatprep.mubr.msk.f32.mxu0 %vm274_vm1, %v1052_v24  ;;  %v1792_v24 = vld [vmem:[#allocation14 + $0xd0] sm:$0xff] }
 0x414   :  { %5047 = vmatmul.mubr.msk.f32.gmra.mrb[18].mxu0 %vm274_vm1, %v1053_v29  ;;  %v6916_v29 = vpack.c.bf16 %v1792_v24, %v1790_v6 }
 0x415   :  { %5071 = vmatprep.mubr.msk.f32.mxu0 %vm274_vm1, %v6680_v25  ;;  %v1767_v25 = vld [vmem:[#allocation14 + $0x8] sm:$0xff] }
 0x4e3   :  { %v6818_v7 = vpop.f32.mrb[16].mxu0 }
 0x4e4   :  { %v6820_v30 = vpop.f32.mrb[17].mxu0 }
 0x4e5   :  { %v5183_v8 = vpack.c.bf16 %v6818_v7, %v6820_v30 }
 0x4e7   :  { %v6824_v10 = vpop.f32.mrb[18].mxu0  ;;  %5184 = vmatprep.subr.bf16.mxu1 %v5183_v8  ;;  %5192 = vmatprep.subr.bf16.mxu0 %v5183_v8 }
 0x4e8   :  { %v6826_v11 = vpop.f32.mrb[19].mxu0  ;;  %5186 = vmatpush3.bf16.msra.mxu1 %v5183_v8  ;;  %5194 = vmatpush3.bf16.msra.mxu0 %v5183_v8 }
 0x4e9   :  { %v5187_v12 = vpack.c.bf16 %v6824_v10, %v6826_v11 }
 0x4eb   :  { %5188 = vmatprep.subr.bf16.mxu1 %v5187_v12  ;;  %5196 = vmatprep.subr.bf16.mxu0 %v5187_v12 }
 0x4ec   :  { %5190 = vmatpush3.bf16.msra.mxu1 %v5187_v12  ;;  %5198 = vmatpush3.bf16.msra.mxu0 %v5187_v12 }
 0x4ed   :  { %5200 = vmatprep.subr.bf16.mxu1 %v5183_v8  ;;  %5208 = vmatprep.subr.bf16.mxu0 %v5183_v8 }
 0x4ef   :  { %5058 = vmatmul.mubr.msk.f32.vlgmr.msra.gmra.mrb[16].mxu1 %vm274_vm1, %v6696_v32  ;;  %5072 = vmatmul.mubr.msk.f32.vlgmr.msra.gmra.mrb[20].mxu0 %vm274_vm1, %v6698_v33  ;;  %v1769_v32 = vld [vmem:[#allocation14 + $0x18] sm:$0xff] }
 0x4f0   :  { %5202 = vmatpush3.bf16.msra.mxu1 %v5183_v8  ;;  %5210 = vmatpush3.bf16.msra.mxu0 %v5183_v8  ;;  %v6854_v33 = vpack.c.bf16 %v1769_v32, %v1767_v25  ;;  %v1649_v32 = vld [vmem:[%s7576_s10 + $0x20] sm:$0xff] }
 0x4f1   :  { %5204 = vmatprep.subr.bf16.mxu1 %v5187_v12  ;;  %5212 = vmatprep.subr.bf16.mxu0 %v5187_v12 }
 0x4f2   :  { %5060 = vmatprep.mubr.msk.f32.mxu1 %vm274_vm1, %v6704_v34  ;;  %5074 = vmatprep.mubr.msk.f32.mxu0 %vm274_vm1, %v6706_v35  ;;  %v1766_v34 = vld [vmem:[#allocation14] sm:$0xff]  ;;  %v1768_v35 = vld [vmem:[#allocation14 + $0x10] sm:$0xff] }
 0x4f3   :  { %5061 = vmatmul.mubr.msk.f32.gmra.mrb[18].mxu1 %vm274_vm1, %v6708_v36  ;;  %5075 = vmatmul.mubr.msk.f32.gmra.mrb[22].mxu0 %vm274_vm1, %v6710_v37  ;;  %v1771_v36 = vld [vmem:[#allocation14 + $0x28] sm:$0xff]  ;;  %v1773_v37 = vld [vmem:[#allocation14 + $0x38] sm:$0xff] }
 0x4f4   :  { %5206 = vmatpush3.bf16.msra.mxu1 %v5187_v12  ;;  %5214 = vmatpush3.bf16.msra.mxu0 %v5187_v12 }
 0x4f5   :  { %5216 = vmatprep.subr.bf16.mxu1 %v5183_v8  ;;  %5085 = vmatprep.mubr.msk.f32.mxu1 %vm274_vm1, %v6716_v38  ;;  %v6862_v38 = vpack.c.bf16 %v1768_v35, %v1766_v34  ;;  %v1651_v34 = vld [vmem:[%s7576_s10 + $0x30] sm:$0xff] }
 0x4f6   :  { %5099 = vmatprep.mubr.msk.f32.mxu0 %vm274_vm1, %v6722_v39  ;;  %v6865_v39 = vpack.c.bf16 %v1773_v37, %v1771_v36  ;;  %5224 = vmatprep.subr.bf16.mxu0 %v5223_v58  ;;  %v5229_v35 = vpack.c.bf16 %v1651_v34, %v1649_v32  ;;  %v1795_v36 = vld [vmem:[#allocation14 + $0xe8] sm:$0xff]  ;;  %v1797_v37 = vld [vmem:[#allocation14 + $0xf8] sm:$0xff] }
 0x4f7   :  { %5086 = vmatmul.mubr.msk.f32.vlgmr.msra.gmra.mrb[20].mxu1 %vm274_vm1, %v6724_v40  ;;  %5100 = vmatmul.mubr.msk.f32.vlgmr.msra.gmra.mrb[24].mxu0 %vm274_vm1, %v6726_v41  ;;  %v1770_v40 = vld [vmem:[#allocation14 + $0x20] sm:$0xff]  ;;  %v1772_v41 = vld [vmem:[#allocation14 + $0x30] sm:$0xff] }
 0x4f8   :  { %5218 = vmatpush3.bf16.msra.mxu1 %v5183_v8  ;;  %5088 = vmatprep.mubr.msk.f32.mxu1 %vm274_vm1, %v6730_v42  ;;  %v6872_v42 = vpack.c.bf16 %v1772_v41, %v1770_v40  ;;  %v1650_v8 = vld [vmem:[%s7576_s10 + $0x28] sm:$0xff]  ;;  %v6932_v40 = vpack.c.bf16 %v1797_v37, %v1795_v36  ;;  %v1794_v41 = vld [vmem:[#allocation14 + $0xe0] sm:$0xff] }
 0x4f9   :  { %5220 = vmatprep.subr.bf16.mxu1 %v5187_v12  ;;  %5102 = vmatprep.mubr.msk.f32.mxu0 %vm274_vm1, %v6734_v43  ;;  %v1775_v43 = vld [vmem:[#allocation14 + $0x48] sm:$0xff] }
 0x4fa   :  { %5226 = vmatpush1.bf16.msra.mxu0 %v5225_v3 }
 0x4fb   :  { %5089 = vmatmul.mubr.msk.f32.gmra.mrb[22].mxu1 %vm274_vm1, %v6742_v44  ;;  %5103 = vmatmul.mubr.msk.f32.gmra.mrb[26].mxu0 %vm274_vm1, %v6744_v45  ;;  %v1777_v44 = vld [vmem:[#allocation14 + $0x58] sm:$0xff] }
 0x4fc   :  { %5222 = vmatpush3.bf16.msra.mxu1 %v5187_v12  ;;  %5113 = vmatprep.mubr.msk.f32.mxu1 %vm274_vm1, %v6748_v46  ;;  %v6878_v45 = vpack.c.bf16 %v1777_v44, %v1775_v43  ;;  %v1774_v46 = vld [vmem:[#allocation14 + $0x40] sm:$0xff]  ;;  %v1796_v43 = vld [vmem:[#allocation14 + $0xf0] sm:$0xff] }
 0x4fd   :  { %5232 = vmatprep.subr.bf16.mxu1 %v6854_v33  ;;  %v1652_v12 = vld [vmem:[%s7576_s10 + $0x38] sm:$0xff]  ;;  %v6934_v44 = vpack.c.bf16 %v1796_v43, %v1794_v41 }
 0x4fe   :  { %v5227_v25 = vpack.c.bf16 %v1652_v12, %v1650_v8 }
 0x4ff   :  { %5114 = vmatmul.mubr.msk.f32.vlgmr.msra.gmra.mrb[24].mxu1 %vm274_vm1, %v6756_v47  ;;  %v1776_v47 = vld [vmem:[#allocation14 + $0x50] sm:$0xff] }
 0x500   :  { %5116 = vmatprep.mubr.msk.f32.mxu1 %vm274_vm1, %v6758_v48  ;;  %5234 = vmatpush1.bf16.msra.mxu1 %v6862_v38  ;;  %v6880_v13 = vpack.c.bf16 %v1776_v47, %v1774_v46  ;;  %v1779_v48 = vld [vmem:[#allocation14 + $0x68] sm:$0xff]  ;;  %v6432_v46 = vmov 0.0   ;;  %v1155_v47 = vld [vmem:[#allocation12] sm:$0x1f] }
 0x501   :  { %5236 = vmatprep.subr.bf16.mxu1 %v6865_v39  ;;  %v6884_v15 = vpack.c.bf16 %v1781_v14, %v1779_v48  ;;  %5228 = vmatprep.subr.bf16.mxu0 %v5227_v25  ;;  %v1244_v48 = vrot.slane %v1155_v47, %v6771_v61  ;;  %v1341_v14 = vrot.slane %v1155_v47, %v6774_v62 }
 0x502   :  { %5230 = vmatpush1.bf16.msra.mxu0 %v5229_v35  ;;  %1741 = vmatprep.mubr.f32.mxu0 %v6432_v46  ;;  %v1438_v58 = vrot.slane %v1155_v47, %v704_v4  ;;  %v1535_v6 = vrot.slane %v1155_v47, %v818_v9 }
 0x503   :  { %5117 = vmatmul.mubr.msk.f32.gmra.mrb[26].mxu1 %vm274_vm1, %v6764_v49  ;;  %v1780_v49 = vld [vmem:[#allocation14 + $0x70] sm:$0xff]  ;;  %5264 = vmatprep.subr.bf16.mxu0 %v6854_v33 }
 0x504   :  { %5238 = vmatpush1.bf16.msra.mxu1 %v6872_v42  ;;  %v6886_v19 = vpack.c.bf16 %v1780_v49, %v1778_v18  ;;  %1862 = vmatprep.mubr.f32.mxu1 %v6432_v46 }
 0x505   :  { %5240 = vmatprep.subr.bf16.mxu1 %v6878_v45 }
 0x508   :  { %5242 = vmatpush1.bf16.msra.mxu1 %v6880_v13 }
 0x509   :  { %5244 = vmatprep.subr.bf16.mxu1 %v6884_v15 }
 0x50c   :  { %5246 = vmatpush1.bf16.msra.mxu1 %v6886_v19 }
 0x50d   :  { %5248 = vmatprep.subr.bf16.mxu1 %v6890_v21 }
 0x510   :  { %5250 = vmatpush1.bf16.msra.mxu1 %v6892_v27 }
 0x511   :  { %5252 = vmatprep.subr.bf16.mxu1 %v6896_v22 }
 0x514   :  { %5254 = vmatpush1.bf16.msra.mxu1 %v6898_v54 }
 0x515   :  { %5256 = vmatprep.subr.bf16.mxu1 %v6914_v1 }
 0x518   :  { %5258 = vmatpush1.bf16.msra.mxu1 %v6916_v29 }
 0x519   :  { %5260 = vmatprep.subr.bf16.mxu1 %v6932_v40 }
 0x51c   :  { %5262 = vmatpush1.bf16.msra.mxu1 %v6934_v44 }
 0x51d   :  { %5296 = vmatprep.subr.bf16.mxu1 %v6854_v33 }
 0x51f   :  { %1863 = vmatmul.mubr.f32.vlgmr.msra.gmra.mrb[28].mxu1 %v6432_v46 }
 0x520   :  { %5298 = vmatpush1.bf16.msra.mxu1 %v6862_v38  ;;  %2166 = vmatprep.mubr.f32.mxu1 %v6432_v46 }
 0x521   :  { %5300 = vmatprep.subr.bf16.mxu1 %v6865_v39 }
 0x524   :  { %5302 = vmatpush1.bf16.msra.mxu1 %v6872_v42 }
 0x525   :  { %5304 = vmatprep.subr.bf16.mxu1 %v6878_v45 }
 0x528   :  { %5306 = vmatpush1.bf16.msra.mxu1 %v6880_v13 }
 0x529   :  { %5308 = vmatprep.subr.bf16.mxu1 %v6884_v15 }
 0x52c   :  { %5310 = vmatpush1.bf16.msra.mxu1 %v6886_v19 }
 0x52d   :  { %5312 = vmatprep.subr.bf16.mxu1 %v6890_v21 }
 0x530   :  { %5314 = vmatpush1.bf16.msra.mxu1 %v6892_v27 }
 0x531   :  { %5316 = vmatprep.subr.bf16.mxu1 %v6896_v22 }
 0x534   :  { %5318 = vmatpush1.bf16.msra.mxu1 %v6898_v54 }
 0x535   :  { %5320 = vmatprep.subr.bf16.mxu1 %v6914_v1 }
 0x538   :  { %5322 = vmatpush1.bf16.msra.mxu1 %v6916_v29 }
 0x539   :  { %5324 = vmatprep.subr.bf16.mxu1 %v6932_v40 }
 0x53c   :  { %5326 = vmatpush1.bf16.msra.mxu1 %v6934_v44 }
 0x53d   :  { %5360 = vmatprep.subr.bf16.mxu1 %v6854_v33 }
 0x5c2   :  { %v5059_v18 = vpop.f32.mrb[16].mxu1  ;;  %v5073_v49 = vpop.f32.mrb[20].mxu0 }
 0x5c3   :  { %v1246_v20 = vmul.f32 %v5059_v18, %v1244_v48  ;;  %v1222_v17 = vpop.f32.mrb[17].mxu1  ;;  %v1343_v23 = vmul.f32 %v5073_v49, %v1341_v14  ;;  %v1319_v26 = vpop.f32.mrb[21].mxu0 }
 0x5c4   :  { %v1245_v50 = vmul.f32 %v1244_v48, %v1222_v17  ;;  %v1342_v51 = vmul.f32 %v1341_v14, %v1319_v26 }
 0x5c5   :  { %v1250_v52 = vadd.f32 %v6818_v7, %v1246_v20 }
 0x5c6   :  { %v1249_v53 = vadd.f32 %v1245_v50, %v6820_v30  ;;  %v5062_v55 = vpop.f32.mrb[18].mxu1  ;;  %v5076_v56 = vpop.f32.mrb[22].mxu0 }
 0x5c7   :  { %v1347_v59 = vadd.f32 %v1343_v23, %v1250_v52  ;;  %v1248_v2 = vmul.f32 %v5062_v55, %v1244_v48  ;;  %v1232_v3 = vpop.f32.mrb[19].mxu1  ;;  %v1345_v5 = vmul.f32 %v5076_v56, %v1341_v14  ;;  %v1329_v0 = vpop.f32.mrb[23].mxu0 }
 0x5c8   :  { %v1346_v24 = vadd.f32 %v1342_v51, %v1249_v53  ;;  %v1247_v8 = vmul.f32 %v1244_v48, %v1232_v3  ;;  %v1344_v12 = vmul.f32 %v1341_v14, %v1329_v0 }
 0x5c9   :  { %v1252_v7 = vadd.f32 %v6824_v10, %v1248_v2 }
 0x5ca   :  { %v1251_v30 = vadd.f32 %v1247_v8, %v6826_v11  ;;  %v5087_v25 = vpop.f32.mrb[20].mxu1  ;;  %v5101_v32 = vpop.f32.mrb[24].mxu0  ;;  %v1632_v11 = vrot.slane %v1155_v47, %v932_v57 }
 0x5cb   :  { %v1349_v34 = vadd.f32 %v1345_v5, %v1252_v7  ;;  %v1440_v35 = vmul.f32 %v5087_v25, %v1438_v58  ;;  %v1416_v4 = vpop.f32.mrb[21].mxu1  ;;  %v1537_v36 = vmul.f32 %v5101_v32, %v1535_v6  ;;  %v1513_v37 = vpop.f32.mrb[25].mxu0 }
 0x5cc   :  { %v1348_v41 = vadd.f32 %v1344_v12, %v1251_v30  ;;  %v1439_v43 = vmul.f32 %v1438_v58, %v1416_v4  ;;  %v1536_v18 = vmul.f32 %v1535_v6, %v1513_v37 }
 0x5cd   :  { %v1444_v49 = vadd.f32 %v1440_v35, %v1347_v59 }
 0x5ce   :  { %v1443_v20 = vadd.f32 %v1439_v43, %v1346_v24  ;;  %v5090_v9 = vpop.f32.mrb[22].mxu1  ;;  %v5104_v17 = vpop.f32.mrb[26].mxu0 }
 0x5cf   :  { %v1541_v48 = vadd.f32 %v1537_v36, %v1444_v49  ;;  %v1442_v14 = vmul.f32 %v5090_v9, %v1438_v58  ;;  %v1426_v23 = vpop.f32.mrb[23].mxu1  ;;  %v1539_v10 = vmul.f32 %v5104_v17, %v1535_v6  ;;  %v1523_v26 = vpop.f32.mrb[27].mxu0 }
 0x5d0   :  { %v1540_v50 = vadd.f32 %v1536_v18, %v1443_v20  ;;  %v1441_v51 = vmul.f32 %v1438_v58, %v1426_v23  ;;  %v1538_v52 = vmul.f32 %v1535_v6, %v1523_v26  ;;  %v1653_v6 = vld [vmem:[%s7578_s12] sm:$0x3]  ;;  %s6433_s12 = smov 64  }
 0x5d1   :  { %v1446_v53 = vadd.f32 %v1442_v14, %v1349_v34  ;;  %v1662_v34 = vrot.slane %v1653_v6, %v6774_v62  ;;  %v1658_v37 = vrot.slane %v1653_v6, %v6771_v61 }
 0x5d2   :  { %v1445_v55 = vadd.f32 %v1441_v51, %v1348_v41  ;;  %v5115_v56 = vpop.f32.mrb[24].mxu1 }
 0x5d3   :  { %v1543_v2 = vadd.f32 %v1539_v10, %v1446_v53  ;;  %v1634_v3 = vmul.f32 %v5115_v56, %v1632_v11  ;;  %v1610_v59 = vpop.f32.mrb[25].mxu1 }
 0x5d4   :  { %v1542_v5 = vadd.f32 %v1538_v52, %v1445_v55  ;;  %v1633_v0 = vmul.f32 %v1632_v11, %v1610_v59 }
 0x5d5   :  { %v1638_v24 = vadd.f32 %v1634_v3, %v1541_v48 }
 0x5d6   :  { %v1637_v8 = vadd.f32 %v1633_v0, %v1540_v50  ;;  %v5118_v12 = vpop.f32.mrb[26].mxu1 }
 0x5d7   :  { %v1636_v7 = vmul.f32 %v5118_v12, %v1632_v11  ;;  %v1620_v30 = vpop.f32.mrb[27].mxu1  ;;  %v1642_v58 = vadd.f32 %v1638_v24, %v6791_v28 }
 0x5d8   :  { %v1641_v25 = vadd.f32 %v1637_v8, %v6793_v31  ;;  %v1635_v32 = vmul.f32 %v1632_v11, %v1620_v30 }
 0x5d9   :  { %v1640_v57 = vadd.f32 %v1636_v7, %v1543_v2 }
 0x5da   :  { %v1639_v47 = vadd.f32 %v1635_v32, %v1542_v5  ;;  %4681 = vmatmul.mubr.msk.f32.vlgmr.msra.gmra.mrb[28].mxu0 %vm274_vm1, %v1641_v25 }
 0x5db   :  { %1747 = vmatprep.mubr.f32.mxu0 %v6432_v46  ;;  %5266 = vmatpush1.bf16.msra.mxu0 %v6862_v38  ;;  %v1644_v28 = vadd.f32 %v1640_v57, %v6797_v63 }
 0x5dc   :  { %5268 = vmatprep.subr.bf16.mxu0 %v6865_v39  ;;  %v1643_v31 = vadd.f32 %v1639_v47, %v6801_v16 }
 0x5de   :  { %4682 = vmatmul.mubr.msk.f32.gmra.mrb[30].mxu0 %vm274_vm1, %v1642_v58 }
 0x5df   :  { %1753 = vmatprep.mubr.f32.mxu0 %v6432_v46  ;;  %5270 = vmatpush1.bf16.msra.mxu0 %v6872_v42 }
 0x5e0   :  { %5272 = vmatprep.subr.bf16.mxu0 %v6878_v45 }
 0x5e2   :  { %4683 = vmatmul.mubr.msk.f32.gmra.mrb[32].mxu0 %vm274_vm1, %v1643_v31 }
 0x5e3   :  { %1759 = vmatprep.mubr.f32.mxu0 %v6432_v46  ;;  %5274 = vmatpush1.bf16.msra.mxu0 %v6880_v13 }
 0x5e4   :  { %5276 = vmatprep.subr.bf16.mxu0 %v6884_v15 }
 0x5e6   :  { %4684 = vmatmul.mubr.msk.f32.gmra.mrb[34].mxu0 %vm274_vm1, %v1644_v28 }
 0x5e7   :  { %5278 = vmatpush1.bf16.msra.mxu0 %v6886_v19  ;;  %2006 = vmatprep.mubr.f32.mxu0 %v6432_v46 }
 0x5e8   :  { %5280 = vmatprep.subr.bf16.mxu0 %v6890_v21 }
 0x5eb   :  { %5282 = vmatpush1.bf16.msra.mxu0 %v6892_v27 }
 0x5ec   :  { %5284 = vmatprep.subr.bf16.mxu0 %v6896_v22 }
 0x5ef   :  { %5286 = vmatpush1.bf16.msra.mxu0 %v6898_v54 }
 0x5f0   :  { %5288 = vmatprep.subr.bf16.mxu0 %v6914_v1 }
 0x5f2   :  { %v1864_v63 = vpop.f32.mrb[28].mxu1 }
 0x5f3   :  { %5290 = vmatpush1.bf16.msra.mxu0 %v6916_v29  ;;  %v1866_v16 = vpop.f32.mrb[29].mxu1  ;;  %v1871_v17 = vrot.slane %v1864_v63, 1 }
 0x5f4   :  { %5292 = vmatprep.subr.bf16.mxu0 %v6932_v40  ;;  %v1872_v48 = vrot.slane %v1866_v16, 1 }
 0x5f7   :  { %5294 = vmatpush1.bf16.msra.mxu0 %v6934_v44 }
 0x5f8   :  { %5328 = vmatprep.subr.bf16.mxu0 %v6854_v33 }
 0x6ad   :  { %v1743_v35 = vpop.f32.mrb[28].mxu0 }
 0x6ae   :  { %v1745_v4 = vpop.f32.mrb[29].mxu0  ;;  %v7012_v9 = vadd.f32 %v1743_v35, %v1658_v37 }
 0x6af   :  { %v7004_v36 = vadd.f32 %v1745_v4, %v1662_v34 }
 0x6b0   :  { %v1877_v61 = vadd.f32 %v1864_v63, %v7012_v9 }
 0x6b1   :  { %v1749_v41 = vpop.f32.mrb[30].mxu0  ;;  %v1878_v49 = vadd.f32 %v1866_v16, %v7004_v36 }
 0x6b2   :  { %v7007_v43 = vadd.f32 %v1749_v41, %v1658_v37  ;;  %v1751_v18 = vpop.f32.mrb[31].mxu0  ;;  %v4685_v57 = vmul.f32 -1.442695, %v1877_v61 }
 0x6b3   :  { %v7010_v20 = vadd.f32 %v1751_v18, %v1662_v34  ;;  %v4687_v10 = vmul.f32 -1.442695, %v1878_v49 }
 0x6b5   :  { %v1755_v14 = vpop.f32.mrb[32].mxu0 }
 0x6b6   :  { %v7014_v62 = vadd.f32 %v1755_v14, %v1658_v37  ;;  %v1757_v23 = vpop.f32.mrb[33].mxu0 }
 0x6b7   :  { %v7016_v26 = vadd.f32 %v1757_v23, %v1662_v34 }
 0x6b8   :  { %v1879_v11 = vadd.f32 %v1871_v17, %v7014_v62 }
 0x6b9   :  { %v1761_v50 = vpop.f32.mrb[34].mxu0  ;;  %v1880_v51 = vadd.f32 %v1872_v48, %v7016_v26 }
 0x6ba   :  { %v7021_v52 = vadd.f32 %v1761_v50, %v1658_v37  ;;  %v1763_v53 = vpop.f32.mrb[35].mxu0  ;;  %5826 = vtanh.f32 %v1879_v11  ;;  %v4686_v47 = vmul.f32 -1.442695, %v1879_v11 }
 0x6bb   :  { %5828 = vpow2.f32 %v4687_v10  ;;  %v7023_v55 = vadd.f32 %v1763_v53, %v1662_v34  ;;  %v4688_v56 = vmul.f32 -1.442695, %v1880_v51 }
 0x6bc   :  { %5830 = vtanh.f32 %v1877_v61 }
 0x6bd   :  { %5832 = vpow2.f32 %v4688_v56 }
 0x6c4   :  { %v5827_v2 = vpop.eup %5826 }
 0x6c5   :  { %v5829_v3 = vpop.eup %5828  ;;  %v1909_v59 = vrot.slane %v5827_v2, 7 }
 0x6c6   :  { %v5831_v5 = vpop.eup %5830  ;;  %v1901_v8 = vadd.f32 1.0, %v5829_v3 }
 0x6c7   :  { %v5833_v0 = vpop.eup %5832  ;;  %v1911_v24 = vsel %vm1910_vm2, %v1909_v59, %v5831_v5 }
 0x6c8   :  { %1913 = vrot.lane.b32.xlu0 %v1911_v24, %s6433_s12  ;;  %v1902_v12 = vadd.f32 1.0, %v5833_v0 }
 0x6ca   :  { %5834 = vrcp.f32 %v1902_v12 }
 0x6cb   :  { %5836 = vrcp.f32 %v1901_v8 }
 0x6cc   :  { %5838 = vpow2.f32 %v4685_v57 }
 0x6cd   :  { %5840 = vpow2.f32 %v4686_v47 }
 0x6d4   :  { %v5835_v7 = vpop.eup %5834 }
 0x6d5   :  { %v1927_v30 = vrot.slane %v5835_v7, 7  ;;  %v5837_v25 = vpop.eup %5836  ;;  %v1922_v41 = vmul.f32 0.0, %v5835_v7 }
 0x6d6   :  { %v5839_v58 = vpop.eup %5838  ;;  %v1921_v34 = vmul.f32 0.0, %v5837_v25 }
 0x6d7   :  { %v1928_v32 = vsel %vm1910_vm2, %v1927_v30, %v5837_v25  ;;  %v5841_v31 = vpop.eup %5840  ;;  %v1887_v28 = vadd.f32 1.0, %v5839_v58 }
 0x6d8   :  { %1930 = vrot.lane.b32.xlu0 %v1928_v32, %s6433_s12  ;;  %v1888_v63 = vadd.f32 1.0, %v5841_v31 }
 0x6d9   :  { %5842 = vrcp.f32 %v1887_v28 }
 0x6da   :  { %5844 = vrcp.f32 %v1888_v63 }
 0x6e3   :  { %v5843_v16 = vpop.eup %5842 }
 0x6e4   :  { %v5845_v37 = vpop.eup %5844 }
 0x73a   :  { %v1914_v6 = vpop.permute.xlu0 %1913 }
 0x73b   :  { %v1916_v35 = vrot.slane %v1914_v6, 1  ;;  %v1919_v4 = vmul.f32 %v5843_v16, %v1914_v6 }
 0x73d   :  { %v1920_v18 = vmul.f32 %v5845_v37, %v1916_v35  ;;  %v1923_v49 = vadd.f32 %v1921_v34, %v1919_v4 }
 0x73f   :  { %v1924_v17 = vadd.f32 %v1922_v41, %v1920_v18  ;;  %v2066_v58 = vrot.slane %v1923_v49, 7 }
 0x741   :  { %5846 = vtanh.f32 %v1924_v17  ;;  %v2067_v28 = vrot.slane %v1924_v17, 7 }
 0x742   :  { %5848 = vtanh.f32 %v1923_v49 }
 0x74a   :  { %v1931_v10 = vpop.permute.xlu0 %1930 }
 0x74b   :  { %v5847_v48 = vpop.eup %5846 }
 0x74c   :  { %v1936_v14 = vrot.slane %v5847_v48, 7  ;;  %v5849_v23 = vpop.eup %5848 }
 0x74e   :  { %v1937_v61 = vsel %vm1910_vm2, %v1936_v14, %v5849_v23 }
 0x74f   :  { %v1939_v11 = vmul.f32 %v1937_v61, %v1931_v10 }
 0x751   :  { %1941 = vst.msk [vmem:[#allocation2] sm:$0x3] %vm1940_vm3, %v1939_v11  ;;  %2007 = vmatmul.mubr.f32.vlgmr.msra.gmra.mrb[36].mxu0 %v1939_v11 }
 0x752   :  { %5330 = vmatpush1.bf16.msra.mxu0 %v6862_v38  ;;  %2332 = vmatprep.mubr.f32.mxu0 %v6432_v46 }
 0x753   :  { %5332 = vmatprep.subr.bf16.mxu0 %v6865_v39 }
 0x756   :  { %5334 = vmatpush1.bf16.msra.mxu0 %v6872_v42 }
 0x757   :  { %5336 = vmatprep.subr.bf16.mxu0 %v6878_v45 }
 0x75a   :  { %5338 = vmatpush1.bf16.msra.mxu0 %v6880_v13 }
 0x75b   :  { %5340 = vmatprep.subr.bf16.mxu0 %v6884_v15 }
 0x75e   :  { %5342 = vmatpush1.bf16.msra.mxu0 %v6886_v19 }
 0x75f   :  { %5344 = vmatprep.subr.bf16.mxu0 %v6890_v21 }
 0x762   :  { %5346 = vmatpush1.bf16.msra.mxu0 %v6892_v27 }
 0x763   :  { %5348 = vmatprep.subr.bf16.mxu0 %v6896_v22 }
 0x766   :  { %5350 = vmatpush1.bf16.msra.mxu0 %v6898_v54 }
 0x767   :  { %5352 = vmatprep.subr.bf16.mxu0 %v6914_v1 }
 0x76a   :  { %5354 = vmatpush1.bf16.msra.mxu0 %v6916_v29 }
 0x76b   :  { %5356 = vmatprep.subr.bf16.mxu0 %v6932_v40 }
 0x76e   :  { %5358 = vmatpush1.bf16.msra.mxu0 %v6934_v44 }
 0x76f   :  { %5392 = vmatprep.subr.bf16.mxu0 %v6854_v33 }
 0x824   :  { %v2008_v50 = vpop.f32.mrb[36].mxu0 }
 0x825   :  { %v2015_v51 = vrot.slane %v2008_v50, 7  ;;  %v2010_v53 = vpop.f32.mrb[37].mxu0  ;;  %v2023_v59 = vadd.f32 %v2008_v50, %v7014_v62 }
 0x826   :  { %v2016_v56 = vrot.slane %v2010_v53, 7  ;;  %v2024_v2 = vadd.f32 %v2010_v53, %v7016_v26 }
 0x827   :  { %v2021_v3 = vadd.f32 %v2015_v51, %v7012_v9  ;;  %v4690_v4 = vmul.f32 -1.442695, %v2023_v59 }
 0x828   :  { %v2022_v5 = vadd.f32 %v2016_v56, %v7004_v36  ;;  %v4692_v0 = vmul.f32 -1.442695, %v2024_v2 }
 0x829   :  { %5850 = vtanh.f32 %v2021_v3  ;;  %v4689_v37 = vmul.f32 -1.442695, %v2021_v3 }
 0x82a   :  { %v4691_v24 = vmul.f32 -1.442695, %v2022_v5  ;;  %5852 = vtanh.f32 %v2023_v59 }
 0x82c   :  { %5854 = vpow2.f32 %v4691_v24 }
 0x82d   :  { %5856 = vpow2.f32 %v4692_v0 }
 0x833   :  { %v5851_v8 = vpop.eup %5850 }
 0x834   :  { %v5853_v12 = vpop.eup %5852  ;;  %v2053_v7 = vrot.slane %v5851_v8, 1 }
 0x836   :  { %v5855_v30 = vpop.eup %5854  ;;  %v2054_v57 = vsel %vm1910_vm2, %v5853_v12, %v2053_v7 }
 0x837   :  { %v5857_v25 = vpop.eup %5856  ;;  %v2045_v32 = vadd.f32 1.0, %v5855_v30  ;;  %2056 = vrot.lane.b32.xlu1 %v2054_v57, %s6433_s12 }
 0x838   :  { %v2046_v47 = vadd.f32 1.0, %v5857_v25 }
 0x839   :  { %5858 = vrcp.f32 %v2045_v32 }
 0x83a   :  { %5860 = vrcp.f32 %v2046_v47 }
 0x83b   :  { %5862 = vpow2.f32 %v4690_v4 }
 0x83c   :  { %5864 = vpow2.f32 %v4689_v37 }
 0x843   :  { %v5859_v31 = vpop.eup %5858 }
 0x844   :  { %v5861_v63 = vpop.eup %5860  ;;  %v2076_v16 = vrot.slane %v5859_v31, 1  ;;  %v2070_v6 = vmul.f32 %v5859_v31, %v2066_v58 }
 0x845   :  { %v2071_v34 = vmul.f32 %v5861_v63, %v2067_v28  ;;  %v5863_v41 = vpop.eup %5862 }
 0x846   :  { %v2077_v35 = vsel %vm1910_vm2, %v5861_v63, %v2076_v16  ;;  %v5865_v18 = vpop.eup %5864  ;;  %v2032_v48 = vadd.f32 1.0, %v5863_v41 }
 0x847   :  { %2079 = vrot.lane.b32.xlu1 %v2077_v35, %s6433_s12  ;;  %v2031_v14 = vadd.f32 1.0, %v5865_v18 }
 0x848   :  { %5866 = vrcp.f32 %v2032_v48 }
 0x849   :  { %5868 = vrcp.f32 %v2031_v14 }
 0x852   :  { %v5867_v49 = vpop.eup %5866 }
 0x853   :  { %v5869_v61 = vpop.eup %5868 }
 0x8a9   :  { %v2057_v17 = vpop.permute.xlu1 %2056 }
 0x8aa   :  { %v2059_v23 = vrot.slane %v2057_v17, 7  ;;  %v2063_v10 = vmul.f32 %v5867_v49, %v2057_v17 }
 0x8ac   :  { %v2062_v11 = vmul.f32 %v5869_v61, %v2059_v23  ;;  %v7056_v50 = vadd.f32 %v2071_v34, %v2063_v10 }
 0x8ae   :  { %v2072_v51 = vadd.f32 %v2070_v6, %v2062_v11  ;;  %v2231_v14 = vrot.slane %v7056_v50, 7 }
 0x8b0   :  { %5870 = vtanh.f32 %v2072_v51  ;;  %v2230_v18 = vrot.slane %v2072_v51, 7 }
 0x8b1   :  { %5872 = vtanh.f32 %v7056_v50 }
 0x8b9   :  { %v2080_v3 = vpop.permute.xlu1 %2079 }
 0x8ba   :  { %v5871_v53 = vpop.eup %5870 }
 0x8bb   :  { %v2085_v56 = vrot.slane %v5871_v53, 1  ;;  %v5873_v2 = vpop.eup %5872 }
 0x8bd   :  { %v2086_v59 = vsel %vm1910_vm2, %v5873_v2, %v2085_v56 }
 0x8be   :  { %v7060_v5 = vmul.f32 %v2086_v59, %v2080_v3 }
 0x8c0   :  { %2167 = vmatmul.mubr.f32.vlgmr.msra.gmra.mrb[30].mxu1 %v7060_v5 }
 0x8c1   :  { %5362 = vmatpush1.bf16.msra.mxu1 %v6862_v38  ;;  %2498 = vmatprep.mubr.f32.mxu1 %v6432_v46 }
 0x8c2   :  { %5364 = vmatprep.subr.bf16.mxu1 %v6865_v39 }
 0x8c5   :  { %5366 = vmatpush1.bf16.msra.mxu1 %v6872_v42 }
 0x8c6   :  { %5368 = vmatprep.subr.bf16.mxu1 %v6878_v45 }
 0x8c9   :  { %5370 = vmatpush1.bf16.msra.mxu1 %v6880_v13 }
 0x8ca   :  { %5372 = vmatprep.subr.bf16.mxu1 %v6884_v15 }
 0x8cd   :  { %5374 = vmatpush1.bf16.msra.mxu1 %v6886_v19 }
 0x8ce   :  { %5376 = vmatprep.subr.bf16.mxu1 %v6890_v21 }
 0x8d1   :  { %5378 = vmatpush1.bf16.msra.mxu1 %v6892_v27 }
 0x8d2   :  { %5380 = vmatprep.subr.bf16.mxu1 %v6896_v22 }
 0x8d5   :  { %5382 = vmatpush1.bf16.msra.mxu1 %v6898_v54 }
 0x8d6   :  { %5384 = vmatprep.subr.bf16.mxu1 %v6914_v1 }
 0x8d9   :  { %5386 = vmatpush1.bf16.msra.mxu1 %v6916_v29 }
 0x8da   :  { %5388 = vmatprep.subr.bf16.mxu1 %v6932_v40 }
 0x8dd   :  { %5390 = vmatpush1.bf16.msra.mxu1 %v6934_v44 }
 0x8de   :  { %5424 = vmatprep.subr.bf16.mxu1 %v6854_v33 }
 0x993   :  { %v2168_v0 = vpop.f32.mrb[30].mxu1 }
 0x994   :  { %v2175_v24 = vrot.slane %v2168_v0, 6  ;;  %v2177_v8 = vrot.slane %v2168_v0, 7  ;;  %v2170_v12 = vpop.f32.mrb[31].mxu1 }
 0x995   :  { %v2176_v7 = vrot.slane %v2170_v12, 6  ;;  %v2178_v30 = vrot.slane %v2170_v12, 7 }
 0x996   :  { %v2183_v25 = vadd.f32 %v2175_v24, %v7012_v9  ;;  %v2185_v32 = vadd.f32 %v2177_v8, %v7014_v62 }
 0x997   :  { %v2184_v57 = vadd.f32 %v2176_v7, %v7004_v36  ;;  %v2186_v47 = vadd.f32 %v2178_v30, %v7016_v26 }
 0x998   :  { %5874 = vtanh.f32 %v2183_v25  ;;  %v4693_v53 = vmul.f32 -1.442695, %v2183_v25  ;;  %v4694_v56 = vmul.f32 -1.442695, %v2185_v32 }
 0x999   :  { %5876 = vtanh.f32 %v2185_v32  ;;  %v4695_v58 = vmul.f32 -1.442695, %v2184_v57  ;;  %v4696_v31 = vmul.f32 -1.442695, %v2186_v47 }
 0x99b   :  { %5878 = vpow2.f32 %v4695_v58 }
 0x99c   :  { %5880 = vpow2.f32 %v4696_v31 }
 0x9a2   :  { %v5875_v28 = vpop.eup %5874 }
 0x9a3   :  { %v5877_v63 = vpop.eup %5876  ;;  %v2215_v16 = vrot.slane %v5875_v28, 2 }
 0x9a4   :  { %v2216_v6 = vrot.slane %v5877_v63, 1 }
 0x9a5   :  { %v5879_v34 = vpop.eup %5878 }
 0x9a6   :  { %v2217_v35 = vsel %vm1910_vm2, %v2216_v6, %v2215_v16  ;;  %v5881_v4 = vpop.eup %5880  ;;  %v2207_v37 = vadd.f32 1.0, %v5879_v34 }
 0x9a7   :  { %2219 = vrot.lane.b32.xlu0 %v2217_v35, %s6433_s12  ;;  %v2208_v41 = vadd.f32 1.0, %v5881_v4 }
 0x9a8   :  { %5882 = vrcp.f32 %v2207_v37 }
 0x9a9   :  { %5884 = vrcp.f32 %v2208_v41 }
 0x9aa   :  { %5886 = vpow2.f32 %v4693_v53 }
 0x9ab   :  { %5888 = vpow2.f32 %v4694_v56 }
 0x9b2   :  { %v5883_v48 = vpop.eup %5882 }
 0x9b3   :  { %v5885_v49 = vpop.eup %5884  ;;  %v2240_v17 = vrot.slane %v5883_v48, 2  ;;  %v2234_v23 = vmul.f32 %v5883_v48, %v2230_v18 }
 0x9b4   :  { %v2241_v10 = vrot.slane %v5885_v49, 1  ;;  %v2235_v61 = vmul.f32 %v5885_v49, %v2231_v14  ;;  %v5887_v2 = vpop.eup %5886 }
 0x9b5   :  { %v5889_v3 = vpop.eup %5888  ;;  %v2193_v59 = vadd.f32 1.0, %v5887_v2 }
 0x9b6   :  { %v2242_v11 = vsel %vm1910_vm2, %v2241_v10, %v2240_v17  ;;  %v2194_v51 = vadd.f32 1.0, %v5889_v3 }
 0x9b7   :  { %2244 = vrot.lane.b32.xlu1 %v2242_v11, %s6433_s12  ;;  %5890 = vrcp.f32 %v2193_v59 }
 0x9b8   :  { %5892 = vrcp.f32 %v2194_v51 }
 0x9c1   :  { %v5891_v0 = vpop.eup %5890 }
 0x9c2   :  { %v5893_v12 = vpop.eup %5892 }
 0xa19   :  { %v2220_v50 = vpop.permute.xlu0 %2219 }
 0xa1a   :  { %v2222_v24 = vrot.slane %v2220_v50, 6  ;;  %v2223_v8 = vrot.slane %v2220_v50, 7 }
 0xa1c   :  { %v2226_v7 = vmul.f32 %v5891_v0, %v2222_v24  ;;  %v2227_v30 = vmul.f32 %v5893_v12, %v2223_v8 }
 0xa1e   :  { %v7089_v57 = vadd.f32 %v2234_v23, %v2226_v7  ;;  %v7091_v47 = vadd.f32 %v2235_v61, %v2227_v30 }
 0xa20   :  { %5894 = vtanh.f32 %v7089_v57  ;;  %v2396_v50 = vrot.slane %v7089_v57, 7  ;;  %v2397_v24 = vrot.slane %v7091_v47, 7 }
 0xa21   :  { %5896 = vtanh.f32 %v7091_v47 }
 0xa29   :  { %v2245_v28 = vpop.permute.xlu1 %2244 }
 0xa2a   :  { %v5895_v25 = vpop.eup %5894 }
 0xa2b   :  { %v5897_v32 = vpop.eup %5896  ;;  %v2250_v58 = vrot.slane %v5895_v25, 2 }
 0xa2c   :  { %v2251_v31 = vrot.slane %v5897_v32, 1 }
 0xa2e   :  { %v2252_v63 = vsel %vm1910_vm2, %v2251_v31, %v2250_v58 }
 0xa2f   :  { %v7096_v16 = vmul.f32 %v2252_v63, %v2245_v28 }
 0xa31   :  { %2333 = vmatmul.mubr.f32.vlgmr.msra.gmra.mrb[38].mxu0 %v7096_v16 }
 0xa32   :  { %5394 = vmatpush1.bf16.msra.mxu0 %v6862_v38  ;;  %2652 = vmatprep.mubr.f32.mxu0 %v6432_v46 }
 0xa33   :  { %5396 = vmatprep.subr.bf16.mxu0 %v6865_v39 }
 0xa36   :  { %5398 = vmatpush1.bf16.msra.mxu0 %v6872_v42 }
 0xa37   :  { %5400 = vmatprep.subr.bf16.mxu0 %v6878_v45 }
 0xa3a   :  { %5402 = vmatpush1.bf16.msra.mxu0 %v6880_v13 }
 0xa3b   :  { %5404 = vmatprep.subr.bf16.mxu0 %v6884_v15 }
 0xa3e   :  { %5406 = vmatpush1.bf16.msra.mxu0 %v6886_v19 }
 0xa3f   :  { %5408 = vmatprep.subr.bf16.mxu0 %v6890_v21 }
 0xa42   :  { %5410 = vmatpush1.bf16.msra.mxu0 %v6892_v27 }
 0xa43   :  { %5412 = vmatprep.subr.bf16.mxu0 %v6896_v22 }
 0xa46   :  { %5414 = vmatpush1.bf16.msra.mxu0 %v6898_v54 }
 0xa47   :  { %5416 = vmatprep.subr.bf16.mxu0 %v6914_v1 }
 0xa4a   :  { %5418 = vmatpush1.bf16.msra.mxu0 %v6916_v29 }
 0xa4b   :  { %5420 = vmatprep.subr.bf16.mxu0 %v6932_v40 }
 0xa4e   :  { %5422 = vmatpush1.bf16.msra.mxu0 %v6934_v44 }
 0xa4f   :  { %5456 = vmatprep.subr.bf16.mxu0 %v6854_v33 }
 0xb04   :  { %v2334_v6 = vpop.f32.mrb[38].mxu0 }
 0xb05   :  { %v2341_v34 = vrot.slane %v2334_v6, 5  ;;  %v2343_v35 = vrot.slane %v2334_v6, 6  ;;  %v2336_v4 = vpop.f32.mrb[39].mxu0 }
 0xb06   :  { %v2342_v37 = vrot.slane %v2336_v4, 5  ;;  %v2344_v41 = vrot.slane %v2336_v4, 6 }
 0xb07   :  { %v2349_v18 = vadd.f32 %v2341_v34, %v7012_v9  ;;  %v2351_v48 = vadd.f32 %v2343_v35, %v7014_v62 }
 0xb08   :  { %v2350_v14 = vadd.f32 %v2342_v37, %v7004_v36  ;;  %v2352_v49 = vadd.f32 %v2344_v41, %v7016_v26 }
 0xb09   :  { %5898 = vtanh.f32 %v2349_v18  ;;  %v4697_v58 = vmul.f32 -1.442695, %v2349_v18  ;;  %v4698_v31 = vmul.f32 -1.442695, %v2351_v48 }
 0xb0a   :  { %5900 = vtanh.f32 %v2351_v48  ;;  %v4699_v17 = vmul.f32 -1.442695, %v2350_v14  ;;  %v4700_v23 = vmul.f32 -1.442695, %v2352_v49 }
 0xb0c   :  { %5902 = vpow2.f32 %v4699_v17 }
 0xb0d   :  { %5904 = vpow2.f32 %v4700_v23 }
 0xb13   :  { %v5899_v10 = vpop.eup %5898 }
 0xb14   :  { %v5901_v61 = vpop.eup %5900  ;;  %v2381_v11 = vrot.slane %v5899_v10, 3 }
 0xb15   :  { %v2382_v53 = vrot.slane %v5901_v61, 2 }
 0xb16   :  { %v5903_v56 = vpop.eup %5902 }
 0xb17   :  { %v2383_v2 = vsel %vm1910_vm2, %v2382_v53, %v2381_v11  ;;  %v5905_v3 = vpop.eup %5904  ;;  %v2373_v59 = vadd.f32 1.0, %v5903_v56 }
 0xb18   :  { %2385 = vrot.lane.b32.xlu0 %v2383_v2, %s6433_s12  ;;  %v2374_v51 = vadd.f32 1.0, %v5905_v3 }
 0xb19   :  { %5906 = vrcp.f32 %v2373_v59 }
 0xb1a   :  { %5908 = vrcp.f32 %v2374_v51 }
 0xb1b   :  { %5910 = vpow2.f32 %v4697_v58 }
 0xb1c   :  { %5912 = vpow2.f32 %v4698_v31 }
 0xb23   :  { %v5907_v0 = vpop.eup %5906 }
 0xb24   :  { %v5909_v8 = vpop.eup %5908  ;;  %v2406_v12 = vrot.slane %v5907_v0, 3  ;;  %v2400_v7 = vmul.f32 %v5907_v0, %v2396_v50 }
 0xb25   :  { %v2407_v30 = vrot.slane %v5909_v8, 2  ;;  %v2401_v25 = vmul.f32 %v5909_v8, %v2397_v24  ;;  %v5911_v28 = vpop.eup %5910 }
 0xb26   :  { %v5913_v63 = vpop.eup %5912  ;;  %v2359_v6 = vadd.f32 1.0, %v5911_v28 }
 0xb27   :  { %v2408_v32 = vsel %vm1910_vm2, %v2407_v30, %v2406_v12  ;;  %v2360_v57 = vadd.f32 1.0, %v5913_v63 }
 0xb28   :  { %2410 = vrot.lane.b32.xlu1 %v2408_v32, %s6433_s12  ;;  %5914 = vrcp.f32 %v2359_v6 }
 0xb29   :  { %5916 = vrcp.f32 %v2360_v57 }
 0xb32   :  { %v5915_v34 = vpop.eup %5914 }
 0xb33   :  { %v5917_v37 = vpop.eup %5916 }
 0xb8a   :  { %v2386_v47 = vpop.permute.xlu0 %2385 }
 0xb8b   :  { %v2388_v35 = vrot.slane %v2386_v47, 5  ;;  %v2389_v4 = vrot.slane %v2386_v47, 6 }
 0xb8d   :  { %v2392_v41 = vmul.f32 %v5915_v34, %v2388_v35  ;;  %v2393_v14 = vmul.f32 %v5917_v37, %v2389_v4 }
 0xb8f   :  { %v7126_v49 = vadd.f32 %v2400_v7, %v2392_v41  ;;  %v7128_v17 = vadd.f32 %v2401_v25, %v2393_v14 }
 0xb91   :  { %5918 = vtanh.f32 %v7126_v49  ;;  %v2562_v34 = vrot.slane %v7126_v49, 7  ;;  %v2563_v4 = vrot.slane %v7128_v17, 7 }
 0xb92   :  { %5920 = vtanh.f32 %v7128_v17 }
 0xb9a   :  { %v2411_v61 = vpop.permute.xlu1 %2410 }
 0xb9b   :  { %v5919_v18 = vpop.eup %5918 }
 0xb9c   :  { %v5921_v48 = vpop.eup %5920  ;;  %v2416_v23 = vrot.slane %v5919_v18, 3 }
 0xb9d   :  { %v2417_v10 = vrot.slane %v5921_v48, 2 }
 0xb9f   :  { %v2418_v11 = vsel %vm1910_vm2, %v2417_v10, %v2416_v23 }
 0xba0   :  { %v7133_v53 = vmul.f32 %v2418_v11, %v2411_v61 }
 0xba2   :  { %2499 = vmatmul.mubr.f32.vlgmr.msra.gmra.mrb[32].mxu1 %v7133_v53 }
 0xba3   :  { %5426 = vmatpush1.bf16.msra.mxu1 %v6862_v38  ;;  %2817 = vmatprep.mubr.f32.mxu1 %v6432_v46 }
 0xba4   :  { %5428 = vmatprep.subr.bf16.mxu1 %v6865_v39 }
 0xba7   :  { %5430 = vmatpush1.bf16.msra.mxu1 %v6872_v42 }
 0xba8   :  { %5432 = vmatprep.subr.bf16.mxu1 %v6878_v45 }
 0xbab   :  { %5434 = vmatpush1.bf16.msra.mxu1 %v6880_v13 }
 0xbac   :  { %5436 = vmatprep.subr.bf16.mxu1 %v6884_v15 }
 0xbaf   :  { %5438 = vmatpush1.bf16.msra.mxu1 %v6886_v19 }
 0xbb0   :  { %5440 = vmatprep.subr.bf16.mxu1 %v6890_v21 }
 0xbb3   :  { %5442 = vmatpush1.bf16.msra.mxu1 %v6892_v27 }
 0xbb4   :  { %5444 = vmatprep.subr.bf16.mxu1 %v6896_v22 }
 0xbb7   :  { %5446 = vmatpush1.bf16.msra.mxu1 %v6898_v54 }
 0xbb8   :  { %5448 = vmatprep.subr.bf16.mxu1 %v6914_v1 }
 0xbbb   :  { %5450 = vmatpush1.bf16.msra.mxu1 %v6916_v29 }
 0xbbc   :  { %5452 = vmatprep.subr.bf16.mxu1 %v6932_v40 }
 0xbbf   :  { %5454 = vmatpush1.bf16.msra.mxu1 %v6934_v44 }
 0xbc0   :  { %5488 = vmatprep.subr.bf16.mxu1 %v6854_v33 }
 0xc75   :  { %v2500_v56 = vpop.f32.mrb[32].mxu1 }
 0xc76   :  { %v2507_v2 = vrot.slane %v2500_v56, 4  ;;  %v2509_v3 = vrot.slane %v2500_v56, 5  ;;  %v2502_v59 = vpop.f32.mrb[33].mxu1 }
 0xc77   :  { %v2508_v51 = vrot.slane %v2502_v59, 4  ;;  %v2510_v50 = vrot.slane %v2502_v59, 5 }
 0xc78   :  { %v2515_v0 = vadd.f32 %v2507_v2, %v7012_v9  ;;  %v2517_v24 = vadd.f32 %v2509_v3, %v7014_v62 }
 0xc79   :  { %v2516_v8 = vadd.f32 %v2508_v51, %v7004_v36  ;;  %v2518_v12 = vadd.f32 %v2510_v50, %v7016_v26 }
 0xc7a   :  { %5922 = vtanh.f32 %v2515_v0  ;;  %v4701_v10 = vmul.f32 -1.442695, %v2515_v0  ;;  %v4702_v61 = vmul.f32 -1.442695, %v2517_v24 }
 0xc7b   :  { %5924 = vtanh.f32 %v2517_v24  ;;  %v4703_v7 = vmul.f32 -1.442695, %v2516_v8  ;;  %v4704_v30 = vmul.f32 -1.442695, %v2518_v12 }
 0xc7d   :  { %5926 = vpow2.f32 %v4703_v7 }
 0xc7e   :  { %5928 = vpow2.f32 %v4704_v30 }
 0xc84   :  { %v5923_v25 = vpop.eup %5922 }
 0xc85   :  { %v5925_v32 = vpop.eup %5924  ;;  %v2547_v58 = vrot.slane %v5923_v25, 4 }
 0xc86   :  { %v2548_v31 = vrot.slane %v5925_v32, 3 }
 0xc87   :  { %v5927_v28 = vpop.eup %5926 }
 0xc88   :  { %v2549_v63 = vsel %vm1910_vm2, %v2548_v31, %v2547_v58  ;;  %v5929_v6 = vpop.eup %5928  ;;  %v2539_v57 = vadd.f32 1.0, %v5927_v28 }
 0xc89   :  { %2551 = vrot.lane.b32.xlu0 %v2549_v63, %s6433_s12  ;;  %v2540_v47 = vadd.f32 1.0, %v5929_v6 }
 0xc8a   :  { %5930 = vrcp.f32 %v2539_v57 }
 0xc8b   :  { %5932 = vrcp.f32 %v2540_v47 }
 0xc8c   :  { %5934 = vpow2.f32 %v4701_v10 }
 0xc8d   :  { %5936 = vpow2.f32 %v4702_v61 }
 0xc94   :  { %v5931_v35 = vpop.eup %5930 }
 0xc95   :  { %v5933_v37 = vpop.eup %5932  ;;  %v2572_v41 = vrot.slane %v5931_v35, 4  ;;  %v2566_v14 = vmul.f32 %v5931_v35, %v2562_v34 }
 0xc96   :  { %v2573_v18 = vrot.slane %v5933_v37, 3  ;;  %v2567_v48 = vmul.f32 %v5933_v37, %v2563_v4  ;;  %v5935_v11 = vpop.eup %5934 }
 0xc97   :  { %v5937_v56 = vpop.eup %5936  ;;  %v2525_v2 = vadd.f32 1.0, %v5935_v11 }
 0xc98   :  { %v2574_v23 = vsel %vm1910_vm2, %v2573_v18, %v2572_v41  ;;  %v2526_v49 = vadd.f32 1.0, %v5937_v56 }
 0xc99   :  { %2576 = vrot.lane.b32.xlu1 %v2574_v23, %s6433_s12  ;;  %5938 = vrcp.f32 %v2525_v2 }
 0xc9a   :  { %5940 = vrcp.f32 %v2526_v49 }
 0xca3   :  { %v5939_v3 = vpop.eup %5938 }
 0xca4   :  { %v5941_v50 = vpop.eup %5940 }
 0xcfb   :  { %v2552_v17 = vpop.permute.xlu0 %2551 }
 0xcfc   :  { %v2554_v59 = vrot.slane %v2552_v17, 4  ;;  %v2555_v51 = vrot.slane %v2552_v17, 5 }
 0xcfe   :  { %v2558_v8 = vmul.f32 %v5939_v3, %v2554_v59  ;;  %v2559_v12 = vmul.f32 %v5941_v50, %v2555_v51 }
 0xd00   :  { %v7163_v7 = vadd.f32 %v2566_v14, %v2558_v8  ;;  %v7165_v30 = vadd.f32 %v2567_v48, %v2559_v12 }
 0xd02   :  { %5942 = vtanh.f32 %v7163_v7  ;;  %v2716_v59 = vrot.slane %v7163_v7, 7  ;;  %v2717_v50 = vrot.slane %v7165_v30, 7 }
 0xd03   :  { %5944 = vtanh.f32 %v7165_v30 }
 0xd0b   :  { %v2577_v58 = vpop.permute.xlu1 %2576 }
 0xd0c   :  { %v5943_v0 = vpop.eup %5942 }
 0xd0d   :  { %v5945_v24 = vpop.eup %5944  ;;  %v2582_v25 = vrot.slane %v5943_v0, 4 }
 0xd0e   :  { %v2583_v32 = vrot.slane %v5945_v24, 3 }
 0xd10   :  { %v2584_v31 = vsel %vm1910_vm2, %v2583_v32, %v2582_v25 }
 0xd11   :  { %v2586_v28 = vmul.f32 %v2584_v31, %v2577_v58 }
 0xd13   :  { %2587 = vst.msk [vmem:[#allocation2 + $0x2] sm:$0x3] %vm1940_vm3, %v2586_v28  ;;  %2653 = vmatmul.mubr.f32.vlgmr.msra.gmra.mrb[40].mxu0 %v2586_v28 }
 0xd14   :  { %5458 = vmatpush1.bf16.msra.mxu0 %v6862_v38  ;;  %2982 = vmatprep.mubr.f32.mxu0 %v6432_v46 }
 0xd15   :  { %5460 = vmatprep.subr.bf16.mxu0 %v6865_v39 }
 0xd18   :  { %5462 = vmatpush1.bf16.msra.mxu0 %v6872_v42 }
 0xd19   :  { %5464 = vmatprep.subr.bf16.mxu0 %v6878_v45 }
 0xd1c   :  { %5466 = vmatpush1.bf16.msra.mxu0 %v6880_v13 }
 0xd1d   :  { %5468 = vmatprep.subr.bf16.mxu0 %v6884_v15 }
 0xd20   :  { %5470 = vmatpush1.bf16.msra.mxu0 %v6886_v19 }
 0xd21   :  { %5472 = vmatprep.subr.bf16.mxu0 %v6890_v21 }
 0xd24   :  { %5474 = vmatpush1.bf16.msra.mxu0 %v6892_v27 }
 0xd25   :  { %5476 = vmatprep.subr.bf16.mxu0 %v6896_v22 }
 0xd28   :  { %5478 = vmatpush1.bf16.msra.mxu0 %v6898_v54 }
 0xd29   :  { %5480 = vmatprep.subr.bf16.mxu0 %v6914_v1 }
 0xd2c   :  { %5482 = vmatpush1.bf16.msra.mxu0 %v6916_v29 }
 0xd2d   :  { %5484 = vmatprep.subr.bf16.mxu0 %v6932_v40 }
 0xd30   :  { %5486 = vmatpush1.bf16.msra.mxu0 %v6934_v44 }
 0xd31   :  { %5520 = vmatprep.subr.bf16.mxu0 %v6854_v33 }
 0xde6   :  { %v2654_v63 = vpop.f32.mrb[40].mxu0 }
 0xde7   :  { %v2661_v6 = vrot.slane %v2654_v63, 3  ;;  %v2663_v57 = vrot.slane %v2654_v63, 4  ;;  %v2656_v47 = vpop.f32.mrb[41].mxu0 }
 0xde8   :  { %v2662_v34 = vrot.slane %v2656_v47, 3  ;;  %v2664_v35 = vrot.slane %v2656_v47, 4 }
 0xde9   :  { %v2669_v4 = vadd.f32 %v2661_v6, %v7012_v9  ;;  %v2671_v37 = vadd.f32 %v2663_v57, %v7014_v62 }
 0xdea   :  { %v2670_v41 = vadd.f32 %v2662_v34, %v7004_v36  ;;  %v2672_v14 = vadd.f32 %v2664_v35, %v7016_v26 }
 0xdeb   :  { %5946 = vtanh.f32 %v2669_v4  ;;  %v4705_v58 = vmul.f32 -1.442695, %v2669_v4  ;;  %v4706_v31 = vmul.f32 -1.442695, %v2671_v37 }
 0xdec   :  { %5948 = vtanh.f32 %v2671_v37  ;;  %v4707_v18 = vmul.f32 -1.442695, %v2670_v41  ;;  %v4708_v48 = vmul.f32 -1.442695, %v2672_v14 }
 0xdee   :  { %5950 = vpow2.f32 %v4707_v18 }
 0xdef   :  { %5952 = vpow2.f32 %v4708_v48 }
 0xdf5   :  { %v5947_v23 = vpop.eup %5946 }
 0xdf6   :  { %v5949_v10 = vpop.eup %5948  ;;  %v2701_v61 = vrot.slane %v5947_v23, 5 }
 0xdf7   :  { %v2702_v11 = vrot.slane %v5949_v10, 4 }
 0xdf8   :  { %v5951_v56 = vpop.eup %5950 }
 0xdf9   :  { %v2703_v2 = vsel %vm1910_vm2, %v2702_v11, %v2701_v61  ;;  %v5953_v49 = vpop.eup %5952  ;;  %v2693_v17 = vadd.f32 1.0, %v5951_v56 }
 0xdfa   :  { %2705 = vrot.lane.b32.xlu0 %v2703_v2, %s6433_s12  ;;  %v2694_v3 = vadd.f32 1.0, %v5953_v49 }
 0xdfb   :  { %5954 = vrcp.f32 %v2693_v17 }
 0xdfc   :  { %5956 = vrcp.f32 %v2694_v3 }
 0xdfd   :  { %5958 = vpow2.f32 %v4705_v58 }
 0xdfe   :  { %5960 = vpow2.f32 %v4706_v31 }
 0xe05   :  { %v5955_v51 = vpop.eup %5954 }
 0xe06   :  { %v5957_v8 = vpop.eup %5956  ;;  %v2726_v12 = vrot.slane %v5955_v51, 5  ;;  %v2720_v0 = vmul.f32 %v5955_v51, %v2716_v59 }
 0xe07   :  { %v2727_v24 = vrot.slane %v5957_v8, 4  ;;  %v2721_v25 = vmul.f32 %v5957_v8, %v2717_v50  ;;  %v5959_v28 = vpop.eup %5958 }
 0xe08   :  { %v5961_v63 = vpop.eup %5960  ;;  %v2679_v6 = vadd.f32 1.0, %v5959_v28 }
 0xe09   :  { %v2728_v32 = vsel %vm1910_vm2, %v2727_v24, %v2726_v12  ;;  %v2680_v7 = vadd.f32 1.0, %v5961_v63 }
 0xe0a   :  { %2730 = vrot.lane.b32.xlu1 %v2728_v32, %s6433_s12  ;;  %5962 = vrcp.f32 %v2679_v6 }
 0xe0b   :  { %5964 = vrcp.f32 %v2680_v7 }
 0xe14   :  { %v5963_v57 = vpop.eup %5962 }
 0xe15   :  { %v5965_v35 = vpop.eup %5964 }
 0xe6c   :  { %v2706_v30 = vpop.permute.xlu0 %2705 }
 0xe6d   :  { %v2708_v47 = vrot.slane %v2706_v30, 3  ;;  %v2709_v34 = vrot.slane %v2706_v30, 4 }
 0xe6f   :  { %v2712_v41 = vmul.f32 %v5963_v57, %v2708_v47  ;;  %v2713_v14 = vmul.f32 %v5965_v35, %v2709_v34 }
 0xe71   :  { %v7198_v18 = vadd.f32 %v2720_v0, %v2712_v41  ;;  %v7200_v48 = vadd.f32 %v2721_v25, %v2713_v14 }
 0xe73   :  { %5966 = vtanh.f32 %v7198_v18  ;;  %v2881_v47 = vrot.slane %v7198_v18, 7  ;;  %v2882_v35 = vrot.slane %v7200_v48, 7 }
 0xe74   :  { %5968 = vtanh.f32 %v7200_v48 }
 0xe7c   :  { %v2731_v61 = vpop.permute.xlu1 %2730 }
 0xe7d   :  { %v5967_v4 = vpop.eup %5966 }
 0xe7e   :  { %v5969_v37 = vpop.eup %5968  ;;  %v2736_v23 = vrot.slane %v5967_v4, 5 }
 0xe7f   :  { %v2737_v10 = vrot.slane %v5969_v37, 4 }
 0xe81   :  { %v2738_v11 = vsel %vm1910_vm2, %v2737_v10, %v2736_v23 }
 0xe82   :  { %v7205_v56 = vmul.f32 %v2738_v11, %v2731_v61 }
 0xe84   :  { %2818 = vmatmul.mubr.f32.vlgmr.msra.gmra.mrb[34].mxu1 %v7205_v56 }
 0xe85   :  { %5490 = vmatpush1.bf16.msra.mxu1 %v6862_v38  ;;  %3147 = vmatprep.mubr.f32.mxu1 %v6432_v46 }
 0xe86   :  { %5492 = vmatprep.subr.bf16.mxu1 %v6865_v39 }
 0xe89   :  { %5494 = vmatpush1.bf16.msra.mxu1 %v6872_v42 }
 0xe8a   :  { %5496 = vmatprep.subr.bf16.mxu1 %v6878_v45 }
 0xe8d   :  { %5498 = vmatpush1.bf16.msra.mxu1 %v6880_v13 }
 0xe8e   :  { %5500 = vmatprep.subr.bf16.mxu1 %v6884_v15 }
 0xe91   :  { %5502 = vmatpush1.bf16.msra.mxu1 %v6886_v19 }
 0xe92   :  { %5504 = vmatprep.subr.bf16.mxu1 %v6890_v21 }
 0xe95   :  { %5506 = vmatpush1.bf16.msra.mxu1 %v6892_v27 }
 0xe96   :  { %5508 = vmatprep.subr.bf16.mxu1 %v6896_v22 }
 0xe99   :  { %5510 = vmatpush1.bf16.msra.mxu1 %v6898_v54 }
 0xe9a   :  { %5512 = vmatprep.subr.bf16.mxu1 %v6914_v1 }
 0xe9d   :  { %5514 = vmatpush1.bf16.msra.mxu1 %v6916_v29 }
 0xe9e   :  { %5516 = vmatprep.subr.bf16.mxu1 %v6932_v40 }
 0xea1   :  { %5518 = vmatpush1.bf16.msra.mxu1 %v6934_v44 }
 0xea2   :  { %5552 = vmatprep.subr.bf16.mxu1 %v6854_v33 }
 0xf57   :  { %v2819_v2 = vpop.f32.mrb[34].mxu1 }
 0xf58   :  { %v2826_v49 = vrot.slane %v2819_v2, 2  ;;  %v2828_v17 = vrot.slane %v2819_v2, 3  ;;  %v2821_v3 = vpop.f32.mrb[35].mxu1 }
 0xf59   :  { %v2827_v59 = vrot.slane %v2821_v3, 2  ;;  %v2829_v51 = vrot.slane %v2821_v3, 3 }
 0xf5a   :  { %v2834_v50 = vadd.f32 %v2826_v49, %v7012_v9  ;;  %v2836_v8 = vadd.f32 %v2828_v17, %v7014_v62 }
 0xf5b   :  { %v2835_v12 = vadd.f32 %v2827_v59, %v7004_v36  ;;  %v2837_v0 = vadd.f32 %v2829_v51, %v7016_v26 }
 0xf5c   :  { %5970 = vtanh.f32 %v2834_v50  ;;  %v4709_v61 = vmul.f32 -1.442695, %v2834_v50  ;;  %v4710_v11 = vmul.f32 -1.442695, %v2836_v8 }
 0xf5d   :  { %5972 = vtanh.f32 %v2836_v8  ;;  %v4711_v24 = vmul.f32 -1.442695, %v2835_v12  ;;  %v4712_v25 = vmul.f32 -1.442695, %v2837_v0 }
 0xf5f   :  { %5974 = vpow2.f32 %v4711_v24 }
 0xf60   :  { %5976 = vpow2.f32 %v4712_v25 }
 0xf66   :  { %v5971_v32 = vpop.eup %5970 }
 0xf67   :  { %v5973_v58 = vpop.eup %5972  ;;  %v2866_v31 = vrot.slane %v5971_v32, 6 }
 0xf68   :  { %v2867_v28 = vrot.slane %v5973_v58, 5 }
 0xf69   :  { %v5975_v63 = vpop.eup %5974 }
 0xf6a   :  { %v2868_v6 = vsel %vm1910_vm2, %v2867_v28, %v2866_v31  ;;  %v5977_v7 = vpop.eup %5976  ;;  %v2858_v30 = vadd.f32 1.0, %v5975_v63 }
 0xf6b   :  { %2870 = vrot.lane.b32.xlu0 %v2868_v6, %s6433_s12  ;;  %v2859_v57 = vadd.f32 1.0, %v5977_v7 }
 0xf6c   :  { %5978 = vrcp.f32 %v2858_v30 }
 0xf6d   :  { %5980 = vrcp.f32 %v2859_v57 }
 0xf6e   :  { %5982 = vpow2.f32 %v4709_v61 }
 0xf6f   :  { %5984 = vpow2.f32 %v4710_v11 }
 0xf76   :  { %v5979_v34 = vpop.eup %5978 }
 0xf77   :  { %v5981_v41 = vpop.eup %5980  ;;  %v2891_v14 = vrot.slane %v5979_v34, 6  ;;  %v2885_v4 = vmul.f32 %v5979_v34, %v2881_v47 }
 0xf78   :  { %v2892_v37 = vrot.slane %v5981_v41, 5  ;;  %v2886_v23 = vmul.f32 %v5981_v41, %v2882_v35  ;;  %v5983_v2 = vpop.eup %5982 }
 0xf79   :  { %v5985_v49 = vpop.eup %5984  ;;  %v2844_v17 = vadd.f32 1.0, %v5983_v2 }
 0xf7a   :  { %v2893_v10 = vsel %vm1910_vm2, %v2892_v37, %v2891_v14  ;;  %v2845_v18 = vadd.f32 1.0, %v5985_v49 }
 0xf7b   :  { %2895 = vrot.lane.b32.xlu1 %v2893_v10, %s6433_s12  ;;  %5986 = vrcp.f32 %v2844_v17 }
 0xf7c   :  { %5988 = vrcp.f32 %v2845_v18 }
 0xf85   :  { %v5987_v3 = vpop.eup %5986 }
 0xf86   :  { %v5989_v12 = vpop.eup %5988 }
 0xfdd   :  { %v2871_v48 = vpop.permute.xlu0 %2870 }
 0xfde   :  { %v2873_v59 = vrot.slane %v2871_v48, 2  ;;  %v2874_v51 = vrot.slane %v2871_v48, 3 }
 0xfe0   :  { %v2877_v0 = vmul.f32 %v5987_v3, %v2873_v59  ;;  %v2878_v24 = vmul.f32 %v5989_v12, %v2874_v51 }
 0xfe2   :  { %v7235_v25 = vadd.f32 %v2885_v4, %v2877_v0  ;;  %v7237_v32 = vadd.f32 %v2886_v23, %v2878_v24 }
 0xfe4   :  { %5990 = vtanh.f32 %v7235_v25  ;;  %v3047_v3 = vrot.slane %v7237_v32, 7 }
 0xfe5   :  { %5992 = vtanh.f32 %v7237_v32 }
 0xfed   :  { %v2896_v28 = vpop.permute.xlu1 %2895 }
 0xfee   :  { %v5991_v50 = vpop.eup %5990 }
 0xfef   :  { %v5993_v8 = vpop.eup %5992  ;;  %v2901_v58 = vrot.slane %v5991_v50, 6 }
 0xff0   :  { %v2902_v31 = vrot.slane %v5993_v8, 5 }
 0xff2   :  { %v2903_v63 = vsel %vm1910_vm2, %v2902_v31, %v2901_v58 }
 0xff3   :  { %v7242_v6 = vmul.f32 %v2903_v63, %v2896_v28 }
 0xff5   :  { %2983 = vmatmul.mubr.f32.vlgmr.msra.gmra.mrb[42].mxu0 %v7242_v6 }
 0xff6   :  { %5522 = vmatpush1.bf16.msra.mxu0 %v6862_v38  ;;  %3295 = vmatprep.mubr.f32.mxu0 %v6432_v46 }
 0xff7   :  { %5524 = vmatprep.subr.bf16.mxu0 %v6865_v39 }
 0xffa   :  { %5526 = vmatpush1.bf16.msra.mxu0 %v6872_v42 }
 0xffb   :  { %5528 = vmatprep.subr.bf16.mxu0 %v6878_v45 }
 0xffe   :  { %5530 = vmatpush1.bf16.msra.mxu0 %v6880_v13 }
 0xfff   :  { %5532 = vmatprep.subr.bf16.mxu0 %v6884_v15 }
0x1002   :  { %5534 = vmatpush1.bf16.msra.mxu0 %v6886_v19 }
0x1003   :  { %5536 = vmatprep.subr.bf16.mxu0 %v6890_v21 }
0x1006   :  { %5538 = vmatpush1.bf16.msra.mxu0 %v6892_v27 }
0x1007   :  { %5540 = vmatprep.subr.bf16.mxu0 %v6896_v22 }
0x100a   :  { %5542 = vmatpush1.bf16.msra.mxu0 %v6898_v54 }
0x100b   :  { %5544 = vmatprep.subr.bf16.mxu0 %v6914_v1 }
0x100e   :  { %5546 = vmatpush1.bf16.msra.mxu0 %v6916_v29 }
0x100f   :  { %5548 = vmatprep.subr.bf16.mxu0 %v6932_v40 }
0x1012   :  { %5550 = vmatpush1.bf16.msra.mxu0 %v6934_v44 }
0x1013   :  { %5584 = vmatprep.subr.bf16.mxu0 %v6854_v33 }
0x10c8   :  { %v2984_v7 = vpop.f32.mrb[42].mxu0 }
0x10c9   :  { %v2991_v30 = vrot.slane %v2984_v7, 1  ;;  %v2993_v57 = vrot.slane %v2984_v7, 2  ;;  %v2986_v47 = vpop.f32.mrb[43].mxu0 }
0x10ca   :  { %v2992_v34 = vrot.slane %v2986_v47, 1  ;;  %v2994_v35 = vrot.slane %v2986_v47, 2 }
0x10cb   :  { %v2999_v41 = vadd.f32 %v2991_v30, %v7012_v9  ;;  %v3001_v14 = vadd.f32 %v2993_v57, %v7014_v62  ;;  %v3046_v62 = vrot.slane %v7235_v25, 7 }
0x10cc   :  { %v3000_v4 = vadd.f32 %v2992_v34, %v7004_v36  ;;  %v3002_v37 = vadd.f32 %v2994_v35, %v7016_v26 }
0x10cd   :  { %5994 = vtanh.f32 %v2999_v41  ;;  %v4713_v8 = vmul.f32 -1.442695, %v2999_v41  ;;  %v4714_v58 = vmul.f32 -1.442695, %v3001_v14 }
0x10ce   :  { %5996 = vtanh.f32 %v3001_v14  ;;  %v4715_v23 = vmul.f32 -1.442695, %v3000_v4  ;;  %v4716_v10 = vmul.f32 -1.442695, %v3002_v37 }
0x10d0   :  { %5998 = vpow2.f32 %v4715_v23 }
0x10d1   :  { %6000 = vpow2.f32 %v4716_v10 }
0x10d7   :  { %v5995_v61 = vpop.eup %5994 }
0x10d8   :  { %v5997_v11 = vpop.eup %5996  ;;  %v3031_v2 = vrot.slane %v5995_v61, 7 }
0x10d9   :  { %v3032_v49 = vrot.slane %v5997_v11, 6 }
0x10da   :  { %v5999_v17 = vpop.eup %5998 }
0x10db   :  { %v3033_v18 = vsel %vm1910_vm2, %v3032_v49, %v3031_v2  ;;  %v6001_v9 = vpop.eup %6000  ;;  %v3023_v48 = vadd.f32 1.0, %v5999_v17 }
0x10dc   :  { %3035 = vrot.lane.b32.xlu0 %v3033_v18, %s6433_s12  ;;  %v3024_v36 = vadd.f32 1.0, %v6001_v9 }
0x10dd   :  { %6002 = vrcp.f32 %v3023_v48 }
0x10de   :  { %6004 = vrcp.f32 %v3024_v36 }
0x10df   :  { %6006 = vpow2.f32 %v4713_v8 }
0x10e0   :  { %6008 = vpow2.f32 %v4714_v58 }
0x10e7   :  { %v6003_v26 = vpop.eup %6002 }
0x10e8   :  { %v6005_v59 = vpop.eup %6004  ;;  %v3056_v51 = vrot.slane %v6003_v26, 7  ;;  %v3050_v12 = vmul.f32 %v6003_v26, %v3046_v62 }
0x10e9   :  { %v3057_v0 = vrot.slane %v6005_v59, 6  ;;  %v3051_v24 = vmul.f32 %v6005_v59, %v3047_v3  ;;  %v6007_v31 = vpop.eup %6006 }
0x10ea   :  { %v6009_v28 = vpop.eup %6008  ;;  %v3009_v63 = vadd.f32 1.0, %v6007_v31 }
0x10eb   :  { %v3058_v50 = vsel %vm1910_vm2, %v3057_v0, %v3056_v51  ;;  %v3010_v25 = vadd.f32 1.0, %v6009_v28 }
0x10ec   :  { %3060 = vrot.lane.b32.xlu1 %v3058_v50, %s6433_s12  ;;  %6010 = vrcp.f32 %v3009_v63 }
0x10ed   :  { %6012 = vrcp.f32 %v3010_v25 }
0x10f6   :  { %v6011_v7 = vpop.eup %6010 }
0x10f7   :  { %v6013_v47 = vpop.eup %6012 }
0x114e   :  { %v3036_v32 = vpop.permute.xlu0 %3035 }
0x114f   :  { %v3038_v30 = vrot.slane %v3036_v32, 1  ;;  %v3039_v57 = vrot.slane %v3036_v32, 2 }
0x1151   :  { %v3042_v34 = vmul.f32 %v6011_v7, %v3038_v30  ;;  %v3043_v35 = vmul.f32 %v6013_v47, %v3039_v57 }
0x1153   :  { %v3052_v4 = vadd.f32 %v3050_v12, %v3042_v34  ;;  %v3053_v37 = vadd.f32 %v3051_v24, %v3043_v35 }
0x1155   :  { %6014 = vtanh.f32 %v3052_v4  ;;  %v3207_v28 = vrot.slane %v3052_v4, 7  ;;  %v3208_v25 = vrot.slane %v3053_v37, 7 }
0x1156   :  { %6016 = vtanh.f32 %v3053_v37 }
0x115e   :  { %v3061_v61 = vpop.permute.xlu1 %3060 }
0x115f   :  { %v6015_v41 = vpop.eup %6014 }
0x1160   :  { %v6017_v14 = vpop.eup %6016  ;;  %v3066_v23 = vrot.slane %v6015_v41, 7 }
0x1161   :  { %v3067_v10 = vrot.slane %v6017_v14, 6 }
0x1163   :  { %v3068_v11 = vsel %vm1910_vm2, %v3067_v10, %v3066_v23 }
0x1164   :  { %v7273_v2 = vmul.f32 %v3068_v11, %v3061_v61 }
0x1166   :  { %3148 = vmatmul.mubr.f32.vlgmr.msra.gmra.mrb[36].mxu1 %v7273_v2 }
0x1167   :  { %5554 = vmatpush1.bf16.msra.mxu1 %v6862_v38  ;;  %3454 = vmatprep.mubr.f32.mxu1 %v6432_v46 }
0x1168   :  { %5556 = vmatprep.subr.bf16.mxu1 %v6865_v39 }
0x116b   :  { %5558 = vmatpush1.bf16.msra.mxu1 %v6872_v42 }
0x116c   :  { %5560 = vmatprep.subr.bf16.mxu1 %v6878_v45 }
0x116f   :  { %5562 = vmatpush1.bf16.msra.mxu1 %v6880_v13 }
0x1170   :  { %5564 = vmatprep.subr.bf16.mxu1 %v6884_v15 }
0x1173   :  { %5566 = vmatpush1.bf16.msra.mxu1 %v6886_v19 }
0x1174   :  { %5568 = vmatprep.subr.bf16.mxu1 %v6890_v21 }
0x1177   :  { %5570 = vmatpush1.bf16.msra.mxu1 %v6892_v27 }
0x1178   :  { %5572 = vmatprep.subr.bf16.mxu1 %v6896_v22 }
0x117b   :  { %5574 = vmatpush1.bf16.msra.mxu1 %v6898_v54 }
0x117c   :  { %5576 = vmatprep.subr.bf16.mxu1 %v6914_v1 }
0x117f   :  { %5578 = vmatpush1.bf16.msra.mxu1 %v6916_v29 }
0x1180   :  { %5580 = vmatprep.subr.bf16.mxu1 %v6932_v40 }
0x1183   :  { %5582 = vmatpush1.bf16.msra.mxu1 %v6934_v44 }
0x1184   :  { %5616 = vmatprep.subr.bf16.mxu1 %v6854_v33 }
0x1239   :  { %v3149_v49 = vpop.f32.mrb[36].mxu1 }
0x123a   :  { %v3156_v17 = vrot.slane %v3149_v49, 1  ;;  %v3151_v18 = vpop.f32.mrb[37].mxu1  ;;  %v3162_v36 = vadd.f32 %v3149_v49, %v7007_v43 }
0x123b   :  { %v3157_v9 = vrot.slane %v3151_v18, 1  ;;  %v3163_v48 = vadd.f32 %v3151_v18, %v7010_v20 }
0x123c   :  { %v3164_v62 = vadd.f32 %v3156_v17, %v7021_v52  ;;  %v4717_v34 = vmul.f32 -1.442695, %v3162_v36 }
0x123d   :  { %v3165_v26 = vadd.f32 %v3157_v9, %v7023_v55  ;;  %v4719_v3 = vmul.f32 -1.442695, %v3163_v48 }
0x123e   :  { %6018 = vtanh.f32 %v3164_v62  ;;  %v4718_v35 = vmul.f32 -1.442695, %v3164_v62 }
0x123f   :  { %v4720_v59 = vmul.f32 -1.442695, %v3165_v26  ;;  %6020 = vtanh.f32 %v3162_v36 }
0x1240   :  { %6022 = vpow2.f32 %v4719_v3 }
0x1241   :  { %6024 = vpow2.f32 %v4720_v59 }
0x1248   :  { %v6019_v51 = vpop.eup %6018 }
0x1249   :  { %v6021_v12 = vpop.eup %6020  ;;  %v3194_v0 = vrot.slane %v6019_v51, 7 }
0x124a   :  { %v6023_v24 = vpop.eup %6022 }
0x124b   :  { %v6025_v50 = vpop.eup %6024  ;;  %v3186_v8 = vadd.f32 1.0, %v6023_v24  ;;  %v3195_v58 = vsel %vm1910_vm2, %v3194_v0, %v6021_v12 }
0x124c   :  { %v3187_v31 = vadd.f32 1.0, %v6025_v50  ;;  %3197 = vrot.lane.b32.xlu0 %v3195_v58, %s6433_s12 }
0x124d   :  { %6026 = vrcp.f32 %v3186_v8 }
0x124e   :  { %6028 = vrcp.f32 %v3187_v31 }
0x124f   :  { %6030 = vpow2.f32 %v4717_v34 }
0x1250   :  { %6032 = vpow2.f32 %v4718_v35 }
0x1257   :  { %v6027_v63 = vpop.eup %6026 }
0x1258   :  { %v6029_v32 = vpop.eup %6028  ;;  %v3211_v7 = vmul.f32 %v6027_v63, %v3207_v28 }
0x1259   :  { %v3217_v30 = vrot.slane %v6029_v32, 7  ;;  %v3212_v57 = vmul.f32 %v6029_v32, %v3208_v25  ;;  %v6031_v41 = vpop.eup %6030 }
0x125a   :  { %v6033_v14 = vpop.eup %6032  ;;  %v3172_v23 = vadd.f32 1.0, %v6031_v41 }
0x125b   :  { %v3218_v47 = vsel %vm1910_vm2, %v3217_v30, %v6027_v63  ;;  %v3173_v10 = vadd.f32 1.0, %v6033_v14 }
0x125c   :  { %3220 = vrot.lane.b32.xlu1 %v3218_v47, %s6433_s12  ;;  %6034 = vrcp.f32 %v3172_v23 }
0x125d   :  { %6036 = vrcp.f32 %v3173_v10 }
0x1266   :  { %v6035_v4 = vpop.eup %6034 }
0x1267   :  { %v6037_v49 = vpop.eup %6036 }
0x12be   :  { %v3198_v37 = vpop.permute.xlu0 %3197 }
0x12bf   :  { %v3200_v61 = vrot.slane %v3198_v37, 1  ;;  %v3203_v11 = vmul.f32 %v6035_v4, %v3198_v37 }
0x12c1   :  { %v3204_v17 = vmul.f32 %v6037_v49, %v3200_v61  ;;  %v3213_v18 = vadd.f32 %v3211_v7, %v3203_v11 }
0x12c3   :  { %v3214_v9 = vadd.f32 %v3212_v57, %v3204_v17  ;;  %v3355_v41 = vrot.slane %v3213_v18, 7 }
0x12c5   :  { %6038 = vtanh.f32 %v3214_v9  ;;  %v3356_v23 = vrot.slane %v3214_v9, 7 }
0x12c6   :  { %6040 = vtanh.f32 %v3213_v18 }
0x12ce   :  { %v3221_v26 = vpop.permute.xlu1 %3220 }
0x12cf   :  { %v6039_v48 = vpop.eup %6038 }
0x12d0   :  { %v3226_v36 = vrot.slane %v6039_v48, 7  ;;  %v6041_v62 = vpop.eup %6040 }
0x12d2   :  { %v3227_v3 = vsel %vm1910_vm2, %v3226_v36, %v6041_v62 }
0x12d3   :  { %v3229_v59 = vmul.f32 %v3227_v3, %v3221_v26 }
0x12d5   :  { %3230 = vst.msk [vmem:[#allocation2 + $0x4] sm:$0x3] %vm1940_vm3, %v3229_v59  ;;  %3296 = vmatmul.mubr.f32.vlgmr.msra.gmra.mrb[44].mxu0 %v3229_v59 }
0x12d6   :  { %5586 = vmatpush1.bf16.msra.mxu0 %v6862_v38  ;;  %3619 = vmatprep.mubr.f32.mxu0 %v6432_v46 }
0x12d7   :  { %5588 = vmatprep.subr.bf16.mxu0 %v6865_v39 }
0x12da   :  { %5590 = vmatpush1.bf16.msra.mxu0 %v6872_v42 }
0x12db   :  { %5592 = vmatprep.subr.bf16.mxu0 %v6878_v45 }
0x12de   :  { %5594 = vmatpush1.bf16.msra.mxu0 %v6880_v13 }
0x12df   :  { %5596 = vmatprep.subr.bf16.mxu0 %v6884_v15 }
0x12e2   :  { %5598 = vmatpush1.bf16.msra.mxu0 %v6886_v19 }
0x12e3   :  { %5600 = vmatprep.subr.bf16.mxu0 %v6890_v21 }
0x12e6   :  { %5602 = vmatpush1.bf16.msra.mxu0 %v6892_v27 }
0x12e7   :  { %5604 = vmatprep.subr.bf16.mxu0 %v6896_v22 }
0x12ea   :  { %5606 = vmatpush1.bf16.msra.mxu0 %v6898_v54 }
0x12eb   :  { %5608 = vmatprep.subr.bf16.mxu0 %v6914_v1 }
0x12ee   :  { %5610 = vmatpush1.bf16.msra.mxu0 %v6916_v29 }
0x12ef   :  { %5612 = vmatprep.subr.bf16.mxu0 %v6932_v40 }
0x12f2   :  { %5614 = vmatpush1.bf16.msra.mxu0 %v6934_v44 }
0x12f3   :  { %5648 = vmatprep.subr.bf16.mxu0 %v6854_v33 }
0x13a8   :  { %v3297_v51 = vpop.f32.mrb[44].mxu0 }
0x13a9   :  { %v3304_v12 = vrot.slane %v3297_v51, 7  ;;  %v3299_v0 = vpop.f32.mrb[45].mxu0  ;;  %v3312_v58 = vadd.f32 %v3297_v51, %v7021_v52 }
0x13aa   :  { %v3305_v24 = vrot.slane %v3299_v0, 7  ;;  %v3313_v50 = vadd.f32 %v3299_v0, %v7023_v55 }
0x13ab   :  { %v3310_v8 = vadd.f32 %v3304_v12, %v7007_v43  ;;  %v4722_v49 = vmul.f32 -1.442695, %v3312_v58 }
0x13ac   :  { %v3311_v31 = vadd.f32 %v3305_v24, %v7010_v20  ;;  %v4724_v28 = vmul.f32 -1.442695, %v3313_v50 }
0x13ad   :  { %6042 = vtanh.f32 %v3310_v8  ;;  %v4721_v17 = vmul.f32 -1.442695, %v3310_v8 }
0x13ae   :  { %v4723_v63 = vmul.f32 -1.442695, %v3311_v31  ;;  %6044 = vtanh.f32 %v3312_v58 }
0x13b0   :  { %6046 = vpow2.f32 %v4723_v63 }
0x13b1   :  { %6048 = vpow2.f32 %v4724_v28 }
0x13b7   :  { %v6043_v25 = vpop.eup %6042 }
0x13b8   :  { %v6045_v32 = vpop.eup %6044  ;;  %v3342_v7 = vrot.slane %v6043_v25, 1 }
0x13ba   :  { %v6047_v30 = vpop.eup %6046  ;;  %v3343_v34 = vsel %vm1910_vm2, %v6045_v32, %v3342_v7 }
0x13bb   :  { %v6049_v57 = vpop.eup %6048  ;;  %v3334_v47 = vadd.f32 1.0, %v6047_v30  ;;  %3345 = vrot.lane.b32.xlu0 %v3343_v34, %s6433_s12 }
0x13bc   :  { %v3335_v35 = vadd.f32 1.0, %v6049_v57 }
0x13bd   :  { %6050 = vrcp.f32 %v3334_v47 }
0x13be   :  { %6052 = vrcp.f32 %v3335_v35 }
0x13bf   :  { %6054 = vpow2.f32 %v4722_v49 }
0x13c0   :  { %6056 = vpow2.f32 %v4721_v17 }
0x13c7   :  { %v6051_v14 = vpop.eup %6050 }
0x13c8   :  { %v6053_v10 = vpop.eup %6052  ;;  %v3365_v4 = vrot.slane %v6051_v14, 1  ;;  %v3359_v37 = vmul.f32 %v6051_v14, %v3355_v41 }
0x13c9   :  { %v3360_v61 = vmul.f32 %v6053_v10, %v3356_v23  ;;  %v6055_v48 = vpop.eup %6054 }
0x13ca   :  { %v3366_v11 = vsel %vm1910_vm2, %v6053_v10, %v3365_v4  ;;  %v6057_v36 = vpop.eup %6056  ;;  %v3321_v62 = vadd.f32 1.0, %v6055_v48 }
0x13cb   :  { %3368 = vrot.lane.b32.xlu1 %v3366_v11, %s6433_s12  ;;  %v3320_v26 = vadd.f32 1.0, %v6057_v36 }
0x13cc   :  { %6058 = vrcp.f32 %v3321_v62 }
0x13cd   :  { %6060 = vrcp.f32 %v3320_v26 }
0x13d6   :  { %v6059_v18 = vpop.eup %6058 }
0x13d7   :  { %v6061_v51 = vpop.eup %6060 }
0x142d   :  { %v3346_v9 = vpop.permute.xlu0 %3345 }
0x142e   :  { %v3348_v3 = vrot.slane %v3346_v9, 7  ;;  %v3352_v59 = vmul.f32 %v6059_v18, %v3346_v9 }
0x1430   :  { %v3351_v12 = vmul.f32 %v6061_v51, %v3348_v3  ;;  %v7328_v0 = vadd.f32 %v3360_v61, %v3352_v59 }
0x1432   :  { %v3361_v24 = vadd.f32 %v3359_v37, %v3351_v12  ;;  %v3519_v9 = vrot.slane %v7328_v0, 7 }
0x1434   :  { %6062 = vtanh.f32 %v3361_v24  ;;  %v3518_v26 = vrot.slane %v3361_v24, 7 }
0x1435   :  { %6064 = vtanh.f32 %v7328_v0 }
0x143d   :  { %v3369_v31 = vpop.permute.xlu1 %3368 }
0x143e   :  { %v6063_v50 = vpop.eup %6062 }
0x143f   :  { %v3374_v8 = vrot.slane %v6063_v50, 1  ;;  %v6065_v58 = vpop.eup %6064 }
0x1441   :  { %v3375_v28 = vsel %vm1910_vm2, %v6065_v58, %v3374_v8 }
0x1442   :  { %v7332_v63 = vmul.f32 %v3375_v28, %v3369_v31 }
0x1444   :  { %3455 = vmatmul.mubr.f32.vlgmr.msra.gmra.mrb[38].mxu1 %v7332_v63 }
0x1445   :  { %5618 = vmatpush1.bf16.msra.mxu1 %v6862_v38  ;;  %3784 = vmatprep.mubr.f32.mxu1 %v6432_v46 }
0x1446   :  { %5620 = vmatprep.subr.bf16.mxu1 %v6865_v39 }
0x1449   :  { %5622 = vmatpush1.bf16.msra.mxu1 %v6872_v42 }
0x144a   :  { %5624 = vmatprep.subr.bf16.mxu1 %v6878_v45 }
0x144d   :  { %5626 = vmatpush1.bf16.msra.mxu1 %v6880_v13 }
0x144e   :  { %5628 = vmatprep.subr.bf16.mxu1 %v6884_v15 }
0x1451   :  { %5630 = vmatpush1.bf16.msra.mxu1 %v6886_v19 }
0x1452   :  { %5632 = vmatprep.subr.bf16.mxu1 %v6890_v21 }
0x1455   :  { %5634 = vmatpush1.bf16.msra.mxu1 %v6892_v27 }
0x1456   :  { %5636 = vmatprep.subr.bf16.mxu1 %v6896_v22 }
0x1459   :  { %5638 = vmatpush1.bf16.msra.mxu1 %v6898_v54 }
0x145a   :  { %5640 = vmatprep.subr.bf16.mxu1 %v6914_v1 }
0x145d   :  { %5642 = vmatpush1.bf16.msra.mxu1 %v6916_v29 }
0x145e   :  { %5644 = vmatprep.subr.bf16.mxu1 %v6932_v40 }
0x1461   :  { %5646 = vmatpush1.bf16.msra.mxu1 %v6934_v44 }
0x1462   :  { %5680 = vmatprep.subr.bf16.mxu1 %v6854_v33 }
0x1517   :  { %v3456_v25 = vpop.f32.mrb[38].mxu1 }
0x1518   :  { %v3463_v32 = vrot.slane %v3456_v25, 6  ;;  %v3465_v7 = vrot.slane %v3456_v25, 7  ;;  %v3458_v30 = vpop.f32.mrb[39].mxu1 }
0x1519   :  { %v3464_v57 = vrot.slane %v3458_v30, 6  ;;  %v3466_v47 = vrot.slane %v3458_v30, 7 }
0x151a   :  { %v3471_v34 = vadd.f32 %v3463_v32, %v7007_v43  ;;  %v3473_v35 = vadd.f32 %v3465_v7, %v7021_v52 }
0x151b   :  { %v3472_v41 = vadd.f32 %v3464_v57, %v7010_v20  ;;  %v3474_v14 = vadd.f32 %v3466_v47, %v7023_v55 }
0x151c   :  { %6066 = vtanh.f32 %v3471_v34  ;;  %v4725_v58 = vmul.f32 -1.442695, %v3471_v34  ;;  %v4726_v31 = vmul.f32 -1.442695, %v3473_v35 }
0x151d   :  { %6068 = vtanh.f32 %v3473_v35  ;;  %v4727_v23 = vmul.f32 -1.442695, %v3472_v41  ;;  %v4728_v10 = vmul.f32 -1.442695, %v3474_v14 }
0x151f   :  { %6070 = vpow2.f32 %v4727_v23 }
0x1520   :  { %6072 = vpow2.f32 %v4728_v10 }
0x1526   :  { %v6067_v4 = vpop.eup %6066 }
0x1527   :  { %v6069_v37 = vpop.eup %6068  ;;  %v3503_v61 = vrot.slane %v6067_v4, 2 }
0x1528   :  { %v3504_v11 = vrot.slane %v6069_v37, 1 }
0x1529   :  { %v6071_v49 = vpop.eup %6070 }
0x152a   :  { %v3505_v17 = vsel %vm1910_vm2, %v3504_v11, %v3503_v61  ;;  %v6073_v48 = vpop.eup %6072  ;;  %v3495_v36 = vadd.f32 1.0, %v6071_v49 }
0x152b   :  { %3507 = vrot.lane.b32.xlu0 %v3505_v17, %s6433_s12  ;;  %v3496_v62 = vadd.f32 1.0, %v6073_v48 }
0x152c   :  { %6074 = vrcp.f32 %v3495_v36 }
0x152d   :  { %6076 = vrcp.f32 %v3496_v62 }
0x152e   :  { %6078 = vpow2.f32 %v4725_v58 }
0x152f   :  { %6080 = vpow2.f32 %v4726_v31 }
0x1536   :  { %v6075_v18 = vpop.eup %6074 }
0x1537   :  { %v6077_v3 = vpop.eup %6076  ;;  %v3528_v59 = vrot.slane %v6075_v18, 2  ;;  %v3522_v51 = vmul.f32 %v6075_v18, %v3518_v26 }
0x1538   :  { %v3529_v12 = vrot.slane %v6077_v3, 1  ;;  %v3523_v50 = vmul.f32 %v6077_v3, %v3519_v9  ;;  %v6079_v28 = vpop.eup %6078 }
0x1539   :  { %v6081_v25 = vpop.eup %6080  ;;  %v3481_v32 = vadd.f32 1.0, %v6079_v28 }
0x153a   :  { %v3530_v8 = vsel %vm1910_vm2, %v3529_v12, %v3528_v59  ;;  %v3482_v24 = vadd.f32 1.0, %v6081_v25 }
0x153b   :  { %3532 = vrot.lane.b32.xlu1 %v3530_v8, %s6433_s12  ;;  %6082 = vrcp.f32 %v3481_v32 }
0x153c   :  { %6084 = vrcp.f32 %v3482_v24 }
0x1545   :  { %v6083_v7 = vpop.eup %6082 }
0x1546   :  { %v6085_v47 = vpop.eup %6084 }
0x159d   :  { %v3508_v0 = vpop.permute.xlu0 %3507 }
0x159e   :  { %v3510_v30 = vrot.slane %v3508_v0, 6  ;;  %v3511_v57 = vrot.slane %v3508_v0, 7 }
0x15a0   :  { %v3514_v41 = vmul.f32 %v6083_v7, %v3510_v30  ;;  %v3515_v14 = vmul.f32 %v6085_v47, %v3511_v57 }
0x15a2   :  { %v7361_v23 = vadd.f32 %v3522_v51, %v3514_v41  ;;  %v7363_v10 = vadd.f32 %v3523_v50, %v3515_v14 }
0x15a4   :  { %6086 = vtanh.f32 %v7361_v23  ;;  %v3683_v7 = vrot.slane %v7361_v23, 7  ;;  %v3684_v57 = vrot.slane %v7363_v10, 7 }
0x15a5   :  { %6088 = vtanh.f32 %v7363_v10 }
0x15ad   :  { %v3533_v61 = vpop.permute.xlu1 %3532 }
0x15ae   :  { %v6087_v34 = vpop.eup %6086 }
0x15af   :  { %v6089_v35 = vpop.eup %6088  ;;  %v3538_v4 = vrot.slane %v6087_v34, 2 }
0x15b0   :  { %v3539_v37 = vrot.slane %v6089_v35, 1 }
0x15b2   :  { %v3540_v11 = vsel %vm1910_vm2, %v3539_v37, %v3538_v4 }
0x15b3   :  { %v7368_v49 = vmul.f32 %v3540_v11, %v3533_v61 }
0x15b5   :  { %3620 = vmatmul.mubr.f32.vlgmr.msra.gmra.mrb[46].mxu0 %v7368_v49 }
0x15b6   :  { %5650 = vmatpush1.bf16.msra.mxu0 %v6862_v38  ;;  %3938 = vmatprep.mubr.f32.mxu0 %v6432_v46 }
0x15b7   :  { %5652 = vmatprep.subr.bf16.mxu0 %v6865_v39 }
0x15ba   :  { %5654 = vmatpush1.bf16.msra.mxu0 %v6872_v42 }
0x15bb   :  { %5656 = vmatprep.subr.bf16.mxu0 %v6878_v45 }
0x15be   :  { %5658 = vmatpush1.bf16.msra.mxu0 %v6880_v13 }
0x15bf   :  { %5660 = vmatprep.subr.bf16.mxu0 %v6884_v15 }
0x15c2   :  { %5662 = vmatpush1.bf16.msra.mxu0 %v6886_v19 }
0x15c3   :  { %5664 = vmatprep.subr.bf16.mxu0 %v6890_v21 }
0x15c6   :  { %5666 = vmatpush1.bf16.msra.mxu0 %v6892_v27 }
0x15c7   :  { %5668 = vmatprep.subr.bf16.mxu0 %v6896_v22 }
0x15ca   :  { %5670 = vmatpush1.bf16.msra.mxu0 %v6898_v54 }
0x15cb   :  { %5672 = vmatprep.subr.bf16.mxu0 %v6914_v1 }
0x15ce   :  { %5674 = vmatpush1.bf16.msra.mxu0 %v6916_v29 }
0x15cf   :  { %5676 = vmatprep.subr.bf16.mxu0 %v6932_v40 }
0x15d2   :  { %5678 = vmatpush1.bf16.msra.mxu0 %v6934_v44 }
0x15d3   :  { %5712 = vmatprep.subr.bf16.mxu0 %v6854_v33 }
0x1688   :  { %v3621_v17 = vpop.f32.mrb[46].mxu0 }
0x1689   :  { %v3628_v48 = vrot.slane %v3621_v17, 5  ;;  %v3630_v36 = vrot.slane %v3621_v17, 6  ;;  %v3623_v62 = vpop.f32.mrb[47].mxu0 }
0x168a   :  { %v3629_v26 = vrot.slane %v3623_v62, 5  ;;  %v3631_v18 = vrot.slane %v3623_v62, 6 }
0x168b   :  { %v3636_v9 = vadd.f32 %v3628_v48, %v7007_v43  ;;  %v3638_v3 = vadd.f32 %v3630_v36, %v7021_v52 }
0x168c   :  { %v3637_v59 = vadd.f32 %v3629_v26, %v7010_v20  ;;  %v3639_v51 = vadd.f32 %v3631_v18, %v7023_v55 }
0x168d   :  { %6090 = vtanh.f32 %v3636_v9  ;;  %v4729_v37 = vmul.f32 -1.442695, %v3636_v9  ;;  %v4730_v61 = vmul.f32 -1.442695, %v3638_v3 }
0x168e   :  { %6092 = vtanh.f32 %v3638_v3  ;;  %v4731_v12 = vmul.f32 -1.442695, %v3637_v59  ;;  %v4732_v50 = vmul.f32 -1.442695, %v3639_v51 }
0x1690   :  { %6094 = vpow2.f32 %v4731_v12 }
0x1691   :  { %6096 = vpow2.f32 %v4732_v50 }
0x1697   :  { %v6091_v33 = vpop.eup %6090 }
0x1698   :  { %v6093_v8 = vpop.eup %6092  ;;  %v3668_v58 = vrot.slane %v6091_v33, 3 }
0x1699   :  { %v3669_v31 = vrot.slane %v6093_v8, 2 }
0x169a   :  { %v6095_v28 = vpop.eup %6094 }
0x169b   :  { %v3670_v25 = vsel %vm1910_vm2, %v3669_v31, %v3668_v58  ;;  %v6097_v32 = vpop.eup %6096  ;;  %v3660_v24 = vadd.f32 1.0, %v6095_v28 }
0x169c   :  { %3672 = vrot.lane.b32.xlu0 %v3670_v25, %s6433_s12  ;;  %v3661_v0 = vadd.f32 1.0, %v6097_v32 }
0x169d   :  { %6098 = vrcp.f32 %v3660_v24 }
0x169e   :  { %6100 = vrcp.f32 %v3661_v0 }
0x169f   :  { %6102 = vpow2.f32 %v4729_v37 }
0x16a0   :  { %6104 = vpow2.f32 %v4730_v61 }
0x16a7   :  { %v6099_v30 = vpop.eup %6098 }
0x16a8   :  { %v6101_v47 = vpop.eup %6100  ;;  %v3693_v41 = vrot.slane %v6099_v30, 3  ;;  %v3687_v14 = vmul.f32 %v6099_v30, %v3683_v7 }
0x16a9   :  { %v3694_v34 = vrot.slane %v6101_v47, 2  ;;  %v3688_v35 = vmul.f32 %v6101_v47, %v3684_v57  ;;  %v6103_v11 = vpop.eup %6102 }
0x16aa   :  { %v6105_v17 = vpop.eup %6104  ;;  %v3646_v48 = vadd.f32 1.0, %v6103_v11 }
0x16ab   :  { %v3695_v4 = vsel %vm1910_vm2, %v3694_v34, %v3693_v41  ;;  %v3647_v23 = vadd.f32 1.0, %v6105_v17 }
0x16ac   :  { %3697 = vrot.lane.b32.xlu1 %v3695_v4, %s6433_s12  ;;  %6106 = vrcp.f32 %v3646_v48 }
0x16ad   :  { %6108 = vrcp.f32 %v3647_v23 }
0x16b6   :  { %v6107_v36 = vpop.eup %6106 }
0x16b7   :  { %v6109_v18 = vpop.eup %6108 }
0x170e   :  { %v3673_v10 = vpop.permute.xlu0 %3672 }
0x170f   :  { %v3675_v62 = vrot.slane %v3673_v10, 5  ;;  %v3676_v26 = vrot.slane %v3673_v10, 6 }
0x1711   :  { %v3679_v59 = vmul.f32 %v6107_v36, %v3675_v62  ;;  %v3680_v51 = vmul.f32 %v6109_v18, %v3676_v26 }
0x1713   :  { %v3689_v12 = vadd.f32 %v3687_v14, %v3679_v59  ;;  %v7398_v50 = vadd.f32 %v3688_v35, %v3680_v51 }
0x1715   :  { %6110 = vtanh.f32 %v3689_v12  ;;  %v3848_v62 = vrot.slane %v3689_v12, 7  ;;  %v3849_v18 = vrot.slane %v7398_v50, 7 }
0x1716   :  { %6112 = vtanh.f32 %v7398_v50 }
0x171e   :  { %v3698_v58 = vpop.permute.xlu1 %3697 }
0x171f   :  { %v6111_v9 = vpop.eup %6110 }
0x1720   :  { %v6113_v3 = vpop.eup %6112  ;;  %v3703_v33 = vrot.slane %v6111_v9, 3 }
0x1721   :  { %v3704_v8 = vrot.slane %v6113_v3, 2 }
0x1723   :  { %v3705_v31 = vsel %vm1910_vm2, %v3704_v8, %v3703_v33 }
0x1724   :  { %v7402_v28 = vmul.f32 %v3705_v31, %v3698_v58 }
0x1726   :  { %3785 = vmatmul.mubr.f32.vlgmr.msra.gmra.mrb[40].mxu1 %v7402_v28 }
0x1727   :  { %5682 = vmatpush1.bf16.msra.mxu1 %v6862_v38  ;;  %4103 = vmatprep.mubr.f32.mxu1 %v6432_v46 }
0x1728   :  { %5684 = vmatprep.subr.bf16.mxu1 %v6865_v39 }
0x172b   :  { %5686 = vmatpush1.bf16.msra.mxu1 %v6872_v42 }
0x172c   :  { %5688 = vmatprep.subr.bf16.mxu1 %v6878_v45 }
0x172f   :  { %5690 = vmatpush1.bf16.msra.mxu1 %v6880_v13 }
0x1730   :  { %5692 = vmatprep.subr.bf16.mxu1 %v6884_v15 }
0x1733   :  { %5694 = vmatpush1.bf16.msra.mxu1 %v6886_v19 }
0x1734   :  { %5696 = vmatprep.subr.bf16.mxu1 %v6890_v21 }
0x1737   :  { %5698 = vmatpush1.bf16.msra.mxu1 %v6892_v27 }
0x1738   :  { %5700 = vmatprep.subr.bf16.mxu1 %v6896_v22 }
0x173b   :  { %5702 = vmatpush1.bf16.msra.mxu1 %v6898_v54 }
0x173c   :  { %5704 = vmatprep.subr.bf16.mxu1 %v6914_v1 }
0x173f   :  { %5706 = vmatpush1.bf16.msra.mxu1 %v6916_v29 }
0x1740   :  { %5708 = vmatprep.subr.bf16.mxu1 %v6932_v40 }
0x1743   :  { %5710 = vmatpush1.bf16.msra.mxu1 %v6934_v44 }
0x17f9   :  { %v3786_v25 = vpop.f32.mrb[40].mxu1 }
0x17fa   :  { %v3793_v32 = vrot.slane %v3786_v25, 4  ;;  %v3795_v24 = vrot.slane %v3786_v25, 5  ;;  %v3788_v0 = vpop.f32.mrb[41].mxu1 }
0x17fb   :  { %v3794_v7 = vrot.slane %v3788_v0, 4  ;;  %v3796_v30 = vrot.slane %v3788_v0, 5 }
0x17fc   :  { %v3801_v57 = vadd.f32 %v3793_v32, %v7007_v43  ;;  %v3803_v47 = vadd.f32 %v3795_v24, %v7021_v52 }
0x17fd   :  { %v3802_v41 = vadd.f32 %v3794_v7, %v7010_v20  ;;  %v3804_v14 = vadd.f32 %v3796_v30, %v7023_v55 }
0x17fe   :  { %6114 = vtanh.f32 %v3801_v57  ;;  %v4733_v58 = vmul.f32 -1.442695, %v3801_v57  ;;  %v4734_v31 = vmul.f32 -1.442695, %v3803_v47 }
0x17ff   :  { %6116 = vtanh.f32 %v3803_v47  ;;  %v4735_v34 = vmul.f32 -1.442695, %v3802_v41  ;;  %v4736_v35 = vmul.f32 -1.442695, %v3804_v14 }
0x1801   :  { %6118 = vpow2.f32 %v4735_v34 }
0x1802   :  { %6120 = vpow2.f32 %v4736_v35 }
0x1808   :  { %v6115_v4 = vpop.eup %6114 }
0x1809   :  { %v6117_v37 = vpop.eup %6116  ;;  %v3833_v61 = vrot.slane %v6115_v4, 4 }
0x180a   :  { %v3834_v11 = vrot.slane %v6117_v37, 3 }
0x180b   :  { %v6119_v17 = vpop.eup %6118 }
0x180c   :  { %v3835_v48 = vsel %vm1910_vm2, %v3834_v11, %v3833_v61  ;;  %v6121_v23 = vpop.eup %6120  ;;  %v3825_v10 = vadd.f32 1.0, %v6119_v17 }
0x180d   :  { %3837 = vrot.lane.b32.xlu0 %v3835_v48, %s6433_s12  ;;  %v3826_v36 = vadd.f32 1.0, %v6121_v23 }
0x180e   :  { %6122 = vrcp.f32 %v3825_v10 }
0x180f   :  { %6124 = vrcp.f32 %v3826_v36 }
0x1810   :  { %6126 = vpow2.f32 %v4733_v58 }
0x1811   :  { %6128 = vpow2.f32 %v4734_v31 }
0x1818   :  { %v6123_v26 = vpop.eup %6122 }
0x1819   :  { %v6125_v59 = vpop.eup %6124  ;;  %v3858_v51 = vrot.slane %v6123_v26, 4  ;;  %v3852_v9 = vmul.f32 %v6123_v26, %v3848_v62 }
0x181a   :  { %v3859_v3 = vrot.slane %v6125_v59, 3  ;;  %v3853_v33 = vmul.f32 %v6125_v59, %v3849_v18  ;;  %v6127_v25 = vpop.eup %6126 }
0x181b   :  { %v6129_v32 = vpop.eup %6128  ;;  %v3811_v24 = vadd.f32 1.0, %v6127_v25 }
0x181c   :  { %v3860_v8 = vsel %vm1910_vm2, %v3859_v3, %v3858_v51  ;;  %v3812_v12 = vadd.f32 1.0, %v6129_v32 }
0x181d   :  { %3862 = vrot.lane.b32.xlu1 %v3860_v8, %s6433_s12  ;;  %6130 = vrcp.f32 %v3811_v24 }
0x181e   :  { %6132 = vrcp.f32 %v3812_v12 }
0x1827   :  { %v6131_v0 = vpop.eup %6130 }
0x1828   :  { %v6133_v41 = vpop.eup %6132 }
0x187f   :  { %v3838_v50 = vpop.permute.xlu0 %3837 }
0x1880   :  { %v3840_v7 = vrot.slane %v3838_v50, 4  ;;  %v3841_v30 = vrot.slane %v3838_v50, 5 }
0x1882   :  { %v3844_v14 = vmul.f32 %v6131_v0, %v3840_v7  ;;  %v3845_v34 = vmul.f32 %v6133_v41, %v3841_v30 }
0x1884   :  { %v7430_v35 = vadd.f32 %v3852_v9, %v3844_v14  ;;  %v7432_v4 = vadd.f32 %v3853_v33, %v3845_v34 }
0x1886   :  { %6134 = vtanh.f32 %v7430_v35  ;;  %v4002_v18 = vrot.slane %v7430_v35, 7  ;;  %v4003_v51 = vrot.slane %v7432_v4, 7 }
0x1887   :  { %6136 = vtanh.f32 %v7432_v4 }
0x188f   :  { %v3863_v11 = vpop.permute.xlu1 %3862 }
0x1890   :  { %v6135_v57 = vpop.eup %6134 }
0x1891   :  { %v6137_v47 = vpop.eup %6136  ;;  %v3868_v37 = vrot.slane %v6135_v57, 4 }
0x1892   :  { %v3869_v61 = vrot.slane %v6137_v47, 3 }
0x1894   :  { %v3870_v17 = vsel %vm1910_vm2, %v3869_v61, %v3868_v37 }
0x1895   :  { %v3872_v48 = vmul.f32 %v3870_v17, %v3863_v11 }
0x1897   :  { %3873 = vst.msk [vmem:[#allocation2 + $0x6] sm:$0x3] %vm1940_vm3, %v3872_v48  ;;  %3939 = vmatmul.mubr.f32.vlgmr.msra.gmra.mrb[48].mxu0 %v3872_v48 }
0x1898   :  { %5714 = vmatpush1.bf16.msra.mxu0 %v6862_v38  ;;  %4268 = vmatprep.mubr.f32.mxu0 %v6432_v46 }
0x1899   :  { %5716 = vmatprep.subr.bf16.mxu0 %v6865_v39 }
0x189c   :  { %5718 = vmatpush1.bf16.msra.mxu0 %v6872_v42 }
0x189d   :  { %5720 = vmatprep.subr.bf16.mxu0 %v6878_v45 }
0x18a0   :  { %5722 = vmatpush1.bf16.msra.mxu0 %v6880_v13 }
0x18a1   :  { %5724 = vmatprep.subr.bf16.mxu0 %v6884_v15 }
0x18a4   :  { %5726 = vmatpush1.bf16.msra.mxu0 %v6886_v19 }
0x18a5   :  { %5728 = vmatprep.subr.bf16.mxu0 %v6890_v21 }
0x18a8   :  { %5730 = vmatpush1.bf16.msra.mxu0 %v6892_v27 }
0x18a9   :  { %5732 = vmatprep.subr.bf16.mxu0 %v6896_v22 }
0x18ac   :  { %5734 = vmatpush1.bf16.msra.mxu0 %v6898_v54 }
0x18ad   :  { %5736 = vmatprep.subr.bf16.mxu0 %v6914_v1 }
0x18b0   :  { %5738 = vmatpush1.bf16.msra.mxu0 %v6916_v29 }
0x18b1   :  { %5740 = vmatprep.subr.bf16.mxu0 %v6932_v40 }
0x18b4   :  { %5742 = vmatpush1.bf16.msra.mxu0 %v6934_v44 }
0x196a   :  { %v3940_v38 = vpop.f32.mrb[48].mxu0 }
0x196b   :  { %v3947_v39 = vrot.slane %v3940_v38, 3  ;;  %v3949_v42 = vrot.slane %v3940_v38, 4  ;;  %v3942_v45 = vpop.f32.mrb[49].mxu0 }
0x196c   :  { %v3948_v13 = vrot.slane %v3942_v45, 3  ;;  %v3950_v15 = vrot.slane %v3942_v45, 4 }
0x196d   :  { %v3955_v19 = vadd.f32 %v3947_v39, %v7007_v43  ;;  %v3957_v21 = vadd.f32 %v3949_v42, %v7021_v52 }
0x196e   :  { %v3956_v27 = vadd.f32 %v3948_v13, %v7010_v20  ;;  %v3958_v22 = vadd.f32 %v3950_v15, %v7023_v55 }
0x196f   :  { %6138 = vtanh.f32 %v3955_v19  ;;  %v4737_v25 = vmul.f32 -1.442695, %v3955_v19  ;;  %v4738_v32 = vmul.f32 -1.442695, %v3957_v21 }
0x1970   :  { %6140 = vtanh.f32 %v3957_v21  ;;  %v4739_v54 = vmul.f32 -1.442695, %v3956_v27  ;;  %v4740_v1 = vmul.f32 -1.442695, %v3958_v22 }
0x1972   :  { %6142 = vpow2.f32 %v4739_v54 }
0x1973   :  { %6144 = vpow2.f32 %v4740_v1 }
0x1979   :  { %v6139_v29 = vpop.eup %6138 }
0x197a   :  { %v6141_v40 = vpop.eup %6140  ;;  %v3987_v44 = vrot.slane %v6139_v29, 5 }
0x197b   :  { %v3988_v46 = vrot.slane %v6141_v40, 4 }
0x197c   :  { %v6143_v23 = vpop.eup %6142 }
0x197d   :  { %v3989_v10 = vsel %vm1910_vm2, %v3988_v46, %v3987_v44  ;;  %v6145_v36 = vpop.eup %6144  ;;  %v3979_v62 = vadd.f32 1.0, %v6143_v23 }
0x197e   :  { %3991 = vrot.lane.b32.xlu0 %v3989_v10, %s6433_s12  ;;  %v3980_v26 = vadd.f32 1.0, %v6145_v36 }
0x197f   :  { %6146 = vrcp.f32 %v3979_v62 }
0x1980   :  { %6148 = vrcp.f32 %v3980_v26 }
0x1981   :  { %6150 = vpow2.f32 %v4737_v25 }
0x1982   :  { %6152 = vpow2.f32 %v4738_v32 }
0x1989   :  { %v6147_v59 = vpop.eup %6146 }
0x198a   :  { %v6149_v9 = vpop.eup %6148  ;;  %v4012_v3 = vrot.slane %v6147_v59, 5  ;;  %v4006_v33 = vmul.f32 %v6147_v59, %v4002_v18 }
0x198b   :  { %v4013_v8 = vrot.slane %v6149_v9, 4  ;;  %v4007_v58 = vmul.f32 %v6149_v9, %v4003_v51  ;;  %v6151_v24 = vpop.eup %6150 }
0x198c   :  { %v6153_v12 = vpop.eup %6152  ;;  %v3965_v50 = vadd.f32 1.0, %v6151_v24 }
0x198d   :  { %v4014_v31 = vsel %vm1910_vm2, %v4013_v8, %v4012_v3  ;;  %v3966_v0 = vadd.f32 1.0, %v6153_v12 }
0x198e   :  { %4016 = vrot.lane.b32.xlu1 %v4014_v31, %s6433_s12  ;;  %6154 = vrcp.f32 %v3965_v50 }
0x198f   :  { %6156 = vrcp.f32 %v3966_v0 }
0x1998   :  { %v6155_v30 = vpop.eup %6154 }
0x1999   :  { %v6157_v34 = vpop.eup %6156 }
0x19f0   :  { %v3992_v7 = vpop.permute.xlu0 %3991 }
0x19f1   :  { %v3994_v41 = vrot.slane %v3992_v7, 3  ;;  %v3995_v14 = vrot.slane %v3992_v7, 4 }
0x19f3   :  { %v3998_v35 = vmul.f32 %v6155_v30, %v3994_v41  ;;  %v3999_v4 = vmul.f32 %v6157_v34, %v3995_v14 }
0x19f5   :  { %v4008_v57 = vadd.f32 %v4006_v33, %v3998_v35  ;;  %v4009_v47 = vadd.f32 %v4007_v58, %v3999_v4 }
0x19f7   :  { %6158 = vtanh.f32 %v4008_v57  ;;  %v4167_v51 = vrot.slane %v4008_v57, 7  ;;  %v4168_v3 = vrot.slane %v4009_v47, 7 }
0x19f8   :  { %6160 = vtanh.f32 %v4009_v47 }
0x1a00   :  { %v4017_v48 = vpop.permute.xlu1 %4016 }
0x1a01   :  { %v6159_v37 = vpop.eup %6158 }
0x1a02   :  { %v6161_v61 = vpop.eup %6160  ;;  %v4022_v11 = vrot.slane %v6159_v37, 5 }
0x1a03   :  { %v4023_v17 = vrot.slane %v6161_v61, 4 }
0x1a05   :  { %v4024_v38 = vsel %vm1910_vm2, %v4023_v17, %v4022_v11 }
0x1a06   :  { %v7465_v39 = vmul.f32 %v4024_v38, %v4017_v48 }
0x1a08   :  { %4104 = vmatmul.mubr.f32.vlgmr.msra.gmra.mrb[42].mxu1 %v7465_v39 }
0x1adb   :  { %v4105_v42 = vpop.f32.mrb[42].mxu1 }
0x1adc   :  { %v4112_v45 = vrot.slane %v4105_v42, 2  ;;  %v4114_v13 = vrot.slane %v4105_v42, 3  ;;  %v4107_v15 = vpop.f32.mrb[43].mxu1 }
0x1add   :  { %v4113_v19 = vrot.slane %v4107_v15, 2  ;;  %v4115_v21 = vrot.slane %v4107_v15, 3 }
0x1ade   :  { %v4120_v27 = vadd.f32 %v4112_v45, %v7007_v43  ;;  %v4122_v22 = vadd.f32 %v4114_v13, %v7021_v52 }
0x1adf   :  { %v4121_v54 = vadd.f32 %v4113_v19, %v7010_v20  ;;  %v4123_v1 = vadd.f32 %v4115_v21, %v7023_v55 }
0x1ae0   :  { %6162 = vtanh.f32 %v4120_v27  ;;  %v4741_v24 = vmul.f32 -1.442695, %v4120_v27  ;;  %v4742_v12 = vmul.f32 -1.442695, %v4122_v22 }
0x1ae1   :  { %6164 = vtanh.f32 %v4122_v22  ;;  %v4743_v29 = vmul.f32 -1.442695, %v4121_v54  ;;  %v4744_v40 = vmul.f32 -1.442695, %v4123_v1 }
0x1ae3   :  { %6166 = vpow2.f32 %v4743_v29 }
0x1ae4   :  { %6168 = vpow2.f32 %v4744_v40 }
0x1aea   :  { %v6163_v44 = vpop.eup %6162 }
0x1aeb   :  { %v6165_v46 = vpop.eup %6164  ;;  %v4152_v23 = vrot.slane %v6163_v44, 6 }
0x1aec   :  { %v4153_v10 = vrot.slane %v6165_v46, 5 }
0x1aed   :  { %v6167_v36 = vpop.eup %6166 }
0x1aee   :  { %v4154_v62 = vsel %vm1910_vm2, %v4153_v10, %v4152_v23  ;;  %v6169_v26 = vpop.eup %6168  ;;  %v4144_v18 = vadd.f32 1.0, %v6167_v36  ;;  %v6434_v10 = vmov 1983009808  }
0x1aef   :  { %4156 = vrot.lane.b32.xlu0 %v4154_v62, %s6433_s12  ;;  %v4145_v59 = vadd.f32 1.0, %v6169_v26  ;;  %v2091_v36 = vunpack.c.l.s4 %v6434_v10  ;;  %v4422_v10 = vld [vmem:[#allocation15 + $0x1a0] sm:$0xff] }
0x1af0   :  { %6170 = vrcp.f32 %v4144_v18 }
0x1af1   :  { %6172 = vrcp.f32 %v4145_v59  ;;  %v2092_v62 = vunpack.c.0.s8 %v2091_v36 }
0x1af2   :  { %6174 = vpow2.f32 %v4741_v24 }
0x1af3   :  { %6176 = vpow2.f32 %v4742_v12  ;;  %v7491_v59 = vsub.s32 %v2092_v62, %v6768_v60  ;;  %v4423_v62 = vld [vmem:[#allocation15 + $0x1a8] sm:$0xff] }
0x1af5   :  { %v2262_v60 = vrot.slane %v7096_v16, %v7491_v59  ;;  %v2428_v16 = vrot.slane %v7133_v53, %v7491_v59 }
0x1afa   :  { %v6171_v9 = vpop.eup %6170 }
0x1afb   :  { %v6173_v33 = vpop.eup %6172  ;;  %v4177_v8 = vrot.slane %v6171_v9, 6  ;;  %v4171_v58 = vmul.f32 %v6171_v9, %v4167_v51 }
0x1afc   :  { %v4178_v31 = vrot.slane %v6173_v33, 5  ;;  %v4172_v25 = vmul.f32 %v6173_v33, %v4168_v3  ;;  %v6175_v50 = vpop.eup %6174  ;;  %v2096_v33 = vrot.slane %v7060_v5, %v7491_v59  ;;  %v3550_v5 = vrot.slane %v7368_v49, %v7491_v59 }
0x1afd   :  { %v6177_v0 = vpop.eup %6176  ;;  %v4130_v7 = vadd.f32 1.0, %v6175_v50  ;;  %v3715_v49 = vrot.slane %v7402_v28, %v7491_v59  ;;  %v2913_v28 = vrot.slane %v7242_v6, %v7491_v59 }
0x1afe   :  { %v4179_v32 = vsel %vm1910_vm2, %v4178_v31, %v4177_v8  ;;  %v4131_v30 = vadd.f32 1.0, %v6177_v0  ;;  %v3385_v8 = vrot.slane %v7332_v63, %v7491_v59 }
0x1aff   :  { %4181 = vrot.lane.b32.xlu1 %v4179_v32, %s6433_s12  ;;  %6178 = vrcp.f32 %v4130_v7  ;;  %v2748_v7 = vrot.slane %v7205_v56, %v7491_v59  ;;  %v4419_v56 = vld [vmem:[#allocation15 + $0x188] sm:$0xff] }
0x1b00   :  { %6180 = vrcp.f32 %v4131_v30  ;;  %v4034_v30 = vrot.slane %v7465_v39, %v7491_v59 }
0x1b09   :  { %v6179_v14 = vpop.eup %6178 }
0x1b0a   :  { %v6181_v4 = vpop.eup %6180 }
0x1b61   :  { %v4157_v41 = vpop.permute.xlu0 %4156 }
0x1b62   :  { %v4159_v34 = vrot.slane %v4157_v41, 2  ;;  %v4160_v35 = vrot.slane %v4157_v41, 3  ;;  %v4386_v41 = vld [vmem:[#allocation15 + $0x80] sm:$0xff] }
0x1b64   :  { %v4163_v57 = vmul.f32 %v6179_v14, %v4159_v34  ;;  %v4164_v47 = vmul.f32 %v6181_v4, %v4160_v35  ;;  %v4387_v14 = vld [vmem:[#allocation15 + $0x88] sm:$0xff]  ;;  %v4370_v34 = vld [vmem:[#allocation15] sm:$0xff] }
0x1b65   :  { %v5743_v53 = vpack.c.bf16 %v4387_v14, %v4386_v41  ;;  %v4371_v35 = vld [vmem:[#allocation15 + $0x8] sm:$0xff]  ;;  %v4418_v4 = vld [vmem:[#allocation15 + $0x180] sm:$0xff] }
0x1b66   :  { %v4173_v37 = vadd.f32 %v4171_v58, %v4163_v57  ;;  %v4174_v61 = vadd.f32 %v4172_v25, %v4164_v47  ;;  %v5745_v57 = vpack.c.bf16 %v4371_v35, %v4370_v34  ;;  %v5775_v47 = vpack.c.bf16 %v4419_v56, %v4418_v4 }
0x1b67   :  { %5744 = vmatprep.subr.bf16.mxu1 %v5743_v53 }
0x1b68   :  { %6182 = vtanh.f32 %v4173_v37  ;;  %v4332_v58 = vrot.slane %v4173_v37, 7  ;;  %v4333_v25 = vrot.slane %v4174_v61, 7  ;;  %v4402_v37 = vld [vmem:[#allocation15 + $0x100] sm:$0xff]  ;;  %5746 = vmatpush3.bf16.msra.mxu1 %v5745_v57  ;;  %5776 = vmatprep.subr.bf16.mxu0 %v5775_v47 }
0x1b69   :  { %6184 = vtanh.f32 %v4174_v61  ;;  %v4403_v61 = vld [vmem:[#allocation15 + $0x108] sm:$0xff] }
0x1b6a   :  { %v5777_v39 = vpack.c.bf16 %v4403_v61, %v4402_v37 }
0x1b71   :  { %v4182_v42 = vpop.permute.xlu1 %4181 }
0x1b72   :  { %v6183_v11 = vpop.eup %6182 }
0x1b73   :  { %v6185_v17 = vpop.eup %6184  ;;  %v4187_v48 = vrot.slane %v6183_v11, 6  ;;  %v4388_v11 = vld [vmem:[#allocation15 + $0x90] sm:$0xff] }
0x1b74   :  { %v4188_v38 = vrot.slane %v6185_v17, 5  ;;  %v4389_v17 = vld [vmem:[#allocation15 + $0x98] sm:$0xff] }
0x1b76   :  { %v4189_v45 = vsel %vm1910_vm2, %v4188_v38, %v4187_v48  ;;  %v4372_v48 = vld [vmem:[#allocation15 + $0x10] sm:$0xff]  ;;  %v4373_v38 = vld [vmem:[#allocation15 + $0x18] sm:$0xff] }
0x1b77   :  { %v7477_v13 = vmul.f32 %v4189_v45, %v4182_v42  ;;  %v5747_v42 = vpack.c.bf16 %v4389_v17, %v4388_v11  ;;  %v5749_v45 = vpack.c.bf16 %v4373_v38, %v4372_v48  ;;  %v4410_v38 = vld [vmem:[#allocation15 + $0x140] sm:$0xff] }
0x1b79   :  { %4269 = vmatmul.mubr.f32.vlgmr.msra.gmra.mrb[50].mxu0 %v7477_v13  ;;  %5748 = vmatprep.subr.bf16.mxu1 %v5747_v42  ;;  %v4199_v36 = vrot.slane %v7477_v13, %v7491_v59  ;;  %v4411_v42 = vld [vmem:[#allocation15 + $0x148] sm:$0xff] }
0x1b7a   :  { %5778 = vmatpush3.bf16.msra.mxu0 %v5777_v39  ;;  %5750 = vmatpush3.bf16.msra.mxu1 %v5749_v45  ;;  %v5793_v45 = vpack.c.bf16 %v4411_v42, %v4410_v38  ;;  %v4749_v42 = vld [vmem:[%s7580_s14] ss:$0 sm:$0xff] }
0x1c4c   :  { %v4270_v15 = vpop.f32.mrb[50].mxu0 }
0x1c4d   :  { %v4277_v19 = vrot.slane %v4270_v15, 1  ;;  %v4279_v21 = vrot.slane %v4270_v15, 2  ;;  %v4272_v27 = vpop.f32.mrb[51].mxu0  ;;  %v4420_v15 = vld [vmem:[#allocation15 + $0x190] sm:$0xff] }
0x1c4e   :  { %v4278_v22 = vrot.slane %v4272_v27, 1  ;;  %v4280_v54 = vrot.slane %v4272_v27, 2 }
0x1c4f   :  { %v7481_v1 = vadd.f32 %v4277_v19, %v7007_v43  ;;  %v7484_v29 = vadd.f32 %v4279_v21, %v7021_v52  ;;  %v4421_v19 = vld [vmem:[#allocation15 + $0x198] sm:$0xff]  ;;  %v4404_v21 = vld [vmem:[#allocation15 + $0x110] sm:$0xff] }
0x1c50   :  { %v4286_v40 = vadd.f32 %v4278_v22, %v7010_v20  ;;  %v4288_v44 = vadd.f32 %v4280_v54, %v7023_v55  ;;  %v5779_v27 = vpack.c.bf16 %v4421_v19, %v4420_v15  ;;  %v4405_v22 = vld [vmem:[#allocation15 + $0x118] sm:$0xff]  ;;  %v4390_v54 = vld [vmem:[#allocation15 + $0xa0] sm:$0xff]  ;;  %v4396_v15 = vld [vmem:[#allocation15 + $0xd0] sm:$0xff] }
0x1c51   :  { %6186 = vtanh.f32 %v7481_v1  ;;  %v5781_v6 = vpack.c.bf16 %v4405_v22, %v4404_v21  ;;  %v4746_v34 = vmul.f32 -1.442695, %v7484_v29  ;;  %v4397_v19 = vld [vmem:[#allocation15 + $0xd8] sm:$0xff]  ;;  %v4380_v22 = vld [vmem:[#allocation15 + $0x50] sm:$0xff] }
0x1c52   :  { %6188 = vtanh.f32 %v7484_v29  ;;  %v4747_v46 = vmul.f32 -1.442695, %v4286_v40  ;;  %v4748_v23 = vmul.f32 -1.442695, %v4288_v44  ;;  %v4391_v40 = vld [vmem:[#allocation15 + $0xa8] sm:$0xff]  ;;  %5780 = vmatprep.subr.bf16.mxu0 %v5779_v27  ;;  %v5763_v27 = vpack.c.bf16 %v4397_v19, %v4396_v15 }
0x1c53   :  { %v5751_v44 = vpack.c.bf16 %v4391_v40, %v4390_v54  ;;  %5782 = vmatpush3.bf16.msra.mxu0 %v5781_v6  ;;  %v4381_v54 = vld [vmem:[#allocation15 + $0x58] sm:$0xff]  ;;  %v4412_v6 = vld [vmem:[#allocation15 + $0x150] sm:$0xff] }
0x1c54   :  { %6190 = vpow2.f32 %v4747_v46  ;;  %v4374_v46 = vld [vmem:[#allocation15 + $0x20] sm:$0xff]  ;;  %v4429_v40 = vld [vmem:[#allocation15 + $0x1d8] sm:$0xff] }
0x1c55   :  { %6192 = vpow2.f32 %v4748_v23  ;;  %v4375_v23 = vld [vmem:[#allocation15 + $0x28] sm:$0xff]  ;;  %5752 = vmatprep.subr.bf16.mxu1 %v5751_v44 }
0x1c5b   :  { %v6187_v43 = vpop.eup %6186 }
0x1c5c   :  { %v6189_v26 = vpop.eup %6188  ;;  %v4317_v18 = vrot.slane %v6187_v43, 7  ;;  %v4406_v43 = vld [vmem:[#allocation15 + $0x120] sm:$0xff] }
0x1c5d   :  { %v4318_v52 = vrot.slane %v6189_v26, 6  ;;  %v4407_v26 = vld [vmem:[#allocation15 + $0x128] sm:$0xff] }
0x1c5e   :  { %v6191_v20 = vpop.eup %6190 }
0x1c5f   :  { %v4319_v55 = vsel %vm1910_vm2, %v4318_v52, %v4317_v18  ;;  %v6193_v51 = vpop.eup %6192  ;;  %v4309_v9 = vadd.f32 1.0, %v6191_v20  ;;  %v5753_v18 = vpack.c.bf16 %v4375_v23, %v4374_v46  ;;  %v5783_v52 = vpack.c.bf16 %v4423_v62, %v4422_v10  ;;  %v4392_v20 = vld [vmem:[#allocation15 + $0xb0] sm:$0xff]  ;;  %v4413_v46 = vld [vmem:[#allocation15 + $0x158] sm:$0xff]  ;;  %v4398_v23 = vld [vmem:[#allocation15 + $0xe0] sm:$0xff] }
0x1c60   :  { %4321 = vrot.lane.b32.xlu0 %v4319_v55, %s6433_s12  ;;  %v4310_v3 = vadd.f32 1.0, %v6193_v51  ;;  %v4393_v55 = vld [vmem:[#allocation15 + $0xb8] sm:$0xff]  ;;  %v4376_v51 = vld [vmem:[#allocation15 + $0x30] sm:$0xff]  ;;  %v4399_v10 = vld [vmem:[#allocation15 + $0xe8] sm:$0xff] }
0x1c61   :  { %6194 = vrcp.f32 %v4309_v9  ;;  %v5785_v9 = vpack.c.bf16 %v4407_v26, %v4406_v43  ;;  %5784 = vmatprep.subr.bf16.mxu0 %v5783_v52  ;;  %v5755_v13 = vpack.c.bf16 %v4393_v55, %v4392_v20  ;;  %5754 = vmatpush3.bf16.msra.mxu1 %v5753_v18  ;;  %v5767_v62 = vpack.c.bf16 %v4399_v10, %v4398_v23  ;;  %v4382_v43 = vld [vmem:[#allocation15 + $0x60] sm:$0xff]  ;;  %v4383_v26 = vld [vmem:[#allocation15 + $0x68] sm:$0xff] }
0x1c62   :  { %6196 = vrcp.f32 %v4310_v3  ;;  %v4377_v3 = vld [vmem:[#allocation15 + $0x38] sm:$0xff]  ;;  %v4430_v18 = vld [vmem:[#allocation15 + $0x1e0] sm:$0xff]  ;;  %v5769_v20 = vpack.c.bf16 %v4383_v26, %v4382_v43  ;;  %v4431_v55 = vld [vmem:[#allocation15 + $0x1e8] sm:$0xff] }
0x1c63   :  { %5786 = vmatpush3.bf16.msra.mxu0 %v5785_v9  ;;  %5756 = vmatprep.subr.bf16.mxu1 %v5755_v13  ;;  %v4415_v9 = vld [vmem:[#allocation15 + $0x168] sm:$0xff] }
0x1c64   :  { %2097 = vrot.lane.b32.xlu0 %v2096_v33, %s6435_s13  ;;  %v4424_v33 = vld [vmem:[#allocation15 + $0x1b0] sm:$0xff] }
0x1c68   :  { %3386 = vrot.lane.b32.xlu0 %v3385_v8, %s6435_s13  ;;  %v4425_v8 = vld [vmem:[#allocation15 + $0x1b8] sm:$0xff] }
0x1c6b   :  { %v6195_v31 = vpop.eup %6194 }
0x1c6c   :  { %2263 = vrot.lane.b32.xlu0 %v2262_v60, %s6433_s12  ;;  %v6197_v32 = vpop.eup %6196  ;;  %v4342_v24 = vrot.slane %v6195_v31, 7  ;;  %v7502_v12 = vmul.f32 %v6195_v31, %v4332_v58  ;;  %v5787_v60 = vpack.c.bf16 %v4425_v8, %v4424_v33  ;;  %v4408_v58 = vld [vmem:[#allocation15 + $0x130] sm:$0xff]  ;;  %v4409_v31 = vld [vmem:[#allocation15 + $0x138] sm:$0xff]  ;;  %v5799_v8 = vpack.c.bf16 %v4431_v55, %v4430_v18 }
0x1c6d   :  { %v4343_v50 = vrot.slane %v6197_v32, 6  ;;  %v7506_v0 = vmul.f32 %v6197_v32, %v4333_v25  ;;  %v4394_v25 = vld [vmem:[#allocation15 + $0xc0] sm:$0xff]  ;;  %v3078_v32 = vrot.slane %v7273_v2, %v7491_v59  ;;  %v4745_v2 = vmul.f32 -1.442695, %v7481_v1 }
0x1c6e   :  { %5788 = vmatprep.subr.bf16.mxu0 %v5787_v60  ;;  %v4400_v60 = vld [vmem:[#allocation15 + $0xf0] sm:$0xff] }
0x1c6f   :  { %v4344_v63 = vsel %vm1910_vm2, %v4343_v50, %v4342_v24  ;;  %v4395_v24 = vld [vmem:[#allocation15 + $0xc8] sm:$0xff]  ;;  %v4426_v50 = vld [vmem:[#allocation15 + $0x1c0] sm:$0xff]  ;;  %6198 = vpow2.f32 %v4745_v2 }
0x1c70   :  { %3551 = vrot.lane.b32.xlu0 %v3550_v5, %s6433_s12  ;;  %4346 = vrot.lane.b32.xlu1 %v4344_v63, %s6433_s12  ;;  %v5757_v5 = vpack.c.bf16 %v4377_v3, %v4376_v51  ;;  %v4427_v63 = vld [vmem:[#allocation15 + $0x1c8] sm:$0xff]  ;;  %6200 = vpow2.f32 %v4746_v34  ;;  %v4414_v51 = vld [vmem:[#allocation15 + $0x160] sm:$0xff]  ;;  %v4416_v34 = vld [vmem:[#allocation15 + $0x170] sm:$0xff] }
0x1c71   :  { %v5791_v41 = vpack.c.bf16 %v4427_v63, %v4426_v50  ;;  %v5801_v13 = vpack.c.bf16 %v4415_v9, %v4414_v51  ;;  %v4432_v50 = vld [vmem:[#allocation15 + $0x1f0] sm:$0xff]  ;;  %v4433_v63 = vld [vmem:[#allocation15 + $0x1f8] sm:$0xff] }
0x1c72   :  { %5758 = vmatpush3.bf16.msra.mxu1 %v5757_v5  ;;  %v4385_v5 = vld [vmem:[#allocation15 + $0x78] sm:$0xff] }
0x1c74   :  { %2429 = vrot.lane.b32.xlu0 %v2428_v16, %s6436_s30  ;;  %2749 = vrot.lane.b32.xlu1 %v2748_v7, %s6435_s13  ;;  %v5789_v16 = vpack.c.bf16 %v4409_v31, %v4408_v58  ;;  %v5759_v7 = vpack.c.bf16 %v4395_v24, %v4394_v25  ;;  %v4401_v58 = vld [vmem:[#allocation15 + $0xf8] sm:$0xff]  ;;  %v4384_v31 = vld [vmem:[#allocation15 + $0x70] sm:$0xff] }
0x1c75   :  { %v5771_v24 = vpack.c.bf16 %v4401_v58, %v4400_v60 }
0x1c76   :  { %5790 = vmatpush3.bf16.msra.mxu0 %v5789_v16  ;;  %5760 = vmatprep.subr.bf16.mxu1 %v5759_v7  ;;  %v5773_v7 = vpack.c.bf16 %v4385_v5, %v4384_v31 }
0x1c77   :  { %5792 = vmatprep.subr.bf16.mxu0 %v5791_v41 }
0x1c78   :  { %3716 = vrot.lane.b32.xlu0 %v3715_v49, %s6436_s30  ;;  %4035 = vrot.lane.b32.xlu1 %v4034_v30, %s6435_s13  ;;  %v4378_v49 = vld [vmem:[#allocation15 + $0x40] sm:$0xff]  ;;  %v4379_v30 = vld [vmem:[#allocation15 + $0x48] sm:$0xff] }
0x1c79   :  { %v5761_v14 = vpack.c.bf16 %v4379_v30, %v4378_v49  ;;  %v6199_v53 = vpop.eup %6198  ;;  %v5803_v49 = vpack.c.bf16 %v4433_v63, %v4432_v50 }
0x1c7a   :  { %v6201_v35 = vpop.eup %6200  ;;  %v4295_v4 = vadd.f32 1.0, %v6199_v53  ;;  %5794 = vmatpush3.bf16.msra.mxu0 %v5793_v45  ;;  %v4417_v53 = vld [vmem:[#allocation15 + $0x178] sm:$0xff] }
0x1c7b   :  { %5762 = vmatpush3.bf16.msra.mxu1 %v5761_v14  ;;  %v4296_v56 = vadd.f32 1.0, %v6201_v35  ;;  %v5805_v35 = vpack.c.bf16 %v4417_v53, %v4416_v34 }
0x1c7c   :  { %2914 = vrot.lane.b32.xlu1 %v2913_v28, %s6433_s12  ;;  %6202 = vrcp.f32 %v4295_v4  ;;  %5764 = vmatprep.subr.bf16.mxu1 %v5763_v27 }
0x1c7d   :  { %6204 = vrcp.f32 %v4296_v56 }
0x1c80   :  { %4200 = vrot.lane.b32.xlu1 %v4199_v36, %s6433_s12  ;;  %v5797_v36 = vpack.c.bf16 %v4413_v46, %v4412_v6 }
0x1c84   :  { %3079 = vrot.lane.b32.xlu1 %v3078_v32, %s6436_s30 }
0x1c86   :  { %v6203_v47 = vpop.eup %6202 }
0x1c87   :  { %v6205_v11 = vpop.eup %6204 }
0x1cd2   :  { %v4322_v57 = vpop.permute.xlu0 %4321 }
0x1cd3   :  { %v4324_v37 = vrot.slane %v4322_v57, 1  ;;  %v4325_v61 = vrot.slane %v4322_v57, 2 }
0x1cd5   :  { %v4328_v28 = vmul.f32 %v6203_v47, %v4324_v37  ;;  %v4329_v39 = vmul.f32 %v6205_v11, %v4325_v61 }
0x1cd6   :  { %v2098_v17 = vpop.permute.xlu0 %2097 }
0x1cd7   :  { %v4338_v1 = vadd.f32 %v7502_v12, %v4328_v28  ;;  %v4339_v29 = vadd.f32 %v7506_v0, %v4329_v39  ;;  %2101 = vst.msk [vmem:[#allocation2] sm:$0x3] %vm2100_vm4, %v2098_v17  ;;  %v5765_v12 = vpack.c.bf16 %v4381_v54, %v4380_v22  ;;  %v4428_v0 = vld [vmem:[#allocation15 + $0x1d0] sm:$0xff] }
0x1cd8   :  { %v5795_v44 = vpack.c.bf16 %v4429_v40, %v4428_v0 }
0x1cd9   :  { %6206 = vtanh.f32 %v4338_v1  ;;  %5766 = vmatpush3.bf16.msra.mxu1 %v5765_v12 }
0x1cda   :  { %6208 = vtanh.f32 %v4339_v29  ;;  %v3387_v48 = vpop.permute.xlu0 %3386  ;;  %5796 = vmatprep.subr.bf16.mxu0 %v5795_v44  ;;  %5768 = vmatprep.subr.bf16.mxu1 %v5767_v62 }
0x1cdb   :  { %3389 = vst.msk [vmem:[#allocation2 + $0x4] sm:$0x3] %vm2100_vm4, %v3387_v48  ;;  %5798 = vmatpush3.bf16.msra.mxu0 %v5797_v36 }
0x1cdc   :  { %5800 = vmatprep.subr.bf16.mxu0 %v5799_v8 }
0x1cdd   :  { %5770 = vmatpush3.bf16.msra.mxu1 %v5769_v20 }
0x1cde   :  { %v2264_v21 = vpop.permute.xlu0 %2263  ;;  %5772 = vmatprep.subr.bf16.mxu1 %v5771_v24 }
0x1cdf   :  { %2267 = vst.msk [vmem:[#allocation2] sm:$0x3] %vm2266_vm5, %v2264_v21  ;;  %5802 = vmatpush3.bf16.msra.mxu0 %v5801_v13 }
0x1ce0   :  { %5804 = vmatprep.subr.bf16.mxu0 %v5803_v49 }
0x1ce1   :  { %5774 = vmatpush3.bf16.msra.mxu1 %v5773_v7 }
0x1ce2   :  { %v3552_v52 = vpop.permute.xlu0 %3551  ;;  %v4347_v33 = vpop.permute.xlu1 %4346 }
0x1ce3   :  { %v6207_v3 = vpop.eup %6206  ;;  %3554 = vst.msk [vmem:[#allocation2 + $0x4] sm:$0x3] %vm2266_vm5, %v3552_v52  ;;  %5806 = vmatpush3.bf16.msra.mxu0 %v5805_v35 }
0x1ce4   :  { %v6209_v25 = vpop.eup %6208  ;;  %v4352_v32 = vrot.slane %v6207_v3, 7 }
0x1ce5   :  { %v4353_v16 = vrot.slane %v6209_v25, 6 }
0x1ce6   :  { %v2430_v30 = vpop.permute.xlu0 %2429  ;;  %v2750_v14 = vpop.permute.xlu1 %2749 }
0x1ce7   :  { %v4354_v41 = vsel %vm1910_vm2, %v4353_v16, %v4352_v32  ;;  %2433 = vst.msk [vmem:[#allocation2] sm:$0x3] %vm2432_vm6, %v2430_v30 }
0x1ce8   :  { %v4356_v2 = vmul.f32 %v4354_v41, %v4347_v33  ;;  %2752 = vst.msk [vmem:[#allocation2 + $0x2] sm:$0x3] %vm2100_vm4, %v2750_v14 }
0x1cea   :  { %v4364_v4 = vrot.slane %v4356_v2, %v7491_v59  ;;  %v3717_v56 = vpop.permute.xlu0 %3716  ;;  %v4036_v57 = vpop.permute.xlu1 %4035 }
0x1ceb   :  { %3719 = vst.msk [vmem:[#allocation2 + $0x4] sm:$0x3] %vm2432_vm6, %v3717_v56 }
0x1cec   :  { %4038 = vst.msk [vmem:[#allocation2 + $0x6] sm:$0x3] %vm2100_vm4, %v4036_v57  ;;  %4365 = vrot.lane.b32.xlu1 %v4364_v4, %s6436_s30 }
0x1cee   :  { %v2915_v47 = vpop.permute.xlu1 %2914 }
0x1cef   :  { %2917 = vst.msk [vmem:[#allocation2 + $0x2] sm:$0x3] %vm2266_vm5, %v2915_v47 }
0x1cf2   :  { %v4201_v37 = vpop.permute.xlu1 %4200 }
0x1cf3   :  { %4203 = vst.msk [vmem:[#allocation2 + $0x6] sm:$0x3] %vm2266_vm5, %v4201_v37 }
0x1cf6   :  { %v3080_v61 = vpop.permute.xlu1 %3079 }
0x1cf7   :  { %3082 = vst.msk [vmem:[#allocation2 + $0x2] sm:$0x3] %vm2432_vm6, %v3080_v61 }
0x1d5e   :  { %v4366_v11 = vpop.permute.xlu1 %4365 }
0x1d5f   :  { %4368 = vst.msk [vmem:[#allocation2 + $0x6] sm:$0x3] %vm2432_vm6, %v4366_v11 }
0x1d66   :  { %v4369_v28 = vld [vmem:[#allocation2] sm:$0xff] }
0x1d67   :  { %v4449_v39 = vrot.slane %v4369_v28, %v7491_v59  ;;  %v4442_v17 = vcombine.high %v4369_v28, %v4369_v28 }
0x1d69   :  { %v4457_v1 = vcombine.high %v4449_v39, %v4449_v39  ;;  %v4456_v29 = vrot.slane %v4442_v17, %v7491_v59 }
0x1d6b   :  { %4527 = vmatprep.mubr.f32.mxu1 %v4457_v1  ;;  %v4458_v48 = vcombine.high %v4456_v29, %v4456_v29 }
0x1d6c   :  { %4528 = vmatmul.mubr.f32.vlgmr.msra.gmra.mrb[44].mxu1 %v4449_v39 }
0x1d6d   :  { %4597 = vmatprep.mubr.f32.mxu0 %v4458_v48 }
0x1d6e   :  { %4598 = vmatmul.mubr.f32.vlgmr.msra.gmra.mrb[52].mxu0 %v4456_v29 }
0x1e3f   :  { %v4891_v38 = vpop.f32.mrb[44].mxu1 }
0x1e40   :  { %v4892_v45 = vpop.f32.mrb[45].mxu1 }
0x1e41   :  { %v4893_v15 = vadd.f32 %v4892_v45, %v4891_v38  ;;  %v4926_v19 = vpop.f32.mrb[52].mxu0 }
0x1e42   :  { %v4927_v21 = vpop.f32.mrb[53].mxu0 }
0x1e43   :  { %v4530_v27 = vadd.f32 %v4893_v15, %v4749_v42  ;;  %v4928_v22 = vadd.f32 %v4927_v21, %v4926_v19 }
0x1e45   :  { %v4600_v54 = vadd.f32 %v4928_v22, %v4530_v27 }
0x1e47   :  { %4603 = vst [vmem:[#allocation17] sm:$0x3] %v4600_v54 }
0x1e48   :  { %6397 = shalt.err (!%p6394_p12)
}
0x1e49   :  { %s6398_s0 = scalar_lea.hbm %s7581_s15, 32 }
0x1e4a   :  { %p6399_p13 = scmp.ne.s32.totalorder %s7581_s15, %s6398_s0  ;;  %p6402_p0 = scmp.lt.u32.totalorder %s6398_s0, %s7581_s15 }
0x1e4c   :  { %p6404_p1 = pnand %p6402_p0, %p6399_p13 }
0x1e4e   :  { %6407 = shalt.err (!%p6404_p1)
}
0x1e4f   :  { %4613 = dma.vmem_to_hbm [thread:$0]  %s4611_s21, 32, %s7581_s15, [#allocation5]  }
0x1e50   :  { %6418 = dma.done.wait [#allocation5], 32  }
0x1e51   :  { %6419 = vsyncadd [#allocation5], 4294967264 }
0x1e52   :  { %4617 = vsyncpa [#allocation4], 1 }
0x1e53   :  { %4618 = vsyncpa [#allocation7], 1 }
0x1e54   :  { %4619 = vsyncpa [#allocation10], 1 }
0x1e55   :  { %4620 = vsyncpa [#allocation13], 1 }
0x1e56   :  { %4621 = vsyncpa [#allocation16], 1 }
0x1e57   :  { %4622 = vsyncpa [#allocation5], 1 }

</bundles_post_ra>
